<compile_context>
chip_gen: v7x
topology: tpu7x:2x2x1
jax: 0.10.0
libtpu: 0.0.40
codegen_flags: <defaults>
</compile_context>

<pallas_src>
import functools

import jax
import jax.numpy as jnp
from jax import lax
from jax.experimental import pallas as pl
from jax.experimental.pallas import tpu as pltpu

F32 = jnp.float32
KF = KT = 3  # conv2d kernel size (3x3), as in the torch config


def _elu(y):
    # torch.nn.ELU(alpha=1.0); exp is only evaluated on the clamped (<=0) branch
    # so the discarded positive branch can't overflow / waste EUP work.
    return jnp.where(y > 0, y, jnp.exp(jnp.minimum(y, 0.0)) - 1.0)


# ------------------------------ fused kernel -------------------------------

def _crn_kernel(*refs, conv_cfgs, F, T, D, H, N, A):
    """Fully fused CRN forward for ONE batch element (grid iterates over batch).

    refs = [x,
            (w_l, scale_l, bias_l) for each conv layer,
            wir, wiz, win, whr, whz, whn, br, bz, bin, bhn,          # GRU
            aw1, asc, abi, awf, abf,                                  # azi heads
            o,                                                        # output
            apad_0 .. apad_{L-1}, gx, hs]                             # VMEM scratch

    Layouts (per batch element):
      conv activations: (C, F, T)        (channels on sublanes, F*T on lanes)
      GRU sequence:     (T, D) / (T, H)
      output:           (N, A, T) block of the (B, N, A, T) result
    """
    L = len(conv_cfgs)
    x_ref = refs[0]
    conv_refs = refs[1:1 + 3 * L]
    idx = 1 + 3 * L
    (wir_ref, wiz_ref, win_ref, whr_ref, whz_ref, whn_ref,
     br_ref, bz_ref, bin_ref, bhn_ref,
     aw1_ref, asc_ref, abi_ref, awf_ref, abf_ref,
     o_ref) = refs[idx:idx + 16]
    scratch = refs[idx + 16:]
    pad_refs = scratch[:L]
    gx_ref, hs_ref = scratch[L], scratch[L + 1]

    # ------------------------------ CNN stack ------------------------------
    f_cur = F
    act = x_ref[0]                                     # (Cin0, F, T)
    for l, (cin, cout) in enumerate(conv_cfgs):
        apad = pad_refs[l]                             # (cin, f_cur+2, T+2)
        apad[...] = jnp.zeros_like(apad)               # freq same-pad, time causal left-pad
        apad[:, 1:f_cur + 1, 2:T + 2] = act

        # im2col: slice each 3x3 tap from the padded scratch ref and do ONE
        # matmul with contraction K = 9*cin and a lane-dense (cout, f_cur*T) output.
        cols = []
        for kf in range(KF):
            for kt in range(KT):
                cols.append(
                    apad[:, kf:kf + f_cur, kt:kt + T].reshape(cin, f_cur * T))
        xcol = jnp.concatenate(cols, axis=0)           # (9*cin, f_cur*T)

        w = conv_refs[3 * l][...]                      # (cout, 9*cin)
        sc = conv_refs[3 * l + 1][...]                 # (cout, 1)  folded BN scale
        bi = conv_refs[3 * l + 2][...]                 # (cout, 1)  folded conv-bias+BN shift
        y = jnp.dot(w, xcol, preferred_element_type=F32)     # (cout, f_cur*T)
        y = _elu(y * sc + bi)

        # MaxPool2d(kernel=(2,1), stride=(2,1)) over the frequency axis.
        y3 = y.reshape(cout, f_cur // 2, 2 * T)        # [:, fh, fp*T + t]
        act = jnp.maximum(y3[:, :, :T], y3[:, :, T:])  # (cout, f_cur//2, T)
        f_cur //= 2

    # ------------------------- GRU (single layer) --------------------------
    # torch: x.view(b, c*f, t).permute(0,2,1)  ->  per-b sequence (T, D), D = C*F (c-major)
    X = act.reshape(D, T).T                            # (T, D)

    # Hoisted input projections (one matmul per gate over all T steps).
    gx_ref[0] = jnp.dot(X, wir_ref[...], preferred_element_type=F32) + br_ref[...]
    gx_ref[1] = jnp.dot(X, wiz_ref[...], preferred_element_type=F32) + bz_ref[...]
    gx_ref[2] = jnp.dot(X, win_ref[...], preferred_element_type=F32) + bin_ref[...]

    whr = whr_ref[...]
    whz = whz_ref[...]
    whn = whn_ref[...]
    bhn = bhn_ref[...]

    def step(t, h):                                    # h: (1, H)
        gr = gx_ref[0, pl.ds(t, 1), :]
        gz = gx_ref[1, pl.ds(t, 1), :]
        gn = gx_ref[2, pl.ds(t, 1), :]
        r = jax.nn.sigmoid(gr + jnp.dot(h, whr, preferred_element_type=F32))
        z = jax.nn.sigmoid(gz + jnp.dot(h, whz, preferred_element_type=F32))
        n = jnp.tanh(gn + r * (jnp.dot(h, whn, preferred_element_type=F32) + bhn))
        h_new = (1.0 - z) * n + z * h
        hs_ref[pl.ds(t, 1), :] = h_new
        return h_new

    lax.fori_loop(0, T, step, jnp.zeros((1, H), dtype=F32),
                  unroll=True if T <= 16 else 4)

    # ------------------ azimuth mapping heads (chained 1x1) ----------------
    xh = hs_ref[...]                                   # (T, H)
    for n_i in range(N):
        y1 = jnp.dot(xh, aw1_ref[n_i], preferred_element_type=F32)
        xh = _elu(y1 * asc_ref[n_i] + abi_ref[n_i])    # chains into the next head
        out_n = jnp.dot(xh, awf_ref[n_i], preferred_element_type=F32) + abf_ref[n_i]
        o_ref[0, n_i, :, :] = out_n.T                  # (A, T)


# ------------------------------ pallas_call glue ----------------------------

def _full_block_spec(a):
    ndim = a.ndim

    def index_map(b):
        return (0,) * ndim

    return pl.BlockSpec(a.shape, index_map)


def crn_forward(params, x):
    """x: (B, C_in, F, T) float32 (PyTorch NCHW). Returns (B, output_num, azi_size, T)."""
    B, Cin0, F, T = x.shape
    conv = params["cnn"]                               # list of (w, scale, bias)
    L = len(conv)

    conv_cfgs = []
    cin, f_cur = Cin0, F
    for (w, _, _) in conv:
        cout = w.shape[0]
        conv_cfgs.append((cin, cout))
        cin = cout
        f_cur //= 2
    C_last, F_last = cin, f_cur
    D = C_last * F_last
    H = params["gru"]["whr"].shape[0]
    N = params["azi"]["w1"].shape[0]
    A = params["azi"]["wf"].shape[-1]
    assert D == params["gru"]["wir"].shape[0], (D, params["gru"]["wir"].shape)

    kernel = functools.partial(_crn_kernel, conv_cfgs=tuple(conv_cfgs),
                               F=F, T=T, D=D, H=H, N=N, A=A)

    g, az = params["gru"], params["azi"]
    conv_flat = [a for blk in conv for a in blk]
    args = ([x.astype(F32)] + conv_flat +
            [g["wir"], g["wiz"], g["win"], g["whr"], g["whz"], g["whn"],
             g["br"], g["bz"], g["bin"], g["bhn"],
             az["w1"], az["sc"], az["bi"], az["wf"], az["bf"]])

    in_specs = [pl.BlockSpec((1, Cin0, F, T), lambda b: (b, 0, 0, 0))]
    in_specs += [_full_block_spec(a) for a in args[1:]]

    scratch_shapes = []
    f_cur = F
    for (cin_l, _) in conv_cfgs:
        scratch_shapes.append(pltpu.VMEM((cin_l, f_cur + 2, T + 2), F32))
        f_cur //= 2
    scratch_shapes += [pltpu.VMEM((3, T, H), F32),     # hoisted r/z/n input projections
                       pltpu.VMEM((T, H), F32)]        # GRU output sequence

    return pl.pallas_call(
        kernel,
        out_shape=jax.ShapeDtypeStruct((B, N, A, T), F32),
        grid=(B,),
        in_specs=in_specs,
        out_specs=pl.BlockSpec((1, N, A, T), lambda b: (b, 0, 0, 0)),
        scratch_shapes=scratch_shapes,
        compiler_params=pltpu.CompilerParams(
            dimension_semantics=("parallel",),         # v7x: one batch element per TC
            vmem_limit_bytes=32 * 1024 * 1024,
        ),
    )(*args)


# ------------------------------ parameter setup -----------------------------

def build_params(key, *, in_ch, filt, layer_num, gru_in, gru_hidden,
                 output_num, azi_size, eps=1e-5):
    def nrm(k, shape, s=0.1):
        return s * jax.random.normal(k, shape, dtype=F32)

    def uni(k, shape, lo, hi):
        return jax.random.uniform(k, shape, dtype=F32, minval=lo, maxval=hi)

    keys = iter(jax.random.split(key, 128))

    # --- CNN blocks: Conv2d weight/bias + BatchNorm2d (inference affine fold) ---
    cnn = []
    cin = in_ch
    for _ in range(layer_num):
        w_oihw = nrm(next(keys), (filt, cin, KF, KT))          # torch (out, in, kH, kW)
        b = nrm(next(keys), (filt,))
        gamma = uni(next(keys), (filt,), 0.5, 1.5)
        beta = nrm(next(keys), (filt,))
        mean = nrm(next(keys), (filt,))
        var = uni(next(keys), (filt,), 0.5, 1.5)
        bn_scale = gamma / jnp.sqrt(var + eps)
        bias_total = (b - mean) * bn_scale + beta              # conv bias folded through BN
        # (Cout, Cin, KF, KT) -> (Cout, KF*KT*Cin), matching the in-kernel im2col order.
        w = jnp.transpose(w_oihw, (0, 2, 3, 1)).reshape(filt, KF * KT * cin)
        cnn.append((w, bn_scale.reshape(filt, 1), bias_total.reshape(filt, 1)))
        cin = filt

    # --- GRU (single layer, PyTorch gate order [r, z, n]), gates split apart ---
    Hh = gru_hidden
    wih = nrm(next(keys), (3 * Hh, gru_in))
    whh = nrm(next(keys), (3 * Hh, Hh))
    bih = nrm(next(keys), (3 * Hh,))
    bhh = nrm(next(keys), (3 * Hh,))
    gru = dict(
        wir=wih[0:Hh].T, wiz=wih[Hh:2 * Hh].T, win=wih[2 * Hh:3 * Hh].T,
        whr=whh[0:Hh].T, whz=whh[Hh:2 * Hh].T, whn=whh[2 * Hh:3 * Hh].T,
        br=(bih[0:Hh] + bhh[0:Hh]).reshape(1, Hh),
        bz=(bih[Hh:2 * Hh] + bhh[Hh:2 * Hh]).reshape(1, Hh),
        bin=bih[2 * Hh:3 * Hh].reshape(1, Hh),
        bhn=bhh[2 * Hh:3 * Hh].reshape(1, Hh),
    )

    # --- azimuth mapping heads: Conv1D_Block(H->H,k=1) + final Conv1d(H->A,k=1) ---
    w1s, scs, bis, wfs, bfs = [], [], [], [], []
    for _ in range(output_num):
        w_c = nrm(next(keys), (Hh, Hh, 1))
        b_c = nrm(next(keys), (Hh,))
        gamma = uni(next(keys), (Hh,), 0.5, 1.5)
        beta = nrm(next(keys), (Hh,))
        mean = nrm(next(keys), (Hh,))
        var = uni(next(keys), (Hh,), 0.5, 1.5)
        s = gamma / jnp.sqrt(var + eps)
        bt = (b_c - mean) * s + beta
        w_f = nrm(next(keys), (azi_size, Hh, 1))
        b_f = nrm(next(keys), (azi_size,))
        w1s.append(jnp.transpose(w_c[:, :, 0]))                # (H_in, H_out)
        scs.append(s.reshape(1, Hh))
        bis.append(bt.reshape(1, Hh))
        wfs.append(jnp.transpose(w_f[:, :, 0]))                # (H, A)
        bfs.append(b_f.reshape(1, azi_size))
    azi = dict(w1=jnp.stack(w1s), sc=jnp.stack(scs), bi=jnp.stack(bis),
               wf=jnp.stack(wfs), bf=jnp.stack(bfs))

    return dict(cnn=cnn, gru=gru, azi=azi)


# ----------------------------------- main -----------------------------------

if __name__ == "__main__":
    # Synthetic config consistent with the torch module's __init__.
    config = {
        "input_audio_channel": 3,                               # -> 4 input channels
        "CNN": {"layer_num": 2, "kernel_size": 3, "filter": 8,
                "max_pool": {"kernel_size": (2, 1), "stride": (2, 1)}},
        "GRU": {"input_size": 32, "hidden_size": 32,
                "num_layers": 1, "batch_first": True},
    }
    output_num, azi_size = 2, 9
    B, F, T = 2, 16, 8
    in_ch = 2 * (config["input_audio_channel"] - 1)

    key = jax.random.PRNGKey(0)
    kx, kp = jax.random.split(key)
    x = jax.random.normal(kx, (B, in_ch, F, T), dtype=F32)

    params = build_params(
        kp,
        in_ch=in_ch,
        filt=config["CNN"]["filter"],
        layer_num=config["CNN"]["layer_num"],
        gru_in=config["GRU"]["input_size"],
        gru_hidden=config["GRU"]["hidden_size"],
        output_num=output_num,
        azi_size=azi_size,
    )

    fwd = jax.jit(crn_forward)
    out = jax.block_until_ready(fwd(params, x))
    assert out.shape == (B, output_num, azi_size, T), out.shape
    assert bool(jnp.all(jnp.isfinite(out)))
    print("KERNEL_OK")
</pallas_src>

<mosaic_0001>
module attributes {stable_mosaic.version = 11 : i64} {
  func.func @_crn_kernel(%arg0: i32, %arg1: memref<1x4x16x8xf32, #tpu.memory_space<vmem>>, %arg2: memref<8x36xf32, #tpu.memory_space<vmem>>, %arg3: memref<8x1xf32, #tpu.memory_space<vmem>>, %arg4: memref<8x1xf32, #tpu.memory_space<vmem>>, %arg5: memref<8x72xf32, #tpu.memory_space<vmem>>, %arg6: memref<8x1xf32, #tpu.memory_space<vmem>>, %arg7: memref<8x1xf32, #tpu.memory_space<vmem>>, %arg8: memref<32x32xf32, #tpu.memory_space<vmem>>, %arg9: memref<32x32xf32, #tpu.memory_space<vmem>>, %arg10: memref<32x32xf32, #tpu.memory_space<vmem>>, %arg11: memref<32x32xf32, #tpu.memory_space<vmem>>, %arg12: memref<32x32xf32, #tpu.memory_space<vmem>>, %arg13: memref<32x32xf32, #tpu.memory_space<vmem>>, %arg14: memref<1x32xf32, #tpu.memory_space<vmem>>, %arg15: memref<1x32xf32, #tpu.memory_space<vmem>>, %arg16: memref<1x32xf32, #tpu.memory_space<vmem>>, %arg17: memref<1x32xf32, #tpu.memory_space<vmem>>, %arg18: memref<2x32x32xf32, #tpu.memory_space<vmem>>, %arg19: memref<2x1x32xf32, #tpu.memory_space<vmem>>, %arg20: memref<2x1x32xf32, #tpu.memory_space<vmem>>, %arg21: memref<2x32x9xf32, #tpu.memory_space<vmem>>, %arg22: memref<2x1x9xf32, #tpu.memory_space<vmem>>, %arg23: memref<1x2x9x8xf32, #tpu.memory_space<vmem>>, %arg24: memref<4x18x10xf32, #tpu.memory_space<vmem>>, %arg25: memref<8x10x10xf32, #tpu.memory_space<vmem>>, %arg26: memref<3x8x32xf32, #tpu.memory_space<vmem>>, %arg27: memref<8x32xf32, #tpu.memory_space<vmem>>) attributes {dimension_semantics = [#tpu.dimension_semantics<parallel>], iteration_bounds = array<i64: 2>, scalar_prefetch = 0 : i64, scratch_operands = 4 : i64, tpu.core_type = #tpu.core_type<tc>, window_params = [{transform_indices = @transform_0, window_bounds = array<i64: 1, 4, 16, 8>}, {pipeline_mode = #tpu.pipeline_mode<synchronous>, transform_indices = @transform_1, window_bounds = array<i64: 8, 36>}, {pipeline_mode = #tpu.pipeline_mode<synchronous>, transform_indices = @transform_2, window_bounds = array<i64: 8, 1>}, {pipeline_mode = #tpu.pipeline_mode<synchronous>, transform_indices = @transform_3, window_bounds = array<i64: 8, 1>}, {pipeline_mode = #tpu.pipeline_mode<synchronous>, transform_indices = @transform_4, window_bounds = array<i64: 8, 72>}, {pipeline_mode = #tpu.pipeline_mode<synchronous>, transform_indices = @transform_5, window_bounds = array<i64: 8, 1>}, {pipeline_mode = #tpu.pipeline_mode<synchronous>, transform_indices = @transform_6, window_bounds = array<i64: 8, 1>}, {pipeline_mode = #tpu.pipeline_mode<synchronous>, transform_indices = @transform_7, window_bounds = array<i64: 32, 32>}, {pipeline_mode = #tpu.pipeline_mode<synchronous>, transform_indices = @transform_8, window_bounds = array<i64: 32, 32>}, {pipeline_mode = #tpu.pipeline_mode<synchronous>, transform_indices = @transform_9, window_bounds = array<i64: 32, 32>}, {pipeline_mode = #tpu.pipeline_mode<synchronous>, transform_indices = @transform_10, window_bounds = array<i64: 32, 32>}, {pipeline_mode = #tpu.pipeline_mode<synchronous>, transform_indices = @transform_11, window_bounds = array<i64: 32, 32>}, {pipeline_mode = #tpu.pipeline_mode<synchronous>, transform_indices = @transform_12, window_bounds = array<i64: 32, 32>}, {pipeline_mode = #tpu.pipeline_mode<synchronous>, transform_indices = @transform_13, window_bounds = array<i64: 1, 32>}, {pipeline_mode = #tpu.pipeline_mode<synchronous>, transform_indices = @transform_14, window_bounds = array<i64: 1, 32>}, {pipeline_mode = #tpu.pipeline_mode<synchronous>, transform_indices = @transform_15, window_bounds = array<i64: 1, 32>}, {pipeline_mode = #tpu.pipeline_mode<synchronous>, transform_indices = @transform_16, window_bounds = array<i64: 1, 32>}, {pipeline_mode = #tpu.pipeline_mode<synchronous>, transform_indices = @transform_17, window_bounds = array<i64: 2, 32, 32>}, {pipeline_mode = #tpu.pipeline_mode<synchronous>, transform_indices = @transform_18, window_bounds = array<i64: 2, 1, 32>}, {pipeline_mode = #tpu.pipeline_mode<synchronous>, transform_indices = @transform_19, window_bounds = array<i64: 2, 1, 32>}, {pipeline_mode = #tpu.pipeline_mode<synchronous>, transform_indices = @transform_20, window_bounds = array<i64: 2, 32, 9>}, {pipeline_mode = #tpu.pipeline_mode<synchronous>, transform_indices = @transform_21, window_bounds = array<i64: 2, 1, 9>}, {transform_indices = @transform_22, window_bounds = array<i64: 1, 2, 9, 8>}]} {
    %c0 = arith.constant 0 : index
    %c0_0 = arith.constant 0 : index
    %c0_1 = arith.constant 0 : index
    %c0_2 = arith.constant 0 : index
    %0 = vector.load %arg1[%c0, %c0_0, %c0_1, %c0_2] : memref<1x4x16x8xf32, #tpu.memory_space<vmem>>, vector<1x4x16x8xf32>
    %1 = vector.shape_cast %0 : vector<1x4x16x8xf32> to vector<4x16x8xf32>
    %cst = arith.constant 0.000000e+00 : f32
    %2 = vector.broadcast %cst : f32 to vector<4x18x10xf32>
    %c0_3 = arith.constant 0 : index
    %c0_4 = arith.constant 0 : index
    %c0_5 = arith.constant 0 : index
    %3 = vector.load %arg24[%c0_3, %c0_4, %c0_5] : memref<4x18x10xf32, #tpu.memory_space<vmem>>, vector<4x18x10xf32>
    tpu.vector_store %arg24[%c0_3, %c0_4, %c0_5], %2 {strides = array<i32>} : memref<4x18x10xf32, #tpu.memory_space<vmem>>, vector<4x18x10xf32>,
    %c0_6 = arith.constant 0 : index
    %c1 = arith.constant 1 : index
    %c2 = arith.constant 2 : index
    %4 = vector.load %arg24[%c0_6, %c1, %c2] : memref<4x18x10xf32, #tpu.memory_space<vmem>>, vector<4x16x8xf32>
    tpu.vector_store %arg24[%c0_6, %c1, %c2], %1 {strides = array<i32>} : memref<4x18x10xf32, #tpu.memory_space<vmem>>, vector<4x16x8xf32>,
    %c0_7 = arith.constant 0 : index
    %c0_8 = arith.constant 0 : index
    %c0_9 = arith.constant 0 : index
    %5 = vector.load %arg24[%c0_7, %c0_8, %c0_9] : memref<4x18x10xf32, #tpu.memory_space<vmem>>, vector<4x16x8xf32>
    %6 = vector.shape_cast %5 : vector<4x16x8xf32> to vector<4x128xf32>
    %c0_10 = arith.constant 0 : index
    %c0_11 = arith.constant 0 : index
    %c1_12 = arith.constant 1 : index
    %7 = vector.load %arg24[%c0_10, %c0_11, %c1_12] : memref<4x18x10xf32, #tpu.memory_space<vmem>>, vector<4x16x8xf32>
    %8 = vector.shape_cast %7 : vector<4x16x8xf32> to vector<4x128xf32>
    %c0_13 = arith.constant 0 : index
    %c0_14 = arith.constant 0 : index
    %c2_15 = arith.constant 2 : index
    %9 = vector.load %arg24[%c0_13, %c0_14, %c2_15] : memref<4x18x10xf32, #tpu.memory_space<vmem>>, vector<4x16x8xf32>
    %10 = vector.shape_cast %9 : vector<4x16x8xf32> to vector<4x128xf32>
    %c0_16 = arith.constant 0 : index
    %c1_17 = arith.constant 1 : index
    %c0_18 = arith.constant 0 : index
    %11 = vector.load %arg24[%c0_16, %c1_17, %c0_18] : memref<4x18x10xf32, #tpu.memory_space<vmem>>, vector<4x16x8xf32>
    %12 = vector.shape_cast %11 : vector<4x16x8xf32> to vector<4x128xf32>
    %c0_19 = arith.constant 0 : index
    %c1_20 = arith.constant 1 : index
    %c1_21 = arith.constant 1 : index
    %13 = vector.load %arg24[%c0_19, %c1_20, %c1_21] : memref<4x18x10xf32, #tpu.memory_space<vmem>>, vector<4x16x8xf32>
    %14 = vector.shape_cast %13 : vector<4x16x8xf32> to vector<4x128xf32>
    %c0_22 = arith.constant 0 : index
    %c1_23 = arith.constant 1 : index
    %c2_24 = arith.constant 2 : index
    %15 = vector.load %arg24[%c0_22, %c1_23, %c2_24] : memref<4x18x10xf32, #tpu.memory_space<vmem>>, vector<4x16x8xf32>
    %16 = vector.shape_cast %15 : vector<4x16x8xf32> to vector<4x128xf32>
    %c0_25 = arith.constant 0 : index
    %c2_26 = arith.constant 2 : index
    %c0_27 = arith.constant 0 : index
    %17 = vector.load %arg24[%c0_25, %c2_26, %c0_27] : memref<4x18x10xf32, #tpu.memory_space<vmem>>, vector<4x16x8xf32>
    %18 = vector.shape_cast %17 : vector<4x16x8xf32> to vector<4x128xf32>
    %c0_28 = arith.constant 0 : index
    %c2_29 = arith.constant 2 : index
    %c1_30 = arith.constant 1 : index
    %19 = vector.load %arg24[%c0_28, %c2_29, %c1_30] : memref<4x18x10xf32, #tpu.memory_space<vmem>>, vector<4x16x8xf32>
    %20 = vector.shape_cast %19 : vector<4x16x8xf32> to vector<4x128xf32>
    %c0_31 = arith.constant 0 : index
    %c2_32 = arith.constant 2 : index
    %c2_33 = arith.constant 2 : index
    %21 = vector.load %arg24[%c0_31, %c2_32, %c2_33] : memref<4x18x10xf32, #tpu.memory_space<vmem>>, vector<4x16x8xf32>
    %22 = vector.shape_cast %21 : vector<4x16x8xf32> to vector<4x128xf32>
    %23 = tpu.concatenate %6, %8, %10, %12, %14, %16, %18, %20, %22 in 0 : vector<4x128xf32>, vector<4x128xf32>, vector<4x128xf32>, vector<4x128xf32>, vector<4x128xf32>, vector<4x128xf32>, vector<4x128xf32>, vector<4x128xf32>, vector<4x128xf32> -> vector<36x128xf32>
    %c0_34 = arith.constant 0 : index
    %c0_35 = arith.constant 0 : index
    %24 = vector.load %arg2[%c0_34, %c0_35] : memref<8x36xf32, #tpu.memory_space<vmem>>, vector<8x36xf32>
    %c0_36 = arith.constant 0 : index
    %c0_37 = arith.constant 0 : index
    %25 = vector.load %arg3[%c0_36, %c0_37] : memref<8x1xf32, #tpu.memory_space<vmem>>, vector<8x1xf32>
    %c0_38 = arith.constant 0 : index
    %c0_39 = arith.constant 0 : index
    %26 = vector.load %arg4[%c0_38, %c0_39] : memref<8x1xf32, #tpu.memory_space<vmem>>, vector<8x1xf32>
    %cst_40 = arith.constant dense<0.000000e+00> : vector<8x128xf32>
    %27 = tpu.matmul %24, %23, %cst_40 {dimension_numbers = #tpu.dot_dimension_numbers<[1], [0], [0], [1], [0, 0, 1, 1], [], []>} : vector<8x36xf32>, vector<36x128xf32>, vector<8x128xf32> -> vector<8x128xf32>
    %28 = vector.broadcast %25 : vector<8x1xf32> to vector<8x128xf32>
    %29 = arith.mulf %27, %28 : vector<8x128xf32>
    %30 = vector.broadcast %26 : vector<8x1xf32> to vector<8x128xf32>
    %31 = arith.addf %29, %30 : vector<8x128xf32>
    %cst_41 = arith.constant 0.000000e+00 : f32
    %32 = vector.broadcast %cst_41 : f32 to vector<8x128xf32>
    %33 = arith.cmpf ogt, %31, %32 : vector<8x128xf32>
    %cst_42 = arith.constant 0.000000e+00 : f32
    %34 = vector.broadcast %cst_42 : f32 to vector<8x128xf32>
    %35 = arith.minimumf %31, %34 : vector<8x128xf32>
    %36 = math.exp %35 : vector<8x128xf32>
    %cst_43 = arith.constant 1.000000e+00 : f32
    %37 = vector.broadcast %cst_43 : f32 to vector<8x128xf32>
    %38 = arith.subf %36, %37 : vector<8x128xf32>
    %39 = arith.select %33, %31, %38 : vector<8x128xi1>, vector<8x128xf32>
    %40 = vector.shape_cast %39 : vector<8x128xf32> to vector<8x8x16xf32>
    %41 = vector.extract_strided_slice %40 {offsets = [0, 0, 0], sizes = [8, 8, 8], strides = [1, 1, 1]} : vector<8x8x16xf32> to vector<8x8x8xf32>
    %42 = vector.extract_strided_slice %40 {offsets = [0, 0, 8], sizes = [8, 8, 8], strides = [1, 1, 1]} : vector<8x8x16xf32> to vector<8x8x8xf32>
    %43 = arith.maximumf %41, %42 : vector<8x8x8xf32>
    %cst_44 = arith.constant 0.000000e+00 : f32
    %44 = vector.broadcast %cst_44 : f32 to vector<8x10x10xf32>
    %c0_45 = arith.constant 0 : index
    %c0_46 = arith.constant 0 : index
    %c0_47 = arith.constant 0 : index
    %45 = vector.load %arg25[%c0_45, %c0_46, %c0_47] : memref<8x10x10xf32, #tpu.memory_space<vmem>>, vector<8x10x10xf32>
    tpu.vector_store %arg25[%c0_45, %c0_46, %c0_47], %44 {strides = array<i32>} : memref<8x10x10xf32, #tpu.memory_space<vmem>>, vector<8x10x10xf32>,
    %c0_48 = arith.constant 0 : index
    %c1_49 = arith.constant 1 : index
    %c2_50 = arith.constant 2 : index
    %46 = vector.load %arg25[%c0_48, %c1_49, %c2_50] : memref<8x10x10xf32, #tpu.memory_space<vmem>>, vector<8x8x8xf32>
    tpu.vector_store %arg25[%c0_48, %c1_49, %c2_50], %43 {strides = array<i32>} : memref<8x10x10xf32, #tpu.memory_space<vmem>>, vector<8x8x8xf32>,
    %c0_51 = arith.constant 0 : index
    %c0_52 = arith.constant 0 : index
    %c0_53 = arith.constant 0 : index
    %47 = vector.load %arg25[%c0_51, %c0_52, %c0_53] : memref<8x10x10xf32, #tpu.memory_space<vmem>>, vector<8x8x8xf32>
    %48 = vector.shape_cast %47 : vector<8x8x8xf32> to vector<8x64xf32>
    %c0_54 = arith.constant 0 : index
    %c0_55 = arith.constant 0 : index
    %c1_56 = arith.constant 1 : index
    %49 = vector.load %arg25[%c0_54, %c0_55, %c1_56] : memref<8x10x10xf32, #tpu.memory_space<vmem>>, vector<8x8x8xf32>
    %50 = vector.shape_cast %49 : vector<8x8x8xf32> to vector<8x64xf32>
    %c0_57 = arith.constant 0 : index
    %c0_58 = arith.constant 0 : index
    %c2_59 = arith.constant 2 : index
    %51 = vector.load %arg25[%c0_57, %c0_58, %c2_59] : memref<8x10x10xf32, #tpu.memory_space<vmem>>, vector<8x8x8xf32>
    %52 = vector.shape_cast %51 : vector<8x8x8xf32> to vector<8x64xf32>
    %c0_60 = arith.constant 0 : index
    %c1_61 = arith.constant 1 : index
    %c0_62 = arith.constant 0 : index
    %53 = vector.load %arg25[%c0_60, %c1_61, %c0_62] : memref<8x10x10xf32, #tpu.memory_space<vmem>>, vector<8x8x8xf32>
    %54 = vector.shape_cast %53 : vector<8x8x8xf32> to vector<8x64xf32>
    %c0_63 = arith.constant 0 : index
    %c1_64 = arith.constant 1 : index
    %c1_65 = arith.constant 1 : index
    %55 = vector.load %arg25[%c0_63, %c1_64, %c1_65] : memref<8x10x10xf32, #tpu.memory_space<vmem>>, vector<8x8x8xf32>
    %56 = vector.shape_cast %55 : vector<8x8x8xf32> to vector<8x64xf32>
    %c0_66 = arith.constant 0 : index
    %c1_67 = arith.constant 1 : index
    %c2_68 = arith.constant 2 : index
    %57 = vector.load %arg25[%c0_66, %c1_67, %c2_68] : memref<8x10x10xf32, #tpu.memory_space<vmem>>, vector<8x8x8xf32>
    %58 = vector.shape_cast %57 : vector<8x8x8xf32> to vector<8x64xf32>
    %c0_69 = arith.constant 0 : index
    %c2_70 = arith.constant 2 : index
    %c0_71 = arith.constant 0 : index
    %59 = vector.load %arg25[%c0_69, %c2_70, %c0_71] : memref<8x10x10xf32, #tpu.memory_space<vmem>>, vector<8x8x8xf32>
    %60 = vector.shape_cast %59 : vector<8x8x8xf32> to vector<8x64xf32>
    %c0_72 = arith.constant 0 : index
    %c2_73 = arith.constant 2 : index
    %c1_74 = arith.constant 1 : index
    %61 = vector.load %arg25[%c0_72, %c2_73, %c1_74] : memref<8x10x10xf32, #tpu.memory_space<vmem>>, vector<8x8x8xf32>
    %62 = vector.shape_cast %61 : vector<8x8x8xf32> to vector<8x64xf32>
    %c0_75 = arith.constant 0 : index
    %c2_76 = arith.constant 2 : index
    %c2_77 = arith.constant 2 : index
    %63 = vector.load %arg25[%c0_75, %c2_76, %c2_77] : memref<8x10x10xf32, #tpu.memory_space<vmem>>, vector<8x8x8xf32>
    %64 = vector.shape_cast %63 : vector<8x8x8xf32> to vector<8x64xf32>
    %65 = tpu.concatenate %48, %50, %52, %54, %56, %58, %60, %62, %64 in 0 : vector<8x64xf32>, vector<8x64xf32>, vector<8x64xf32>, vector<8x64xf32>, vector<8x64xf32>, vector<8x64xf32>, vector<8x64xf32>, vector<8x64xf32>, vector<8x64xf32> -> vector<72x64xf32>
    %c0_78 = arith.constant 0 : index
    %c0_79 = arith.constant 0 : index
    %66 = vector.load %arg5[%c0_78, %c0_79] : memref<8x72xf32, #tpu.memory_space<vmem>>, vector<8x72xf32>
    %c0_80 = arith.constant 0 : index
    %c0_81 = arith.constant 0 : index
    %67 = vector.load %arg6[%c0_80, %c0_81] : memref<8x1xf32, #tpu.memory_space<vmem>>, vector<8x1xf32>
    %c0_82 = arith.constant 0 : index
    %c0_83 = arith.constant 0 : index
    %68 = vector.load %arg7[%c0_82, %c0_83] : memref<8x1xf32, #tpu.memory_space<vmem>>, vector<8x1xf32>
    %cst_84 = arith.constant dense<0.000000e+00> : vector<8x64xf32>
    %69 = tpu.matmul %66, %65, %cst_84 {dimension_numbers = #tpu.dot_dimension_numbers<[1], [0], [0], [1], [0, 0, 1, 1], [], []>} : vector<8x72xf32>, vector<72x64xf32>, vector<8x64xf32> -> vector<8x64xf32>
    %70 = vector.broadcast %67 : vector<8x1xf32> to vector<8x64xf32>
    %71 = arith.mulf %69, %70 : vector<8x64xf32>
    %72 = vector.broadcast %68 : vector<8x1xf32> to vector<8x64xf32>
    %73 = arith.addf %71, %72 : vector<8x64xf32>
    %cst_85 = arith.constant 0.000000e+00 : f32
    %74 = vector.broadcast %cst_85 : f32 to vector<8x64xf32>
    %75 = arith.cmpf ogt, %73, %74 : vector<8x64xf32>
    %cst_86 = arith.constant 0.000000e+00 : f32
    %76 = vector.broadcast %cst_86 : f32 to vector<8x64xf32>
    %77 = arith.minimumf %73, %76 : vector<8x64xf32>
    %78 = math.exp %77 : vector<8x64xf32>
    %cst_87 = arith.constant 1.000000e+00 : f32
    %79 = vector.broadcast %cst_87 : f32 to vector<8x64xf32>
    %80 = arith.subf %78, %79 : vector<8x64xf32>
    %81 = arith.select %75, %73, %80 : vector<8x64xi1>, vector<8x64xf32>
    %82 = vector.shape_cast %81 : vector<8x64xf32> to vector<8x4x16xf32>
    %83 = vector.extract_strided_slice %82 {offsets = [0, 0, 0], sizes = [8, 4, 8], strides = [1, 1, 1]} : vector<8x4x16xf32> to vector<8x4x8xf32>
    %84 = vector.extract_strided_slice %82 {offsets = [0, 0, 8], sizes = [8, 4, 8], strides = [1, 1, 1]} : vector<8x4x16xf32> to vector<8x4x8xf32>
    %85 = arith.maximumf %83, %84 : vector<8x4x8xf32>
    %86 = vector.shape_cast %85 : vector<8x4x8xf32> to vector<32x8xf32>
    %87 = tpu.transpose %86, [1, 0] : vector<32x8xf32> -> vector<8x32xf32>
    %c0_88 = arith.constant 0 : index
    %c0_89 = arith.constant 0 : index
    %88 = vector.load %arg8[%c0_88, %c0_89] : memref<32x32xf32, #tpu.memory_space<vmem>>, vector<32x32xf32>
    %cst_90 = arith.constant dense<0.000000e+00> : vector<8x32xf32>
    %89 = tpu.matmul %87, %88, %cst_90 {dimension_numbers = #tpu.dot_dimension_numbers<[1], [0], [0], [1], [0, 0, 1, 1], [], []>} : vector<8x32xf32>, vector<32x32xf32>, vector<8x32xf32> -> vector<8x32xf32>
    %c0_91 = arith.constant 0 : index
    %c0_92 = arith.constant 0 : index
    %90 = vector.load %arg14[%c0_91, %c0_92] : memref<1x32xf32, #tpu.memory_space<vmem>>, vector<1x32xf32>
    %91 = vector.broadcast %90 : vector<1x32xf32> to vector<8x32xf32>
    %92 = arith.addf %89, %91 : vector<8x32xf32>
    %c0_93 = arith.constant 0 : index
    %c0_94 = arith.constant 0 : index
    %c0_95 = arith.constant 0 : index
    %93 = vector.load %arg26[%c0_93, %c0_94, %c0_95] : memref<3x8x32xf32, #tpu.memory_space<vmem>>, vector<1x8x32xf32>
    %94 = vector.shape_cast %93 : vector<1x8x32xf32> to vector<8x32xf32>
    %95 = vector.shape_cast %92 : vector<8x32xf32> to vector<1x8x32xf32>
    tpu.vector_store %arg26[%c0_93, %c0_94, %c0_95], %95 {strides = array<i32>} : memref<3x8x32xf32, #tpu.memory_space<vmem>>, vector<1x8x32xf32>,
    %c0_96 = arith.constant 0 : index
    %c0_97 = arith.constant 0 : index
    %96 = vector.load %arg9[%c0_96, %c0_97] : memref<32x32xf32, #tpu.memory_space<vmem>>, vector<32x32xf32>
    %cst_98 = arith.constant dense<0.000000e+00> : vector<8x32xf32>
    %97 = tpu.matmul %87, %96, %cst_98 {dimension_numbers = #tpu.dot_dimension_numbers<[1], [0], [0], [1], [0, 0, 1, 1], [], []>} : vector<8x32xf32>, vector<32x32xf32>, vector<8x32xf32> -> vector<8x32xf32>
    %c0_99 = arith.constant 0 : index
    %c0_100 = arith.constant 0 : index
    %98 = vector.load %arg15[%c0_99, %c0_100] : memref<1x32xf32, #tpu.memory_space<vmem>>, vector<1x32xf32>
    %99 = vector.broadcast %98 : vector<1x32xf32> to vector<8x32xf32>
    %100 = arith.addf %97, %99 : vector<8x32xf32>
    %c1_101 = arith.constant 1 : index
    %c0_102 = arith.constant 0 : index
    %c0_103 = arith.constant 0 : index
    %101 = vector.load %arg26[%c1_101, %c0_102, %c0_103] : memref<3x8x32xf32, #tpu.memory_space<vmem>>, vector<1x8x32xf32>
    %102 = vector.shape_cast %101 : vector<1x8x32xf32> to vector<8x32xf32>
    %103 = vector.shape_cast %100 : vector<8x32xf32> to vector<1x8x32xf32>
    tpu.vector_store %arg26[%c1_101, %c0_102, %c0_103], %103 {strides = array<i32>} : memref<3x8x32xf32, #tpu.memory_space<vmem>>, vector<1x8x32xf32>,
    %c0_104 = arith.constant 0 : index
    %c0_105 = arith.constant 0 : index
    %104 = vector.load %arg10[%c0_104, %c0_105] : memref<32x32xf32, #tpu.memory_space<vmem>>, vector<32x32xf32>
    %cst_106 = arith.constant dense<0.000000e+00> : vector<8x32xf32>
    %105 = tpu.matmul %87, %104, %cst_106 {dimension_numbers = #tpu.dot_dimension_numbers<[1], [0], [0], [1], [0, 0, 1, 1], [], []>} : vector<8x32xf32>, vector<32x32xf32>, vector<8x32xf32> -> vector<8x32xf32>
    %c0_107 = arith.constant 0 : index
    %c0_108 = arith.constant 0 : index
    %106 = vector.load %arg16[%c0_107, %c0_108] : memref<1x32xf32, #tpu.memory_space<vmem>>, vector<1x32xf32>
    %107 = vector.broadcast %106 : vector<1x32xf32> to vector<8x32xf32>
    %108 = arith.addf %105, %107 : vector<8x32xf32>
    %c2_109 = arith.constant 2 : index
    %c0_110 = arith.constant 0 : index
    %c0_111 = arith.constant 0 : index
    %109 = vector.load %arg26[%c2_109, %c0_110, %c0_111] : memref<3x8x32xf32, #tpu.memory_space<vmem>>, vector<1x8x32xf32>
    %110 = vector.shape_cast %109 : vector<1x8x32xf32> to vector<8x32xf32>
    %111 = vector.shape_cast %108 : vector<8x32xf32> to vector<1x8x32xf32>
    tpu.vector_store %arg26[%c2_109, %c0_110, %c0_111], %111 {strides = array<i32>} : memref<3x8x32xf32, #tpu.memory_space<vmem>>, vector<1x8x32xf32>,
    %c0_112 = arith.constant 0 : index
    %c0_113 = arith.constant 0 : index
    %112 = vector.load %arg11[%c0_112, %c0_113] : memref<32x32xf32, #tpu.memory_space<vmem>>, vector<32x32xf32>
    %c0_114 = arith.constant 0 : index
    %c0_115 = arith.constant 0 : index
    %113 = vector.load %arg12[%c0_114, %c0_115] : memref<32x32xf32, #tpu.memory_space<vmem>>, vector<32x32xf32>
    %c0_116 = arith.constant 0 : index
    %c0_117 = arith.constant 0 : index
    %114 = vector.load %arg13[%c0_116, %c0_117] : memref<32x32xf32, #tpu.memory_space<vmem>>, vector<32x32xf32>
    %c0_118 = arith.constant 0 : index
    %c0_119 = arith.constant 0 : index
    %115 = vector.load %arg17[%c0_118, %c0_119] : memref<1x32xf32, #tpu.memory_space<vmem>>, vector<1x32xf32>
    %cst_120 = arith.constant 0.000000e+00 : f32
    %116 = vector.broadcast %cst_120 : f32 to vector<1x32xf32>
    %c0_i32 = arith.constant 0 : i32
    %c0_121 = arith.constant 0 : index
    %117 = arith.index_cast %c0_i32 : i32 to index
    %c0_122 = arith.constant 0 : index
    %118 = vector.load %arg26[%c0_121, %117, %c0_122] : memref<3x8x32xf32, #tpu.memory_space<vmem>>, vector<1x1x32xf32>
    %119 = vector.shape_cast %118 : vector<1x1x32xf32> to vector<1x32xf32>
    %c1_123 = arith.constant 1 : index
    %120 = arith.index_cast %c0_i32 : i32 to index
    %c0_124 = arith.constant 0 : index
    %121 = vector.load %arg26[%c1_123, %120, %c0_124] : memref<3x8x32xf32, #tpu.memory_space<vmem>>, vector<1x1x32xf32>
    %122 = vector.shape_cast %121 : vector<1x1x32xf32> to vector<1x32xf32>
    %c2_125 = arith.constant 2 : index
    %123 = arith.index_cast %c0_i32 : i32 to index
    %c0_126 = arith.constant 0 : index
    %124 = vector.load %arg26[%c2_125, %123, %c0_126] : memref<3x8x32xf32, #tpu.memory_space<vmem>>, vector<1x1x32xf32>
    %125 = vector.shape_cast %124 : vector<1x1x32xf32> to vector<1x32xf32>
    %cst_127 = arith.constant dense<0.000000e+00> : vector<1x32xf32>
    %126 = tpu.matmul %116, %112, %cst_127 {dimension_numbers = #tpu.dot_dimension_numbers<[1], [0], [0], [1], [0, 0, 1, 1], [], []>} : vector<1x32xf32>, vector<32x32xf32>, vector<1x32xf32> -> vector<1x32xf32>
    %127 = arith.addf %119, %126 : vector<1x32xf32>
    %128 = arith.negf %127 : vector<1x32xf32>
    %129 = math.exp %128 : vector<1x32xf32>
    %cst_128 = arith.constant 1.000000e+00 : f32
    %130 = vector.broadcast %cst_128 : f32 to vector<1x32xf32>
    %131 = arith.addf %130, %129 : vector<1x32xf32>
    %132 = arith.divf %130, %131 : vector<1x32xf32>
    %cst_129 = arith.constant dense<0.000000e+00> : vector<1x32xf32>
    %133 = tpu.matmul %116, %113, %cst_129 {dimension_numbers = #tpu.dot_dimension_numbers<[1], [0], [0], [1], [0, 0, 1, 1], [], []>} : vector<1x32xf32>, vector<32x32xf32>, vector<1x32xf32> -> vector<1x32xf32>
    %134 = arith.addf %122, %133 : vector<1x32xf32>
    %135 = arith.negf %134 : vector<1x32xf32>
    %136 = math.exp %135 : vector<1x32xf32>
    %cst_130 = arith.constant 1.000000e+00 : f32
    %137 = vector.broadcast %cst_130 : f32 to vector<1x32xf32>
    %138 = arith.addf %137, %136 : vector<1x32xf32>
    %139 = arith.divf %137, %138 : vector<1x32xf32>
    %cst_131 = arith.constant dense<0.000000e+00> : vector<1x32xf32>
    %140 = tpu.matmul %116, %114, %cst_131 {dimension_numbers = #tpu.dot_dimension_numbers<[1], [0], [0], [1], [0, 0, 1, 1], [], []>} : vector<1x32xf32>, vector<32x32xf32>, vector<1x32xf32> -> vector<1x32xf32>
    %141 = arith.addf %140, %115 : vector<1x32xf32>
    %142 = arith.mulf %132, %141 : vector<1x32xf32>
    %143 = arith.addf %125, %142 : vector<1x32xf32>
    %144 = math.tanh %143 : vector<1x32xf32>
    %cst_132 = arith.constant 1.000000e+00 : f32
    %145 = vector.broadcast %cst_132 : f32 to vector<1x32xf32>
    %146 = arith.subf %145, %139 : vector<1x32xf32>
    %147 = arith.mulf %146, %144 : vector<1x32xf32>
    %148 = arith.mulf %139, %116 : vector<1x32xf32>
    %149 = arith.addf %147, %148 : vector<1x32xf32>
    %150 = arith.index_cast %c0_i32 : i32 to index
    %c0_133 = arith.constant 0 : index
    %151 = vector.load %arg27[%150, %c0_133] : memref<8x32xf32, #tpu.memory_space<vmem>>, vector<1x32xf32>
    tpu.vector_store %arg27[%150, %c0_133], %149 {strides = array<i32>} : memref<8x32xf32, #tpu.memory_space<vmem>>, vector<1x32xf32>,
    %c1_i32 = arith.constant 1 : i32
    %c0_134 = arith.constant 0 : index
    %152 = arith.index_cast %c1_i32 : i32 to index
    %c0_135 = arith.constant 0 : index
    %153 = vector.load %arg26[%c0_134, %152, %c0_135] : memref<3x8x32xf32, #tpu.memory_space<vmem>>, vector<1x1x32xf32>
    %154 = vector.shape_cast %153 : vector<1x1x32xf32> to vector<1x32xf32>
    %c1_136 = arith.constant 1 : index
    %155 = arith.index_cast %c1_i32 : i32 to index
    %c0_137 = arith.constant 0 : index
    %156 = vector.load %arg26[%c1_136, %155, %c0_137] : memref<3x8x32xf32, #tpu.memory_space<vmem>>, vector<1x1x32xf32>
    %157 = vector.shape_cast %156 : vector<1x1x32xf32> to vector<1x32xf32>
    %c2_138 = arith.constant 2 : index
    %158 = arith.index_cast %c1_i32 : i32 to index
    %c0_139 = arith.constant 0 : index
    %159 = vector.load %arg26[%c2_138, %158, %c0_139] : memref<3x8x32xf32, #tpu.memory_space<vmem>>, vector<1x1x32xf32>
    %160 = vector.shape_cast %159 : vector<1x1x32xf32> to vector<1x32xf32>
    %cst_140 = arith.constant dense<0.000000e+00> : vector<1x32xf32>
    %161 = tpu.matmul %149, %112, %cst_140 {dimension_numbers = #tpu.dot_dimension_numbers<[1], [0], [0], [1], [0, 0, 1, 1], [], []>} : vector<1x32xf32>, vector<32x32xf32>, vector<1x32xf32> -> vector<1x32xf32>
    %162 = arith.addf %154, %161 : vector<1x32xf32>
    %163 = arith.negf %162 : vector<1x32xf32>
    %164 = math.exp %163 : vector<1x32xf32>
    %cst_141 = arith.constant 1.000000e+00 : f32
    %165 = vector.broadcast %cst_141 : f32 to vector<1x32xf32>
    %166 = arith.addf %165, %164 : vector<1x32xf32>
    %167 = arith.divf %165, %166 : vector<1x32xf32>
    %cst_142 = arith.constant dense<0.000000e+00> : vector<1x32xf32>
    %168 = tpu.matmul %149, %113, %cst_142 {dimension_numbers = #tpu.dot_dimension_numbers<[1], [0], [0], [1], [0, 0, 1, 1], [], []>} : vector<1x32xf32>, vector<32x32xf32>, vector<1x32xf32> -> vector<1x32xf32>
    %169 = arith.addf %157, %168 : vector<1x32xf32>
    %170 = arith.negf %169 : vector<1x32xf32>
    %171 = math.exp %170 : vector<1x32xf32>
    %cst_143 = arith.constant 1.000000e+00 : f32
    %172 = vector.broadcast %cst_143 : f32 to vector<1x32xf32>
    %173 = arith.addf %172, %171 : vector<1x32xf32>
    %174 = arith.divf %172, %173 : vector<1x32xf32>
    %cst_144 = arith.constant dense<0.000000e+00> : vector<1x32xf32>
    %175 = tpu.matmul %149, %114, %cst_144 {dimension_numbers = #tpu.dot_dimension_numbers<[1], [0], [0], [1], [0, 0, 1, 1], [], []>} : vector<1x32xf32>, vector<32x32xf32>, vector<1x32xf32> -> vector<1x32xf32>
    %176 = arith.addf %175, %115 : vector<1x32xf32>
    %177 = arith.mulf %167, %176 : vector<1x32xf32>
    %178 = arith.addf %160, %177 : vector<1x32xf32>
    %179 = math.tanh %178 : vector<1x32xf32>
    %cst_145 = arith.constant 1.000000e+00 : f32
    %180 = vector.broadcast %cst_145 : f32 to vector<1x32xf32>
    %181 = arith.subf %180, %174 : vector<1x32xf32>
    %182 = arith.mulf %181, %179 : vector<1x32xf32>
    %183 = arith.mulf %174, %149 : vector<1x32xf32>
    %184 = arith.addf %182, %183 : vector<1x32xf32>
    %185 = arith.index_cast %c1_i32 : i32 to index
    %c0_146 = arith.constant 0 : index
    %186 = vector.load %arg27[%185, %c0_146] : memref<8x32xf32, #tpu.memory_space<vmem>>, vector<1x32xf32>
    tpu.vector_store %arg27[%185, %c0_146], %184 {strides = array<i32>} : memref<8x32xf32, #tpu.memory_space<vmem>>, vector<1x32xf32>,
    %c2_i32 = arith.constant 2 : i32
    %c0_147 = arith.constant 0 : index
    %187 = arith.index_cast %c2_i32 : i32 to index
    %c0_148 = arith.constant 0 : index
    %188 = vector.load %arg26[%c0_147, %187, %c0_148] : memref<3x8x32xf32, #tpu.memory_space<vmem>>, vector<1x1x32xf32>
    %189 = vector.shape_cast %188 : vector<1x1x32xf32> to vector<1x32xf32>
    %c1_149 = arith.constant 1 : index
    %190 = arith.index_cast %c2_i32 : i32 to index
    %c0_150 = arith.constant 0 : index
    %191 = vector.load %arg26[%c1_149, %190, %c0_150] : memref<3x8x32xf32, #tpu.memory_space<vmem>>, vector<1x1x32xf32>
    %192 = vector.shape_cast %191 : vector<1x1x32xf32> to vector<1x32xf32>
    %c2_151 = arith.constant 2 : index
    %193 = arith.index_cast %c2_i32 : i32 to index
    %c0_152 = arith.constant 0 : index
    %194 = vector.load %arg26[%c2_151, %193, %c0_152] : memref<3x8x32xf32, #tpu.memory_space<vmem>>, vector<1x1x32xf32>
    %195 = vector.shape_cast %194 : vector<1x1x32xf32> to vector<1x32xf32>
    %cst_153 = arith.constant dense<0.000000e+00> : vector<1x32xf32>
    %196 = tpu.matmul %184, %112, %cst_153 {dimension_numbers = #tpu.dot_dimension_numbers<[1], [0], [0], [1], [0, 0, 1, 1], [], []>} : vector<1x32xf32>, vector<32x32xf32>, vector<1x32xf32> -> vector<1x32xf32>
    %197 = arith.addf %189, %196 : vector<1x32xf32>
    %198 = arith.negf %197 : vector<1x32xf32>
    %199 = math.exp %198 : vector<1x32xf32>
    %cst_154 = arith.constant 1.000000e+00 : f32
    %200 = vector.broadcast %cst_154 : f32 to vector<1x32xf32>
    %201 = arith.addf %200, %199 : vector<1x32xf32>
    %202 = arith.divf %200, %201 : vector<1x32xf32>
    %cst_155 = arith.constant dense<0.000000e+00> : vector<1x32xf32>
    %203 = tpu.matmul %184, %113, %cst_155 {dimension_numbers = #tpu.dot_dimension_numbers<[1], [0], [0], [1], [0, 0, 1, 1], [], []>} : vector<1x32xf32>, vector<32x32xf32>, vector<1x32xf32> -> vector<1x32xf32>
    %204 = arith.addf %192, %203 : vector<1x32xf32>
    %205 = arith.negf %204 : vector<1x32xf32>
    %206 = math.exp %205 : vector<1x32xf32>
    %cst_156 = arith.constant 1.000000e+00 : f32
    %207 = vector.broadcast %cst_156 : f32 to vector<1x32xf32>
    %208 = arith.addf %207, %206 : vector<1x32xf32>
    %209 = arith.divf %207, %208 : vector<1x32xf32>
    %cst_157 = arith.constant dense<0.000000e+00> : vector<1x32xf32>
    %210 = tpu.matmul %184, %114, %cst_157 {dimension_numbers = #tpu.dot_dimension_numbers<[1], [0], [0], [1], [0, 0, 1, 1], [], []>} : vector<1x32xf32>, vector<32x32xf32>, vector<1x32xf32> -> vector<1x32xf32>
    %211 = arith.addf %210, %115 : vector<1x32xf32>
    %212 = arith.mulf %202, %211 : vector<1x32xf32>
    %213 = arith.addf %195, %212 : vector<1x32xf32>
    %214 = math.tanh %213 : vector<1x32xf32>
    %cst_158 = arith.constant 1.000000e+00 : f32
    %215 = vector.broadcast %cst_158 : f32 to vector<1x32xf32>
    %216 = arith.subf %215, %209 : vector<1x32xf32>
    %217 = arith.mulf %216, %214 : vector<1x32xf32>
    %218 = arith.mulf %209, %184 : vector<1x32xf32>
    %219 = arith.addf %217, %218 : vector<1x32xf32>
    %220 = arith.index_cast %c2_i32 : i32 to index
    %c0_159 = arith.constant 0 : index
    %221 = vector.load %arg27[%220, %c0_159] : memref<8x32xf32, #tpu.memory_space<vmem>>, vector<1x32xf32>
    tpu.vector_store %arg27[%220, %c0_159], %219 {strides = array<i32>} : memref<8x32xf32, #tpu.memory_space<vmem>>, vector<1x32xf32>,
    %c3_i32 = arith.constant 3 : i32
    %c0_160 = arith.constant 0 : index
    %222 = arith.index_cast %c3_i32 : i32 to index
    %c0_161 = arith.constant 0 : index
    %223 = vector.load %arg26[%c0_160, %222, %c0_161] : memref<3x8x32xf32, #tpu.memory_space<vmem>>, vector<1x1x32xf32>
    %224 = vector.shape_cast %223 : vector<1x1x32xf32> to vector<1x32xf32>
    %c1_162 = arith.constant 1 : index
    %225 = arith.index_cast %c3_i32 : i32 to index
    %c0_163 = arith.constant 0 : index
    %226 = vector.load %arg26[%c1_162, %225, %c0_163] : memref<3x8x32xf32, #tpu.memory_space<vmem>>, vector<1x1x32xf32>
    %227 = vector.shape_cast %226 : vector<1x1x32xf32> to vector<1x32xf32>
    %c2_164 = arith.constant 2 : index
    %228 = arith.index_cast %c3_i32 : i32 to index
    %c0_165 = arith.constant 0 : index
    %229 = vector.load %arg26[%c2_164, %228, %c0_165] : memref<3x8x32xf32, #tpu.memory_space<vmem>>, vector<1x1x32xf32>
    %230 = vector.shape_cast %229 : vector<1x1x32xf32> to vector<1x32xf32>
    %cst_166 = arith.constant dense<0.000000e+00> : vector<1x32xf32>
    %231 = tpu.matmul %219, %112, %cst_166 {dimension_numbers = #tpu.dot_dimension_numbers<[1], [0], [0], [1], [0, 0, 1, 1], [], []>} : vector<1x32xf32>, vector<32x32xf32>, vector<1x32xf32> -> vector<1x32xf32>
    %232 = arith.addf %224, %231 : vector<1x32xf32>
    %233 = arith.negf %232 : vector<1x32xf32>
    %234 = math.exp %233 : vector<1x32xf32>
    %cst_167 = arith.constant 1.000000e+00 : f32
    %235 = vector.broadcast %cst_167 : f32 to vector<1x32xf32>
    %236 = arith.addf %235, %234 : vector<1x32xf32>
    %237 = arith.divf %235, %236 : vector<1x32xf32>
    %cst_168 = arith.constant dense<0.000000e+00> : vector<1x32xf32>
    %238 = tpu.matmul %219, %113, %cst_168 {dimension_numbers = #tpu.dot_dimension_numbers<[1], [0], [0], [1], [0, 0, 1, 1], [], []>} : vector<1x32xf32>, vector<32x32xf32>, vector<1x32xf32> -> vector<1x32xf32>
    %239 = arith.addf %227, %238 : vector<1x32xf32>
    %240 = arith.negf %239 : vector<1x32xf32>
    %241 = math.exp %240 : vector<1x32xf32>
    %cst_169 = arith.constant 1.000000e+00 : f32
    %242 = vector.broadcast %cst_169 : f32 to vector<1x32xf32>
    %243 = arith.addf %242, %241 : vector<1x32xf32>
    %244 = arith.divf %242, %243 : vector<1x32xf32>
    %cst_170 = arith.constant dense<0.000000e+00> : vector<1x32xf32>
    %245 = tpu.matmul %219, %114, %cst_170 {dimension_numbers = #tpu.dot_dimension_numbers<[1], [0], [0], [1], [0, 0, 1, 1], [], []>} : vector<1x32xf32>, vector<32x32xf32>, vector<1x32xf32> -> vector<1x32xf32>
    %246 = arith.addf %245, %115 : vector<1x32xf32>
    %247 = arith.mulf %237, %246 : vector<1x32xf32>
    %248 = arith.addf %230, %247 : vector<1x32xf32>
    %249 = math.tanh %248 : vector<1x32xf32>
    %cst_171 = arith.constant 1.000000e+00 : f32
    %250 = vector.broadcast %cst_171 : f32 to vector<1x32xf32>
    %251 = arith.subf %250, %244 : vector<1x32xf32>
    %252 = arith.mulf %251, %249 : vector<1x32xf32>
    %253 = arith.mulf %244, %219 : vector<1x32xf32>
    %254 = arith.addf %252, %253 : vector<1x32xf32>
    %255 = arith.index_cast %c3_i32 : i32 to index
    %c0_172 = arith.constant 0 : index
    %256 = vector.load %arg27[%255, %c0_172] : memref<8x32xf32, #tpu.memory_space<vmem>>, vector<1x32xf32>
    tpu.vector_store %arg27[%255, %c0_172], %254 {strides = array<i32>} : memref<8x32xf32, #tpu.memory_space<vmem>>, vector<1x32xf32>,
    %c4_i32 = arith.constant 4 : i32
    %c0_173 = arith.constant 0 : index
    %257 = arith.index_cast %c4_i32 : i32 to index
    %c0_174 = arith.constant 0 : index
    %258 = vector.load %arg26[%c0_173, %257, %c0_174] : memref<3x8x32xf32, #tpu.memory_space<vmem>>, vector<1x1x32xf32>
    %259 = vector.shape_cast %258 : vector<1x1x32xf32> to vector<1x32xf32>
    %c1_175 = arith.constant 1 : index
    %260 = arith.index_cast %c4_i32 : i32 to index
    %c0_176 = arith.constant 0 : index
    %261 = vector.load %arg26[%c1_175, %260, %c0_176] : memref<3x8x32xf32, #tpu.memory_space<vmem>>, vector<1x1x32xf32>
    %262 = vector.shape_cast %261 : vector<1x1x32xf32> to vector<1x32xf32>
    %c2_177 = arith.constant 2 : index
    %263 = arith.index_cast %c4_i32 : i32 to index
    %c0_178 = arith.constant 0 : index
    %264 = vector.load %arg26[%c2_177, %263, %c0_178] : memref<3x8x32xf32, #tpu.memory_space<vmem>>, vector<1x1x32xf32>
    %265 = vector.shape_cast %264 : vector<1x1x32xf32> to vector<1x32xf32>
    %cst_179 = arith.constant dense<0.000000e+00> : vector<1x32xf32>
    %266 = tpu.matmul %254, %112, %cst_179 {dimension_numbers = #tpu.dot_dimension_numbers<[1], [0], [0], [1], [0, 0, 1, 1], [], []>} : vector<1x32xf32>, vector<32x32xf32>, vector<1x32xf32> -> vector<1x32xf32>
    %267 = arith.addf %259, %266 : vector<1x32xf32>
    %268 = arith.negf %267 : vector<1x32xf32>
    %269 = math.exp %268 : vector<1x32xf32>
    %cst_180 = arith.constant 1.000000e+00 : f32
    %270 = vector.broadcast %cst_180 : f32 to vector<1x32xf32>
    %271 = arith.addf %270, %269 : vector<1x32xf32>
    %272 = arith.divf %270, %271 : vector<1x32xf32>
    %cst_181 = arith.constant dense<0.000000e+00> : vector<1x32xf32>
    %273 = tpu.matmul %254, %113, %cst_181 {dimension_numbers = #tpu.dot_dimension_numbers<[1], [0], [0], [1], [0, 0, 1, 1], [], []>} : vector<1x32xf32>, vector<32x32xf32>, vector<1x32xf32> -> vector<1x32xf32>
    %274 = arith.addf %262, %273 : vector<1x32xf32>
    %275 = arith.negf %274 : vector<1x32xf32>
    %276 = math.exp %275 : vector<1x32xf32>
    %cst_182 = arith.constant 1.000000e+00 : f32
    %277 = vector.broadcast %cst_182 : f32 to vector<1x32xf32>
    %278 = arith.addf %277, %276 : vector<1x32xf32>
    %279 = arith.divf %277, %278 : vector<1x32xf32>
    %cst_183 = arith.constant dense<0.000000e+00> : vector<1x32xf32>
    %280 = tpu.matmul %254, %114, %cst_183 {dimension_numbers = #tpu.dot_dimension_numbers<[1], [0], [0], [1], [0, 0, 1, 1], [], []>} : vector<1x32xf32>, vector<32x32xf32>, vector<1x32xf32> -> vector<1x32xf32>
    %281 = arith.addf %280, %115 : vector<1x32xf32>
    %282 = arith.mulf %272, %281 : vector<1x32xf32>
    %283 = arith.addf %265, %282 : vector<1x32xf32>
    %284 = math.tanh %283 : vector<1x32xf32>
    %cst_184 = arith.constant 1.000000e+00 : f32
    %285 = vector.broadcast %cst_184 : f32 to vector<1x32xf32>
    %286 = arith.subf %285, %279 : vector<1x32xf32>
    %287 = arith.mulf %286, %284 : vector<1x32xf32>
    %288 = arith.mulf %279, %254 : vector<1x32xf32>
    %289 = arith.addf %287, %288 : vector<1x32xf32>
    %290 = arith.index_cast %c4_i32 : i32 to index
    %c0_185 = arith.constant 0 : index
    %291 = vector.load %arg27[%290, %c0_185] : memref<8x32xf32, #tpu.memory_space<vmem>>, vector<1x32xf32>
    tpu.vector_store %arg27[%290, %c0_185], %289 {strides = array<i32>} : memref<8x32xf32, #tpu.memory_space<vmem>>, vector<1x32xf32>,
    %c5_i32 = arith.constant 5 : i32
    %c0_186 = arith.constant 0 : index
    %292 = arith.index_cast %c5_i32 : i32 to index
    %c0_187 = arith.constant 0 : index
    %293 = vector.load %arg26[%c0_186, %292, %c0_187] : memref<3x8x32xf32, #tpu.memory_space<vmem>>, vector<1x1x32xf32>
    %294 = vector.shape_cast %293 : vector<1x1x32xf32> to vector<1x32xf32>
    %c1_188 = arith.constant 1 : index
    %295 = arith.index_cast %c5_i32 : i32 to index
    %c0_189 = arith.constant 0 : index
    %296 = vector.load %arg26[%c1_188, %295, %c0_189] : memref<3x8x32xf32, #tpu.memory_space<vmem>>, vector<1x1x32xf32>
    %297 = vector.shape_cast %296 : vector<1x1x32xf32> to vector<1x32xf32>
    %c2_190 = arith.constant 2 : index
    %298 = arith.index_cast %c5_i32 : i32 to index
    %c0_191 = arith.constant 0 : index
    %299 = vector.load %arg26[%c2_190, %298, %c0_191] : memref<3x8x32xf32, #tpu.memory_space<vmem>>, vector<1x1x32xf32>
    %300 = vector.shape_cast %299 : vector<1x1x32xf32> to vector<1x32xf32>
    %cst_192 = arith.constant dense<0.000000e+00> : vector<1x32xf32>
    %301 = tpu.matmul %289, %112, %cst_192 {dimension_numbers = #tpu.dot_dimension_numbers<[1], [0], [0], [1], [0, 0, 1, 1], [], []>} : vector<1x32xf32>, vector<32x32xf32>, vector<1x32xf32> -> vector<1x32xf32>
    %302 = arith.addf %294, %301 : vector<1x32xf32>
    %303 = arith.negf %302 : vector<1x32xf32>
    %304 = math.exp %303 : vector<1x32xf32>
    %cst_193 = arith.constant 1.000000e+00 : f32
    %305 = vector.broadcast %cst_193 : f32 to vector<1x32xf32>
    %306 = arith.addf %305, %304 : vector<1x32xf32>
    %307 = arith.divf %305, %306 : vector<1x32xf32>
    %cst_194 = arith.constant dense<0.000000e+00> : vector<1x32xf32>
    %308 = tpu.matmul %289, %113, %cst_194 {dimension_numbers = #tpu.dot_dimension_numbers<[1], [0], [0], [1], [0, 0, 1, 1], [], []>} : vector<1x32xf32>, vector<32x32xf32>, vector<1x32xf32> -> vector<1x32xf32>
    %309 = arith.addf %297, %308 : vector<1x32xf32>
    %310 = arith.negf %309 : vector<1x32xf32>
    %311 = math.exp %310 : vector<1x32xf32>
    %cst_195 = arith.constant 1.000000e+00 : f32
    %312 = vector.broadcast %cst_195 : f32 to vector<1x32xf32>
    %313 = arith.addf %312, %311 : vector<1x32xf32>
    %314 = arith.divf %312, %313 : vector<1x32xf32>
    %cst_196 = arith.constant dense<0.000000e+00> : vector<1x32xf32>
    %315 = tpu.matmul %289, %114, %cst_196 {dimension_numbers = #tpu.dot_dimension_numbers<[1], [0], [0], [1], [0, 0, 1, 1], [], []>} : vector<1x32xf32>, vector<32x32xf32>, vector<1x32xf32> -> vector<1x32xf32>
    %316 = arith.addf %315, %115 : vector<1x32xf32>
    %317 = arith.mulf %307, %316 : vector<1x32xf32>
    %318 = arith.addf %300, %317 : vector<1x32xf32>
    %319 = math.tanh %318 : vector<1x32xf32>
    %cst_197 = arith.constant 1.000000e+00 : f32
    %320 = vector.broadcast %cst_197 : f32 to vector<1x32xf32>
    %321 = arith.subf %320, %314 : vector<1x32xf32>
    %322 = arith.mulf %321, %319 : vector<1x32xf32>
    %323 = arith.mulf %314, %289 : vector<1x32xf32>
    %324 = arith.addf %322, %323 : vector<1x32xf32>
    %325 = arith.index_cast %c5_i32 : i32 to index
    %c0_198 = arith.constant 0 : index
    %326 = vector.load %arg27[%325, %c0_198] : memref<8x32xf32, #tpu.memory_space<vmem>>, vector<1x32xf32>
    tpu.vector_store %arg27[%325, %c0_198], %324 {strides = array<i32>} : memref<8x32xf32, #tpu.memory_space<vmem>>, vector<1x32xf32>,
    %c6_i32 = arith.constant 6 : i32
    %c0_199 = arith.constant 0 : index
    %327 = arith.index_cast %c6_i32 : i32 to index
    %c0_200 = arith.constant 0 : index
    %328 = vector.load %arg26[%c0_199, %327, %c0_200] : memref<3x8x32xf32, #tpu.memory_space<vmem>>, vector<1x1x32xf32>
    %329 = vector.shape_cast %328 : vector<1x1x32xf32> to vector<1x32xf32>
    %c1_201 = arith.constant 1 : index
    %330 = arith.index_cast %c6_i32 : i32 to index
    %c0_202 = arith.constant 0 : index
    %331 = vector.load %arg26[%c1_201, %330, %c0_202] : memref<3x8x32xf32, #tpu.memory_space<vmem>>, vector<1x1x32xf32>
    %332 = vector.shape_cast %331 : vector<1x1x32xf32> to vector<1x32xf32>
    %c2_203 = arith.constant 2 : index
    %333 = arith.index_cast %c6_i32 : i32 to index
    %c0_204 = arith.constant 0 : index
    %334 = vector.load %arg26[%c2_203, %333, %c0_204] : memref<3x8x32xf32, #tpu.memory_space<vmem>>, vector<1x1x32xf32>
    %335 = vector.shape_cast %334 : vector<1x1x32xf32> to vector<1x32xf32>
    %cst_205 = arith.constant dense<0.000000e+00> : vector<1x32xf32>
    %336 = tpu.matmul %324, %112, %cst_205 {dimension_numbers = #tpu.dot_dimension_numbers<[1], [0], [0], [1], [0, 0, 1, 1], [], []>} : vector<1x32xf32>, vector<32x32xf32>, vector<1x32xf32> -> vector<1x32xf32>
    %337 = arith.addf %329, %336 : vector<1x32xf32>
    %338 = arith.negf %337 : vector<1x32xf32>
    %339 = math.exp %338 : vector<1x32xf32>
    %cst_206 = arith.constant 1.000000e+00 : f32
    %340 = vector.broadcast %cst_206 : f32 to vector<1x32xf32>
    %341 = arith.addf %340, %339 : vector<1x32xf32>
    %342 = arith.divf %340, %341 : vector<1x32xf32>
    %cst_207 = arith.constant dense<0.000000e+00> : vector<1x32xf32>
    %343 = tpu.matmul %324, %113, %cst_207 {dimension_numbers = #tpu.dot_dimension_numbers<[1], [0], [0], [1], [0, 0, 1, 1], [], []>} : vector<1x32xf32>, vector<32x32xf32>, vector<1x32xf32> -> vector<1x32xf32>
    %344 = arith.addf %332, %343 : vector<1x32xf32>
    %345 = arith.negf %344 : vector<1x32xf32>
    %346 = math.exp %345 : vector<1x32xf32>
    %cst_208 = arith.constant 1.000000e+00 : f32
    %347 = vector.broadcast %cst_208 : f32 to vector<1x32xf32>
    %348 = arith.addf %347, %346 : vector<1x32xf32>
    %349 = arith.divf %347, %348 : vector<1x32xf32>
    %cst_209 = arith.constant dense<0.000000e+00> : vector<1x32xf32>
    %350 = tpu.matmul %324, %114, %cst_209 {dimension_numbers = #tpu.dot_dimension_numbers<[1], [0], [0], [1], [0, 0, 1, 1], [], []>} : vector<1x32xf32>, vector<32x32xf32>, vector<1x32xf32> -> vector<1x32xf32>
    %351 = arith.addf %350, %115 : vector<1x32xf32>
    %352 = arith.mulf %342, %351 : vector<1x32xf32>
    %353 = arith.addf %335, %352 : vector<1x32xf32>
    %354 = math.tanh %353 : vector<1x32xf32>
    %cst_210 = arith.constant 1.000000e+00 : f32
    %355 = vector.broadcast %cst_210 : f32 to vector<1x32xf32>
    %356 = arith.subf %355, %349 : vector<1x32xf32>
    %357 = arith.mulf %356, %354 : vector<1x32xf32>
    %358 = arith.mulf %349, %324 : vector<1x32xf32>
    %359 = arith.addf %357, %358 : vector<1x32xf32>
    %360 = arith.index_cast %c6_i32 : i32 to index
    %c0_211 = arith.constant 0 : index
    %361 = vector.load %arg27[%360, %c0_211] : memref<8x32xf32, #tpu.memory_space<vmem>>, vector<1x32xf32>
    tpu.vector_store %arg27[%360, %c0_211], %359 {strides = array<i32>} : memref<8x32xf32, #tpu.memory_space<vmem>>, vector<1x32xf32>,
    %c7_i32 = arith.constant 7 : i32
    %c0_212 = arith.constant 0 : index
    %362 = arith.index_cast %c7_i32 : i32 to index
    %c0_213 = arith.constant 0 : index
    %363 = vector.load %arg26[%c0_212, %362, %c0_213] : memref<3x8x32xf32, #tpu.memory_space<vmem>>, vector<1x1x32xf32>
    %364 = vector.shape_cast %363 : vector<1x1x32xf32> to vector<1x32xf32>
    %c1_214 = arith.constant 1 : index
    %365 = arith.index_cast %c7_i32 : i32 to index
    %c0_215 = arith.constant 0 : index
    %366 = vector.load %arg26[%c1_214, %365, %c0_215] : memref<3x8x32xf32, #tpu.memory_space<vmem>>, vector<1x1x32xf32>
    %367 = vector.shape_cast %366 : vector<1x1x32xf32> to vector<1x32xf32>
    %c2_216 = arith.constant 2 : index
    %368 = arith.index_cast %c7_i32 : i32 to index
    %c0_217 = arith.constant 0 : index
    %369 = vector.load %arg26[%c2_216, %368, %c0_217] : memref<3x8x32xf32, #tpu.memory_space<vmem>>, vector<1x1x32xf32>
    %370 = vector.shape_cast %369 : vector<1x1x32xf32> to vector<1x32xf32>
    %cst_218 = arith.constant dense<0.000000e+00> : vector<1x32xf32>
    %371 = tpu.matmul %359, %112, %cst_218 {dimension_numbers = #tpu.dot_dimension_numbers<[1], [0], [0], [1], [0, 0, 1, 1], [], []>} : vector<1x32xf32>, vector<32x32xf32>, vector<1x32xf32> -> vector<1x32xf32>
    %372 = arith.addf %364, %371 : vector<1x32xf32>
    %373 = arith.negf %372 : vector<1x32xf32>
    %374 = math.exp %373 : vector<1x32xf32>
    %cst_219 = arith.constant 1.000000e+00 : f32
    %375 = vector.broadcast %cst_219 : f32 to vector<1x32xf32>
    %376 = arith.addf %375, %374 : vector<1x32xf32>
    %377 = arith.divf %375, %376 : vector<1x32xf32>
    %cst_220 = arith.constant dense<0.000000e+00> : vector<1x32xf32>
    %378 = tpu.matmul %359, %113, %cst_220 {dimension_numbers = #tpu.dot_dimension_numbers<[1], [0], [0], [1], [0, 0, 1, 1], [], []>} : vector<1x32xf32>, vector<32x32xf32>, vector<1x32xf32> -> vector<1x32xf32>
    %379 = arith.addf %367, %378 : vector<1x32xf32>
    %380 = arith.negf %379 : vector<1x32xf32>
    %381 = math.exp %380 : vector<1x32xf32>
    %cst_221 = arith.constant 1.000000e+00 : f32
    %382 = vector.broadcast %cst_221 : f32 to vector<1x32xf32>
    %383 = arith.addf %382, %381 : vector<1x32xf32>
    %384 = arith.divf %382, %383 : vector<1x32xf32>
    %cst_222 = arith.constant dense<0.000000e+00> : vector<1x32xf32>
    %385 = tpu.matmul %359, %114, %cst_222 {dimension_numbers = #tpu.dot_dimension_numbers<[1], [0], [0], [1], [0, 0, 1, 1], [], []>} : vector<1x32xf32>, vector<32x32xf32>, vector<1x32xf32> -> vector<1x32xf32>
    %386 = arith.addf %385, %115 : vector<1x32xf32>
    %387 = arith.mulf %377, %386 : vector<1x32xf32>
    %388 = arith.addf %370, %387 : vector<1x32xf32>
    %389 = math.tanh %388 : vector<1x32xf32>
    %cst_223 = arith.constant 1.000000e+00 : f32
    %390 = vector.broadcast %cst_223 : f32 to vector<1x32xf32>
    %391 = arith.subf %390, %384 : vector<1x32xf32>
    %392 = arith.mulf %391, %389 : vector<1x32xf32>
    %393 = arith.mulf %384, %359 : vector<1x32xf32>
    %394 = arith.addf %392, %393 : vector<1x32xf32>
    %395 = arith.index_cast %c7_i32 : i32 to index
    %c0_224 = arith.constant 0 : index
    %396 = vector.load %arg27[%395, %c0_224] : memref<8x32xf32, #tpu.memory_space<vmem>>, vector<1x32xf32>
    tpu.vector_store %arg27[%395, %c0_224], %394 {strides = array<i32>} : memref<8x32xf32, #tpu.memory_space<vmem>>, vector<1x32xf32>,
    %c8_i32 = arith.constant 8 : i32
    %c0_225 = arith.constant 0 : index
    %c0_226 = arith.constant 0 : index
    %397 = vector.load %arg27[%c0_225, %c0_226] : memref<8x32xf32, #tpu.memory_space<vmem>>, vector<8x32xf32>
    %c0_227 = arith.constant 0 : index
    %c0_228 = arith.constant 0 : index
    %c0_229 = arith.constant 0 : index
    %398 = vector.load %arg18[%c0_227, %c0_228, %c0_229] : memref<2x32x32xf32, #tpu.memory_space<vmem>>, vector<1x32x32xf32>
    %399 = vector.shape_cast %398 : vector<1x32x32xf32> to vector<32x32xf32>
    %cst_230 = arith.constant dense<0.000000e+00> : vector<8x32xf32>
    %400 = tpu.matmul %397, %399, %cst_230 {dimension_numbers = #tpu.dot_dimension_numbers<[1], [0], [0], [1], [0, 0, 1, 1], [], []>} : vector<8x32xf32>, vector<32x32xf32>, vector<8x32xf32> -> vector<8x32xf32>
    %c0_231 = arith.constant 0 : index
    %c0_232 = arith.constant 0 : index
    %c0_233 = arith.constant 0 : index
    %401 = vector.load %arg19[%c0_231, %c0_232, %c0_233] : memref<2x1x32xf32, #tpu.memory_space<vmem>>, vector<1x1x32xf32>
    %402 = vector.shape_cast %401 : vector<1x1x32xf32> to vector<1x32xf32>
    %403 = vector.broadcast %402 : vector<1x32xf32> to vector<8x32xf32>
    %404 = arith.mulf %400, %403 : vector<8x32xf32>
    %c0_234 = arith.constant 0 : index
    %c0_235 = arith.constant 0 : index
    %c0_236 = arith.constant 0 : index
    %405 = vector.load %arg20[%c0_234, %c0_235, %c0_236] : memref<2x1x32xf32, #tpu.memory_space<vmem>>, vector<1x1x32xf32>
    %406 = vector.shape_cast %405 : vector<1x1x32xf32> to vector<1x32xf32>
    %407 = vector.broadcast %406 : vector<1x32xf32> to vector<8x32xf32>
    %408 = arith.addf %404, %407 : vector<8x32xf32>
    %cst_237 = arith.constant 0.000000e+00 : f32
    %409 = vector.broadcast %cst_237 : f32 to vector<8x32xf32>
    %410 = arith.cmpf ogt, %408, %409 : vector<8x32xf32>
    %cst_238 = arith.constant 0.000000e+00 : f32
    %411 = vector.broadcast %cst_238 : f32 to vector<8x32xf32>
    %412 = arith.minimumf %408, %411 : vector<8x32xf32>
    %413 = math.exp %412 : vector<8x32xf32>
    %cst_239 = arith.constant 1.000000e+00 : f32
    %414 = vector.broadcast %cst_239 : f32 to vector<8x32xf32>
    %415 = arith.subf %413, %414 : vector<8x32xf32>
    %416 = arith.select %410, %408, %415 : vector<8x32xi1>, vector<8x32xf32>
    %c0_240 = arith.constant 0 : index
    %c0_241 = arith.constant 0 : index
    %c0_242 = arith.constant 0 : index
    %417 = vector.load %arg21[%c0_240, %c0_241, %c0_242] : memref<2x32x9xf32, #tpu.memory_space<vmem>>, vector<1x32x9xf32>
    %418 = vector.shape_cast %417 : vector<1x32x9xf32> to vector<32x9xf32>
    %cst_243 = arith.constant dense<0.000000e+00> : vector<8x9xf32>
    %419 = tpu.matmul %416, %418, %cst_243 {dimension_numbers = #tpu.dot_dimension_numbers<[1], [0], [0], [1], [0, 0, 1, 1], [], []>} : vector<8x32xf32>, vector<32x9xf32>, vector<8x9xf32> -> vector<8x9xf32>
    %c0_244 = arith.constant 0 : index
    %c0_245 = arith.constant 0 : index
    %c0_246 = arith.constant 0 : index
    %420 = vector.load %arg22[%c0_244, %c0_245, %c0_246] : memref<2x1x9xf32, #tpu.memory_space<vmem>>, vector<1x1x9xf32>
    %421 = vector.shape_cast %420 : vector<1x1x9xf32> to vector<1x9xf32>
    %422 = vector.broadcast %421 : vector<1x9xf32> to vector<8x9xf32>
    %423 = arith.addf %419, %422 : vector<8x9xf32>
    %424 = tpu.transpose %423, [1, 0] : vector<8x9xf32> -> vector<9x8xf32>
    %c0_247 = arith.constant 0 : index
    %c0_248 = arith.constant 0 : index
    %c0_249 = arith.constant 0 : index
    %c0_250 = arith.constant 0 : index
    %425 = vector.load %arg23[%c0_247, %c0_248, %c0_249, %c0_250] : memref<1x2x9x8xf32, #tpu.memory_space<vmem>>, vector<1x1x9x8xf32>
    %426 = vector.shape_cast %425 : vector<1x1x9x8xf32> to vector<9x8xf32>
    %427 = vector.shape_cast %424 : vector<9x8xf32> to vector<1x1x9x8xf32>
    tpu.vector_store %arg23[%c0_247, %c0_248, %c0_249, %c0_250], %427 {strides = array<i32>} : memref<1x2x9x8xf32, #tpu.memory_space<vmem>>, vector<1x1x9x8xf32>,
    %c1_251 = arith.constant 1 : index
    %c0_252 = arith.constant 0 : index
    %c0_253 = arith.constant 0 : index
    %428 = vector.load %arg18[%c1_251, %c0_252, %c0_253] : memref<2x32x32xf32, #tpu.memory_space<vmem>>, vector<1x32x32xf32>
    %429 = vector.shape_cast %428 : vector<1x32x32xf32> to vector<32x32xf32>
    %cst_254 = arith.constant dense<0.000000e+00> : vector<8x32xf32>
    %430 = tpu.matmul %416, %429, %cst_254 {dimension_numbers = #tpu.dot_dimension_numbers<[1], [0], [0], [1], [0, 0, 1, 1], [], []>} : vector<8x32xf32>, vector<32x32xf32>, vector<8x32xf32> -> vector<8x32xf32>
    %c1_255 = arith.constant 1 : index
    %c0_256 = arith.constant 0 : index
    %c0_257 = arith.constant 0 : index
    %431 = vector.load %arg19[%c1_255, %c0_256, %c0_257] : memref<2x1x32xf32, #tpu.memory_space<vmem>>, vector<1x1x32xf32>
    %432 = vector.shape_cast %431 : vector<1x1x32xf32> to vector<1x32xf32>
    %433 = vector.broadcast %432 : vector<1x32xf32> to vector<8x32xf32>
    %434 = arith.mulf %430, %433 : vector<8x32xf32>
    %c1_258 = arith.constant 1 : index
    %c0_259 = arith.constant 0 : index
    %c0_260 = arith.constant 0 : index
    %435 = vector.load %arg20[%c1_258, %c0_259, %c0_260] : memref<2x1x32xf32, #tpu.memory_space<vmem>>, vector<1x1x32xf32>
    %436 = vector.shape_cast %435 : vector<1x1x32xf32> to vector<1x32xf32>
    %437 = vector.broadcast %436 : vector<1x32xf32> to vector<8x32xf32>
    %438 = arith.addf %434, %437 : vector<8x32xf32>
    %cst_261 = arith.constant 0.000000e+00 : f32
    %439 = vector.broadcast %cst_261 : f32 to vector<8x32xf32>
    %440 = arith.cmpf ogt, %438, %439 : vector<8x32xf32>
    %cst_262 = arith.constant 0.000000e+00 : f32
    %441 = vector.broadcast %cst_262 : f32 to vector<8x32xf32>
    %442 = arith.minimumf %438, %441 : vector<8x32xf32>
    %443 = math.exp %442 : vector<8x32xf32>
    %cst_263 = arith.constant 1.000000e+00 : f32
    %444 = vector.broadcast %cst_263 : f32 to vector<8x32xf32>
    %445 = arith.subf %443, %444 : vector<8x32xf32>
    %446 = arith.select %440, %438, %445 : vector<8x32xi1>, vector<8x32xf32>
    %c1_264 = arith.constant 1 : index
    %c0_265 = arith.constant 0 : index
    %c0_266 = arith.constant 0 : index
    %447 = vector.load %arg21[%c1_264, %c0_265, %c0_266] : memref<2x32x9xf32, #tpu.memory_space<vmem>>, vector<1x32x9xf32>
    %448 = vector.shape_cast %447 : vector<1x32x9xf32> to vector<32x9xf32>
    %cst_267 = arith.constant dense<0.000000e+00> : vector<8x9xf32>
    %449 = tpu.matmul %446, %448, %cst_267 {dimension_numbers = #tpu.dot_dimension_numbers<[1], [0], [0], [1], [0, 0, 1, 1], [], []>} : vector<8x32xf32>, vector<32x9xf32>, vector<8x9xf32> -> vector<8x9xf32>
    %c1_268 = arith.constant 1 : index
    %c0_269 = arith.constant 0 : index
    %c0_270 = arith.constant 0 : index
    %450 = vector.load %arg22[%c1_268, %c0_269, %c0_270] : memref<2x1x9xf32, #tpu.memory_space<vmem>>, vector<1x1x9xf32>
    %451 = vector.shape_cast %450 : vector<1x1x9xf32> to vector<1x9xf32>
    %452 = vector.broadcast %451 : vector<1x9xf32> to vector<8x9xf32>
    %453 = arith.addf %449, %452 : vector<8x9xf32>
    %454 = tpu.transpose %453, [1, 0] : vector<8x9xf32> -> vector<9x8xf32>
    %c0_271 = arith.constant 0 : index
    %c1_272 = arith.constant 1 : index
    %c0_273 = arith.constant 0 : index
    %c0_274 = arith.constant 0 : index
    %455 = vector.load %arg23[%c0_271, %c1_272, %c0_273, %c0_274] : memref<1x2x9x8xf32, #tpu.memory_space<vmem>>, vector<1x1x9x8xf32>
    %456 = vector.shape_cast %455 : vector<1x1x9x8xf32> to vector<9x8xf32>
    %457 = vector.shape_cast %454 : vector<9x8xf32> to vector<1x1x9x8xf32>
    tpu.vector_store %arg23[%c0_271, %c1_272, %c0_273, %c0_274], %457 {strides = array<i32>} : memref<1x2x9x8xf32, #tpu.memory_space<vmem>>, vector<1x1x9x8xf32>,
    return
  }
  func.func @transform_0(%arg0: i32) -> (i32, i32, i32, i32) {
    %c0_i32 = arith.constant 0 : i32
    %c0_i32_0 = arith.constant 0 : i32
    %c0_i32_1 = arith.constant 0 : i32
    %c0_i32_2 = arith.constant 0 : i32
    return %arg0, %c0_i32, %c0_i32_0, %c0_i32_1 : i32, i32, i32, i32
  }
  func.func @transform_1(%arg0: i32) -> (i32, i32) {
    %c0_i32 = arith.constant 0 : i32
    %c0_i32_0 = arith.constant 0 : i32
    %c0_i32_1 = arith.constant 0 : i32
    return %c0_i32, %c0_i32_0 : i32, i32
  }
  func.func @transform_2(%arg0: i32) -> (i32, i32) {
    %c0_i32 = arith.constant 0 : i32
    %c0_i32_0 = arith.constant 0 : i32
    %c0_i32_1 = arith.constant 0 : i32
    return %c0_i32, %c0_i32_0 : i32, i32
  }
  func.func @transform_3(%arg0: i32) -> (i32, i32) {
    %c0_i32 = arith.constant 0 : i32
    %c0_i32_0 = arith.constant 0 : i32
    %c0_i32_1 = arith.constant 0 : i32
    return %c0_i32, %c0_i32_0 : i32, i32
  }
  func.func @transform_4(%arg0: i32) -> (i32, i32) {
    %c0_i32 = arith.constant 0 : i32
    %c0_i32_0 = arith.constant 0 : i32
    %c0_i32_1 = arith.constant 0 : i32
    return %c0_i32, %c0_i32_0 : i32, i32
  }
  func.func @transform_5(%arg0: i32) -> (i32, i32) {
    %c0_i32 = arith.constant 0 : i32
    %c0_i32_0 = arith.constant 0 : i32
    %c0_i32_1 = arith.constant 0 : i32
    return %c0_i32, %c0_i32_0 : i32, i32
  }
  func.func @transform_6(%arg0: i32) -> (i32, i32) {
    %c0_i32 = arith.constant 0 : i32
    %c0_i32_0 = arith.constant 0 : i32
    %c0_i32_1 = arith.constant 0 : i32
    return %c0_i32, %c0_i32_0 : i32, i32
  }
  func.func @transform_7(%arg0: i32) -> (i32, i32) {
    %c0_i32 = arith.constant 0 : i32
    %c0_i32_0 = arith.constant 0 : i32
    %c0_i32_1 = arith.constant 0 : i32
    return %c0_i32, %c0_i32_0 : i32, i32
  }
  func.func @transform_8(%arg0: i32) -> (i32, i32) {
    %c0_i32 = arith.constant 0 : i32
    %c0_i32_0 = arith.constant 0 : i32
    %c0_i32_1 = arith.constant 0 : i32
    return %c0_i32, %c0_i32_0 : i32, i32
  }
  func.func @transform_9(%arg0: i32) -> (i32, i32) {
    %c0_i32 = arith.constant 0 : i32
    %c0_i32_0 = arith.constant 0 : i32
    %c0_i32_1 = arith.constant 0 : i32
    return %c0_i32, %c0_i32_0 : i32, i32
  }
  func.func @transform_10(%arg0: i32) -> (i32, i32) {
    %c0_i32 = arith.constant 0 : i32
    %c0_i32_0 = arith.constant 0 : i32
    %c0_i32_1 = arith.constant 0 : i32
    return %c0_i32, %c0_i32_0 : i32, i32
  }
  func.func @transform_11(%arg0: i32) -> (i32, i32) {
    %c0_i32 = arith.constant 0 : i32
    %c0_i32_0 = arith.constant 0 : i32
    %c0_i32_1 = arith.constant 0 : i32
    return %c0_i32, %c0_i32_0 : i32, i32
  }
  func.func @transform_12(%arg0: i32) -> (i32, i32) {
    %c0_i32 = arith.constant 0 : i32
    %c0_i32_0 = arith.constant 0 : i32
    %c0_i32_1 = arith.constant 0 : i32
    return %c0_i32, %c0_i32_0 : i32, i32
  }
  func.func @transform_13(%arg0: i32) -> (i32, i32) {
    %c0_i32 = arith.constant 0 : i32
    %c0_i32_0 = arith.constant 0 : i32
    %c0_i32_1 = arith.constant 0 : i32
    return %c0_i32, %c0_i32_0 : i32, i32
  }
  func.func @transform_14(%arg0: i32) -> (i32, i32) {
    %c0_i32 = arith.constant 0 : i32
    %c0_i32_0 = arith.constant 0 : i32
    %c0_i32_1 = arith.constant 0 : i32
    return %c0_i32, %c0_i32_0 : i32, i32
  }
  func.func @transform_15(%arg0: i32) -> (i32, i32) {
    %c0_i32 = arith.constant 0 : i32
    %c0_i32_0 = arith.constant 0 : i32
    %c0_i32_1 = arith.constant 0 : i32
    return %c0_i32, %c0_i32_0 : i32, i32
  }
  func.func @transform_16(%arg0: i32) -> (i32, i32) {
    %c0_i32 = arith.constant 0 : i32
    %c0_i32_0 = arith.constant 0 : i32
    %c0_i32_1 = arith.constant 0 : i32
    return %c0_i32, %c0_i32_0 : i32, i32
  }
  func.func @transform_17(%arg0: i32) -> (i32, i32, i32) {
    %c0_i32 = arith.constant 0 : i32
    %c0_i32_0 = arith.constant 0 : i32
    %c0_i32_1 = arith.constant 0 : i32
    %c0_i32_2 = arith.constant 0 : i32
    return %c0_i32, %c0_i32_0, %c0_i32_1 : i32, i32, i32
  }
  func.func @transform_18(%arg0: i32) -> (i32, i32, i32) {
    %c0_i32 = arith.constant 0 : i32
    %c0_i32_0 = arith.constant 0 : i32
    %c0_i32_1 = arith.constant 0 : i32
    %c0_i32_2 = arith.constant 0 : i32
    return %c0_i32, %c0_i32_0, %c0_i32_1 : i32, i32, i32
  }
  func.func @transform_19(%arg0: i32) -> (i32, i32, i32) {
    %c0_i32 = arith.constant 0 : i32
    %c0_i32_0 = arith.constant 0 : i32
    %c0_i32_1 = arith.constant 0 : i32
    %c0_i32_2 = arith.constant 0 : i32
    return %c0_i32, %c0_i32_0, %c0_i32_1 : i32, i32, i32
  }
  func.func @transform_20(%arg0: i32) -> (i32, i32, i32) {
    %c0_i32 = arith.constant 0 : i32
    %c0_i32_0 = arith.constant 0 : i32
    %c0_i32_1 = arith.constant 0 : i32
    %c0_i32_2 = arith.constant 0 : i32
    return %c0_i32, %c0_i32_0, %c0_i32_1 : i32, i32, i32
  }
  func.func @transform_21(%arg0: i32) -> (i32, i32, i32) {
    %c0_i32 = arith.constant 0 : i32
    %c0_i32_0 = arith.constant 0 : i32
    %c0_i32_1 = arith.constant 0 : i32
    %c0_i32_2 = arith.constant 0 : i32
    return %c0_i32, %c0_i32_0, %c0_i32_1 : i32, i32, i32
  }
  func.func @transform_22(%arg0: i32) -> (i32, i32, i32, i32) {
    %c0_i32 = arith.constant 0 : i32
    %c0_i32_0 = arith.constant 0 : i32
    %c0_i32_1 = arith.constant 0 : i32
    %c0_i32_2 = arith.constant 0 : i32
    return %arg0, %c0_i32, %c0_i32_0, %c0_i32_1 : i32, i32, i32, i32
  }
}

</mosaic_0001>

<bundles_post_ra>
// kernel: crn_forward.1
= control target key start
LH: loop header
LB: loop body
LE: loop exit
PB: predicated region body
PF: predicated region fallthrough
CT: control target
= control target key end

     0   :  { %s12627_s0 = inlined_call_operand.vmem [shape: f32[2,4,16,8], index: 0, kind: input, shape index: {}]   ;;  %s12628_s1 = inlined_call_operand.vmem [shape: f32[8,36], index: 1, kind: input, shape index: {}]   ;;  %s12629_s2 = inlined_call_operand.vmem [shape: f32[8,1], index: 2, kind: input, shape index: {}]   ;;  %s12630_s3 = inlined_call_operand.vmem [shape: f32[8,1], index: 3, kind: input, shape index: {}]   ;;  %s12631_s4 = inlined_call_operand.vmem [shape: f32[8,72], index: 4, kind: input, shape index: {}]   ;;  %s12632_s5 = inlined_call_operand.vmem [shape: f32[8,1], index: 5, kind: input, shape index: {}]   ;;  %s12633_s6 = inlined_call_operand.vmem [shape: f32[8,1], index: 6, kind: input, shape index: {}]   ;;  %s12634_s7 = inlined_call_operand.vmem [shape: f32[32,32], index: 7, kind: input, shape index: {}]   ;;  %s12635_s8 = inlined_call_operand.vmem [shape: f32[32,32], index: 8, kind: input, shape index: {}]   ;;  %s12636_s9 = inlined_call_operand.vmem [shape: f32[32,32], index: 9, kind: input, shape index: {}]   ;;  %s12637_s10 = inlined_call_operand.vmem [shape: f32[32,32], index: 10, kind: input, shape index: {}]   ;;  %s12638_s11 = inlined_call_operand.vmem [shape: f32[32,32], index: 11, kind: input, shape index: {}]   ;;  %s12639_s12 = inlined_call_operand.vmem [shape: f32[32,32], index: 12, kind: input, shape index: {}]   ;;  %s12640_s13 = inlined_call_operand.vmem [shape: f32[1,32], index: 13, kind: input, shape index: {}]   ;;  %s12641_s14 = inlined_call_operand.vmem [shape: f32[1,32], index: 14, kind: input, shape index: {}]   ;;  %s12642_s15 = inlined_call_operand.vmem [shape: f32[1,32], index: 15, kind: input, shape index: {}]   ;;  %s12643_s16 = inlined_call_operand.vmem [shape: f32[1,32], index: 16, kind: input, shape index: {}]   ;;  %s12644_s17 = inlined_call_operand.vmem [shape: f32[2,32,32], index: 17, kind: input, shape index: {}]   ;;  %s12645_s18 = inlined_call_operand.hbm [shape: f32[2,1,32], index: 18, kind: input, shape index: {}]   ;;  %s12646_s19 = inlined_call_operand.hbm [shape: f32[2,1,32], index: 19, kind: input, shape index: {}]   ;;  %s12647_s20 = inlined_call_operand.vmem [shape: f32[2,32,9], index: 20, kind: input, shape index: {}]   ;;  %s12648_s21 = inlined_call_operand.hbm [shape: f32[2,1,9], index: 21, kind: input, shape index: {}]   ;;  %s12649_s22 = inlined_call_operand.vmem [shape: f32[2,2,9,8], index: 22, kind: output, shape index: {}]  }
   0x1   :  { %12716 = sst [smem:[#allocation54_spill]] %s12627_s0 }
   0x2   :  { %12717 = sst [smem:[#allocation55_spill]] %s12628_s1 }
   0x3   :  { %12718 = sst [smem:[#allocation56_spill]] %s12629_s2 }
   0x4   :  { %12719 = sst [smem:[#allocation57_spill]] %s12630_s3 }
   0x5   :  { %12720 = sst [smem:[#allocation58_spill]] %s12631_s4 }
   0x6   :  { %12721 = sst [smem:[#allocation59_spill]] %s12632_s5 }
   0x7   :  { %12722 = sst [smem:[#allocation60_spill]] %s12633_s6 }
   0x8   :  { %12723 = sst [smem:[#allocation61_spill]] %s12644_s17 }
   0x9   :  { %12724 = sst [smem:[#allocation62_spill]] %s12647_s20 }
   0xa   :  { %12725 = sst [smem:[#allocation63_spill]] %s12649_s22 }
   0xb   :  { %27 = vsyncpa [#allocation7], 0 }
   0xc   :  { %28 = vsyncpa [#allocation9], 0  ;;  %s9651_s3 = smov 0  }
   0xd LB: > { %12726 = sst [smem:[#allocation13_spill]] %s9505_s3  ;;  %s9657_s28 = sadd.s32 4294967295, %s9505_s3   ;;  %s9505_s3 = sphi %s9651_s3, %s34_s3  }
   0xe   : > { %p7953_p0 = scmp.ge.s32.totalorder %s9505_s3, 1  ;;  %p532_p1 = scmp.lt.s32.totalorder %s9505_s3, 3 }
   0xf   : > { %p12650_p2 = scmp.eq.s32.totalorder %s9657_s28, 0  ;;  %s9507_s30 = smov [#allocation8]  }
  0x10   : > { %p9662_p3 = pnand %p7953_p0, %p532_p1  ;;  %s608_s4 = sshll.u32 %s9507_s30, 4  ;;  %s609_s4 = int_to_ptr.vmem [resolvable:$true] %s608_s4 }
  0x11   : > { %s9508_s0 = smov [#allocation6]   ;;  %s9509_s5 = smov [#allocation10]  }
  0x12   : > { %s12727_s29 = scalar_select %p9662_p3, 1, 0 }
  0x13   : > { %p8802_p4 = pneg %p9662_p3  ;;  %s595_s23 = sshll.u32 %s9508_s0, 4  ;;  %s9674_s23 = int_to_ptr.vmem [resolvable:$true] %s595_s23 }
  0x14   : > { %s624_s24 = sshll.u32 %s9509_s5, 4  ;;  %s9407_s26 = scalar_lea.hbm %s12646_s19, 32  ;;  %s9676_s24 = int_to_ptr.vmem [resolvable:$true] %s624_s24 }
  0x15   : > { %p9670_p5 = pnand %p12650_p2, %p8802_p4  ;;  %p9408_p6 = scmp.ne.s32.totalorder %s12646_s19, %s9407_s26 }
  0x16   : > { %p9414_p10 = scmp.lt.u32.totalorder %s9407_s26, %s12646_s19 }
  0x17   : > { %p9686_p7 = pneg %p9670_p5 }
  0x19   : > { %p9410_p8 = pnand %p9686_p7, %p9408_p6 }
  0x1b   : > { %p9411_p9 = pneg %p9410_p8 }
  0x1d   : > { %p9416_p11 = pnand %p9414_p10, %p9411_p9 }
  0x1f   : > { %9419 = shalt.err (!%p9416_p11)
}
  0x20   : > { %s9420_s6 = scalar_lea.vmem %s609_s4, 32  ;;  %p9428_p1 = scmp.lt.s32.totalorder %s609_s4, %s609_s4 }
  0x21   : > { %p9421_p12 = scmp.ne.s32.totalorder %s609_s4, %s9420_s6  ;;  %p9429_p4 = scmp.lt.s32.totalorder %s9420_s6, %s9420_s6 }
  0x23   : > { %p9423_p13 = pnand %p9421_p12, %p9686_p7  ;;  %p9430_p2 = por %p9429_p4, %p9428_p1 }
  0x25   : > { %p9424_p0 = pneg %p9423_p13 }
  0x27   : > { %p9431_p3 = pnand %p9430_p2, %p9424_p0 }
  0x29   : > { %9434 = shalt.err (!%p9431_p3)
}
  0x2a   : > { %s9510_s25 = smov 16   ;;  %s9511_s2 = smov 1  }
  0x2b   : > { %8808 = dma.hbm_to_vmem [thread:$0]  (!%p9670_p5), %s12646_s19, 32, %s609_s4, [#allocation9], %s9510_s25, %s9510_s25, %s9511_s2  }
  0x2c   : > { %s9435_s3 = scalar_lea.hbm %s12645_s18, 32 }
  0x2d   : > { %p9436_p2 = scmp.ne.s32.totalorder %s12645_s18, %s9435_s3  ;;  %p9442_p8 = scmp.lt.u32.totalorder %s9435_s3, %s12645_s18 }
  0x2f   : > { %p9438_p3 = pnand %p9436_p2, %p9686_p7 }
  0x31   : > { %p9439_p6 = pneg %p9438_p3 }
  0x33   : > { %p9444_p9 = pnand %p9442_p8, %p9439_p6 }
  0x35   : > { %9447 = shalt.err (!%p9444_p9)
}
  0x36   : > { %s9448_s4 = scalar_lea.vmem %s9674_s23, 32  ;;  %p9456_p13 = scmp.lt.s32.totalorder %s9674_s23, %s9674_s23 }
  0x37   : > { %p9449_p10 = scmp.ne.s32.totalorder %s9674_s23, %s9448_s4  ;;  %p9457_p0 = scmp.lt.s32.totalorder %s9448_s4, %s9448_s4 }
  0x39   : > { %p9451_p11 = pnand %p9449_p10, %p9686_p7  ;;  %p9458_p1 = por %p9457_p0, %p9456_p13 }
  0x3b   : > { %p9452_p12 = pneg %p9451_p11 }
  0x3d   : > { %p9459_p4 = pnand %p9458_p1, %p9452_p12 }
  0x3f   : > { %9462 = shalt.err (!%p9459_p4)
}
  0x40   : > { %8805 = dma.hbm_to_vmem [thread:$0]  (!%p9670_p5), %s12645_s18, 32, %s9674_s23, [#allocation7], %s9510_s25, %s9510_s25, %s9511_s2  }
  0x41   : > { %s9463_s26 = scalar_lea.hbm %s12648_s21, 32 }
  0x42   : > { %p9464_p2 = scmp.ne.s32.totalorder %s12648_s21, %s9463_s26  ;;  %p9470_p8 = scmp.lt.u32.totalorder %s9463_s26, %s12648_s21 }
  0x44   : > { %p9466_p3 = pnand %p9464_p2, %p9686_p7 }
  0x46   : > { %p9467_p6 = pneg %p9466_p3 }
  0x48   : > { %p9472_p9 = pnand %p9470_p8, %p9467_p6 }
  0x4a   : > { %9475 = shalt.err (!%p9472_p9)
}
  0x4b   : > { %s9476_s23 = scalar_lea.vmem %s9676_s24, 32  ;;  %p9484_p13 = scmp.lt.s32.totalorder %s9676_s24, %s9676_s24 }
  0x4c   : > { %p9477_p10 = scmp.ne.s32.totalorder %s9676_s24, %s9476_s23  ;;  %p9485_p0 = scmp.lt.s32.totalorder %s9476_s23, %s9476_s23 }
  0x4e   : > { %p9479_p11 = pnand %p9477_p10, %p9686_p7  ;;  %p9486_p1 = por %p9485_p0, %p9484_p13 }
  0x50   : > { %p9480_p12 = pneg %p9479_p11 }
  0x52   : > { %p9487_p4 = pnand %p9486_p1, %p9480_p12 }
  0x54   : > { %9490 = shalt.err (!%p9487_p4)
}
  0x55   : > { %8811 = dma.hbm_to_vmem [thread:$0]  (!%p9670_p5), %s12648_s21, 32, %s9676_s24, [#allocation9], %s9510_s25, %s9510_s25, %s9511_s2  }
  0x56   : > { %p12730_p2 = scmp.ne.s32.totalorder %s12727_s29, 0 }
  0x58   : > { %648 = sbr.rel (%p12730_p2) target bundleno = 5161 (0x1429), region = 108 }
  0x5f   : > { %p12731_p7 = scmp.eq.s32.totalorder %s9657_s28, 0 }
  0x61   : > { %9496 = dma.done.wait (%p12731_p7), [#allocation7], 32   ;;  %p12732_p3 = pmov %p12731_p7 }
  0x63   : > { %9498 = vsyncadd (%p12732_p3), [#allocation7], 4294967264  ;;  %p12733_p6 = pmov %p12732_p3 }
  0x64   : > { %p12734_p8 = pmov %p12732_p3 }
  0x65   : > { %9500 = dma.done.wait (%p12733_p6), [#allocation9], 64  }
  0x66   : > { %9502 = vsyncadd (%p12734_p8), [#allocation9], 4294967232  ;;  %p718_p9 = scmp.lt.s32.totalorder %s9657_s28, 1  ;;  %vm736_vm0 = vcmask 80896   ;;  %v12659_v0 = vmov 0.0   ;;  %vm739_vm1 = vcmask 74752   ;;  %v804_v13 = vlaneseq }
  0x67   : > { %744 = vst.msk [vmem:[#allocation2 + $0x30] sm:$0xff] %vm736_vm0, %v12659_v0  ;;  %745 = vst.msk [vmem:[#allocation2 + $0x38] sm:$0xff] %vm736_vm0, %v12659_v0  ;;  %s12735_s30 = sld [smem:[#allocation54_spill]]  ;;  %s9513_s2 = smov 2   ;;  %vm12711_vm2 = vcmask 80912   ;;  %vm12712_vm3 = vmmov 0  }
  0x68   : > { %737 = vst.msk [vmem:[#allocation2] sm:$0xff] %vm736_vm0, %v12659_v0  ;;  %738 = vst.msk [vmem:[#allocation2 + $0x8] sm:$0xff] %vm736_vm0, %v12659_v0  ;;  %s12937_s28 = smov (!%p718_p9, %s9657_s28), 1  ;;  %v9514_v11 = vmov 1983009808   ;;  %v9833_v17 = vshrl.u32 %v804_v13, 7 }
  0x69   : > { %741 = vst.msk [vmem:[#allocation2 + $0x18] sm:$0xff] %vm736_vm0, %v12659_v0  ;;  %742 = vst.msk [vmem:[#allocation2 + $0x20] sm:$0xff] %vm736_vm0, %v12659_v0  ;;  %s8038_s29 = sshll.u32 %s12937_s28, 6  ;;  %v802_v12 = vunpack.c.l.s4 %v9514_v11  ;;  %s9515_s20 = smov 127   ;;  %vm995_vm4 = vcmask 64512   ;;  %vm997_vm5 = vcmask 130048  }
  0x6a   : > { %747 = vst.msk [vmem:[#allocation2 + $0x48] sm:$0xff] %vm736_vm0, %v12659_v0  ;;  %748 = vst.msk [vmem:[#allocation2 + $0x50] sm:$0xff] %vm736_vm0, %v12659_v0  ;;  %s12695_s22 = smov 126   ;;  %s9518_s3 = smov 16   ;;  %vm999_vm6 = vcmask 195584   ;;  %vm1001_vm7 = vcmask 261120  }
  0x6b   : > { %3210 = vst.msk [vmem:[#allocation3] sm:$0xff] %vm736_vm0, %v12659_v0  ;;  %3212 = vst.msk [vmem:[#allocation3 + $0x10] sm:$0xff] %vm736_vm0, %v12659_v0  ;;  %v803_v16 = vunpack.c.0.s8 %v802_v12  ;;  %s9519_s26 = smov 32   ;;  %s9520_s27 = smov 48   ;;  %vm1003_vm8 = vcmask 326656   ;;  %vm1005_vm9 = vcmask 392192  }
  0x6c   : > { %3214 = vst.msk [vmem:[#allocation3 + $0x20] sm:$0xff] %vm736_vm0, %v12659_v0  ;;  %3216 = vst.msk [vmem:[#allocation3 + $0x30] sm:$0xff] %vm736_vm0, %v12659_v0  ;;  %s9521_s0 = smov 64   ;;  %s9522_s5 = smov 80   ;;  %vm1007_vm10 = vcmask 457728   ;;  %vm1009_vm11 = vcmask 523264  }
  0x6d   : > { %3218 = vst.msk [vmem:[#allocation3 + $0x40] sm:$0xff] %vm736_vm0, %v12659_v0  ;;  %3220 = vst.msk [vmem:[#allocation3 + $0x50] sm:$0xff] %vm736_vm0, %v12659_v0  ;;  %s722_s25 = scalar_lea.vmem %s12735_s30, %s8038_s29  ;;  %v9847_v28 = vsub.s32 %v803_v16, %v9833_v17  ;;  %s9523_s6 = smov 96   ;;  %vm1011_vm12 = vcmask 588800   ;;  %vm1013_vm13 = vcmask 654336   ;;  %vm1015_vm14 = vcmask 719872  }
  0x6e   : > { %3222 = vst.msk [vmem:[#allocation3 + $0x60] sm:$0xff] %vm736_vm0, %v12659_v0  ;;  %3224 = vst.msk [vmem:[#allocation3 + $0x70] sm:$0xff] %vm736_vm0, %v12659_v0  ;;  %v732_v1 = vld [vmem:[%s722_s25 + $0x20] sm:$0xff]  ;;  %v734_v3 = vld [vmem:[%s722_s25 + $0x30] sm:$0xff]  ;;  %s9524_s23 = smov 112   ;;  %s9525_s4 = smov 8  }
  0x6f   : > { %743 = vst.msk [vmem:[#allocation2 + $0x28] sm:$0x3] %vm739_vm1, %v12659_v0  ;;  %740 = vst.msk [vmem:[#allocation2 + $0x10] sm:$0x3] %vm739_vm1, %v12659_v0  ;;  %v728_v2 = vld [vmem:[%s722_s25] sm:$0xff]  ;;  %766 = vrot.lane.b32.xlu1 %v732_v1, %s9513_s2  ;;  %v730_v4 = vld [vmem:[%s722_s25 + $0x10] sm:$0xff] }
  0x70   : > { %746 = vst.msk [vmem:[#allocation2 + $0x40] sm:$0x3] %vm739_vm1, %v12659_v0  ;;  %749 = vst.msk [vmem:[#allocation2 + $0x58] sm:$0x3] %vm739_vm1, %v12659_v0  ;;  %758 = vrot.lane.b32.xlu0 %v728_v2, %s9513_s2  ;;  %v731_v5 = vld [vmem:[%s722_s25 + $0x18] sm:$0xff]  ;;  %v729_v6 = vld [vmem:[%s722_s25 + $0x8] sm:$0xff] }
  0x71   : > { %3211 = vst.msk [vmem:[#allocation3 + $0x8] sm:$0x3] %vm739_vm1, %v12659_v0  ;;  %3213 = vst.msk [vmem:[#allocation3 + $0x18] sm:$0x3] %vm739_vm1, %v12659_v0  ;;  %v735_v7 = vld [vmem:[%s722_s25 + $0x38] sm:$0xff]  ;;  %v733_v8 = vld [vmem:[%s722_s25 + $0x28] sm:$0xff] }
  0x72   : > { %3215 = vst.msk [vmem:[#allocation3 + $0x28] sm:$0x3] %vm739_vm1, %v12659_v0  ;;  %3217 = vst.msk [vmem:[#allocation3 + $0x38] sm:$0x3] %vm739_vm1, %v12659_v0  ;;  %s12701_s17 = smov 24   ;;  %s12699_s29 = smov 40  }
  0x73   : > { %3219 = vst.msk [vmem:[#allocation3 + $0x48] sm:$0x3] %vm739_vm1, %v12659_v0  ;;  %3221 = vst.msk [vmem:[#allocation3 + $0x58] sm:$0x3] %vm739_vm1, %v12659_v0  ;;  %770 = vrot.lane.b32.xlu1 %v734_v3, %s9513_s2  ;;  %s12697_s1 = smov 56   ;;  %s9529_s24 = smov 72  }
  0x74   : > { %3223 = vst.msk [vmem:[#allocation3 + $0x68] sm:$0x3] %vm739_vm1, %v12659_v0  ;;  %3225 = vst.msk [vmem:[#allocation3 + $0x78] sm:$0x3] %vm739_vm1, %v12659_v0  ;;  %762 = vrot.lane.b32.xlu0 %v730_v4, %s9513_s2  ;;  %s9530_s30 = smov 88   ;;  %s9531_s25 = smov 104  }
  0x75   : > { %12736 = vst [vmem:[#allocation14_spill] sm:$0xff] %v9847_v28  ;;  %vm1017_vm15 = vcmask 785408   ;;  %vm1019_vm0 = vcmask 850944   ;;  %vm1021_vm1 = vcmask 916480  }
  0x77   : > { %764 = vrot.lane.b32.xlu1 %v731_v5, %s9513_s2 }
  0x78   : > { %760 = vrot.lane.b32.xlu0 %v729_v6, %s9513_s2 }
  0x7b   : > { %772 = vrot.lane.b32.xlu1 %v735_v7, %s9513_s2 }
  0x7c   : > { %768 = vrot.lane.b32.xlu0 %v733_v8, %s9513_s2 }
  0xe1   : > { %v767_v9 = vpop.permute.xlu1 %766 }
  0xe2   : > { %v759_v10 = vpop.permute.xlu0 %758  ;;  %787 = vst.msk [vmem:[#allocation2 + $0x31] sm:$0xff] %vm12711_vm2, %v767_v9 }
  0xe3   : > { %783 = vst.msk [vmem:[#allocation2 + $0x1] sm:$0xff] %vm12711_vm2, %v759_v10 }
  0xe5   : > { %v771_v14 = vpop.permute.xlu1 %770 }
  0xe6   : > { %v763_v15 = vpop.permute.xlu0 %762  ;;  %789 = vst.msk [vmem:[#allocation2 + $0x49] sm:$0xff] %vm12711_vm2, %v771_v14 }
  0xe7   : > { %785 = vst.msk [vmem:[#allocation2 + $0x19] sm:$0xff] %vm12711_vm2, %v763_v15 }
  0xe9   : > { %v765_v18 = vpop.permute.xlu1 %764  ;;  %v795_v21 = vld [vmem:[#allocation2 + $0x30] sm:$0xff] }
  0xea   : > { %v761_v19 = vpop.permute.xlu0 %760  ;;  %v791_v20 = vld [vmem:[#allocation2] sm:$0xff]  ;;  %786 = vst.msk [vmem:[#allocation2 + $0x21] sm:$0xff] %vm12711_vm2, %v765_v18  ;;  %v9840_v25 = vld [vmem:[#allocation2 + $0x31] sm:$0xff] }
  0xeb   : > { %v9835_v22 = vld [vmem:[#allocation2 + $0x1] sm:$0xff]  ;;  %784 = vst.msk [vmem:[#allocation2 + $0x9] sm:$0xff] %vm12711_vm2, %v761_v19  ;;  %1033 = vrot.lane.b32.xlu0 %v791_v20, %s9515_s20  ;;  %v799_v23 = vcombine.low %v791_v20, %v795_v21  ;;  %v800_v24 = vcombine.high %v791_v20, %v795_v21 }
  0xec   : > { %v1511_v26 = vcombine.low %v9835_v22, %v9840_v25  ;;  %v1512_v27 = vcombine.high %v9835_v22, %v9840_v25 }
  0xed   : > { %v773_v29 = vpop.permute.xlu1 %772  ;;  %v797_v32 = vld [vmem:[#allocation2 + $0x48] sm:$0xff]  ;;  %v9862_v39 = vrot.slane %v799_v23, %v9847_v28  ;;  %v9865_v40 = vrot.slane %v800_v24, %v9847_v28 }
  0xee   : > { %v769_v30 = vpop.permute.xlu0 %768  ;;  %v793_v31 = vld [vmem:[#allocation2 + $0x18] sm:$0xff]  ;;  %790 = vst.msk [vmem:[#allocation2 + $0x51] sm:$0xff] %vm12711_vm2, %v773_v29  ;;  %v9855_v36 = vld [vmem:[#allocation2 + $0x49] sm:$0xff]  ;;  %v9874_v43 = vrot.slane %v1511_v26, %v9847_v28  ;;  %v9877_v44 = vrot.slane %v1512_v27, %v9847_v28 }
  0xef   : > { %v9849_v33 = vld [vmem:[#allocation2 + $0x19] sm:$0xff]  ;;  %788 = vst.msk [vmem:[#allocation2 + $0x39] sm:$0xff] %vm12711_vm2, %v769_v30  ;;  %1041 = vrot.lane.b32.xlu0 %v795_v21, %s9515_s20  ;;  %1037 = vrot.lane.b32.xlu1 %v793_v31, %s9515_s20  ;;  %v815_v34 = vcombine.low %v793_v31, %v797_v32  ;;  %v816_v35 = vcombine.high %v793_v31, %v797_v32  ;;  %vm1023_vm2 = vcmask 982016  }
  0xf0   : > { %v1527_v37 = vcombine.low %v9849_v33, %v9855_v36  ;;  %v1528_v38 = vcombine.high %v9849_v33, %v9855_v36 }
  0xf1   : > { %v9868_v41 = vrot.slane %v815_v34, %v9847_v28  ;;  %v9871_v42 = vrot.slane %v816_v35, %v9847_v28  ;;  %v9903_v55 = vld [vmem:[#allocation2 + $0x1a] sm:$0xff]  ;;  %v9517_v35 = vmov 1934713408  }
  0xf2   : > { %v9880_v45 = vrot.slane %v1527_v37, %v9847_v28  ;;  %v9883_v46 = vrot.slane %v1528_v38, %v9847_v28  ;;  %v9901_v54 = vld [vmem:[#allocation2 + $0x2] sm:$0xff]  ;;  %v10008_v30 = vld [vmem:[#allocation2 + $0xa] sm:$0xff] }
  0xf3   : > { %1268 = vrot.lane.b32.xlu0 %v791_v20, %s12695_s22  ;;  %1045 = vrot.lane.b32.xlu1 %v797_v32, %s9515_s20  ;;  %v847_v47 = vcombine.low %v9865_v40, %v9871_v42  ;;  %v832_v48 = vcombine.high %v9862_v39, %v9868_v41  ;;  %v848_v49 = vcombine.high %v9865_v40, %v9871_v42  ;;  %v792_v62 = vld [vmem:[#allocation2 + $0x8] sm:$0xff]  ;;  %v794_v63 = vld [vmem:[#allocation2 + $0x20] sm:$0xff] }
  0xf4   : > { %v1544_v50 = vcombine.high %v9874_v43, %v9880_v45  ;;  %v1559_v51 = vcombine.low %v9877_v44, %v9883_v46  ;;  %v1560_v52 = vcombine.high %v9877_v44, %v9883_v46 }
  0xf5   : > { %v9909_v58 = vld [vmem:[#allocation2 + $0x4a] sm:$0xff] }
  0xf6   : > { %v9907_v57 = vld [vmem:[#allocation2 + $0x32] sm:$0xff]  ;;  %v2224_v2 = vcombine.low %v9903_v55, %v9909_v58  ;;  %v2225_v6 = vcombine.high %v9903_v55, %v9909_v58 }
  0xf7   : > { %v796_v59 = vld [vmem:[#allocation2 + $0x38] sm:$0xff]  ;;  %1276 = vrot.lane.b32.xlu0 %v795_v21, %s12695_s22  ;;  %1272 = vrot.lane.b32.xlu1 %v793_v31, %s12695_s22  ;;  %v2208_v60 = vcombine.low %v9901_v54, %v9907_v57  ;;  %v2209_v61 = vcombine.high %v9901_v54, %v9907_v57  ;;  %v798_v1 = vld [vmem:[#allocation2 + $0x50] sm:$0xff]  ;;  %v10014_v31 = vld [vmem:[#allocation2 + $0x22] sm:$0xff] }
  0xf8   : > { %v867_v3 = vcombine.low %v792_v62, %v796_v59  ;;  %v868_v4 = vcombine.high %v792_v62, %v796_v59  ;;  %v883_v5 = vcombine.low %v794_v63, %v798_v1  ;;  %v884_v7 = vcombine.high %v794_v63, %v798_v1  ;;  %v10000_v27 = vld [vmem:[#allocation2 + $0x39] sm:$0xff]  ;;  %v10006_v29 = vld [vmem:[#allocation2 + $0x51] sm:$0xff] }
  0xf9   : > { %v9925_v8 = vrot.slane %v2208_v60, %v9847_v28  ;;  %v9928_v9 = vrot.slane %v2224_v2, %v9847_v28  ;;  %v9937_v12 = vrot.slane %v2209_v61, %v9847_v28  ;;  %v9940_v13 = vrot.slane %v2225_v6, %v9847_v28 }
  0xfa   : > { %v9931_v10 = vrot.slane %v867_v3, %v9847_v28  ;;  %v9934_v11 = vrot.slane %v883_v5, %v9847_v28  ;;  %v9957_v20 = vrot.slane %v868_v4, %v9847_v28  ;;  %v9960_v21 = vrot.slane %v884_v7, %v9847_v28 }
  0xfb   : > { %1965 = vrot.lane.b32.xlu0 %v9835_v22, %s12695_s22  ;;  %1280 = vrot.lane.b32.xlu1 %v797_v32, %s12695_s22  ;;  %12737 = vst [vmem:[#allocation15_spill] sm:$0xff] %v9925_v8  ;;  %12738 = vst [vmem:[#allocation16_spill] sm:$0xff] %v9928_v9  ;;  %v10016_v32 = vld [vmem:[#allocation2 + $0x3a] sm:$0xff] }
  0xff   : > { %1973 = vrot.lane.b32.xlu0 %v9840_v25, %s12695_s22  ;;  %1969 = vrot.lane.b32.xlu1 %v9849_v33, %s12695_s22 }
 0x103   : > { %1977 = vrot.lane.b32.xlu1 %v9855_v36, %s12695_s22  ;;  %2427 = vrot.lane.b32.xlu0 %v9901_v54, %s9515_s20 }
 0x107   : > { %2431 = vrot.lane.b32.xlu1 %v9903_v55, %s9515_s20  ;;  %2435 = vrot.lane.b32.xlu0 %v9907_v57, %s9515_s20 }
 0x10b   : > { %2439 = vrot.lane.b32.xlu1 %v9909_v58, %s9515_s20  ;;  %1730 = vrot.lane.b32.xlu0 %v9835_v22, %s9515_s20  ;;  %v9993_v22 = vld [vmem:[#allocation2 + $0x9] sm:$0xff] }
 0x10f   : > { %1734 = vrot.lane.b32.xlu1 %v9849_v33, %s9515_s20  ;;  %1738 = vrot.lane.b32.xlu0 %v9840_v25, %s9515_s20  ;;  %v9998_v25 = vld [vmem:[#allocation2 + $0x21] sm:$0xff]  ;;  %v10022_v33 = vld [vmem:[#allocation2 + $0x52] sm:$0xff] }
 0x113   : > { %1742 = vrot.lane.b32.xlu1 %v9855_v36, %s9515_s20  ;;  %1035 = vrot.lane.b32.xlu0 %v792_v62, %s9515_s20  ;;  %v834_v36 = vunpack.c.l.s4 %v9517_v35 }
 0x117   : > { %1039 = vrot.lane.b32.xlu1 %v794_v63, %s9515_s20  ;;  %1043 = vrot.lane.b32.xlu0 %v796_v59, %s9515_s20 }
 0x11b   : > { %1047 = vrot.lane.b32.xlu1 %v798_v1, %s9515_s20  ;;  %1270 = vrot.lane.b32.xlu0 %v792_v62, %s12695_s22 }
 0x11f   : > { %1274 = vrot.lane.b32.xlu1 %v794_v63, %s12695_s22  ;;  %1278 = vrot.lane.b32.xlu0 %v796_v59, %s12695_s22 }
 0x123   : > { %1282 = vrot.lane.b32.xlu1 %v798_v1, %s12695_s22  ;;  %1967 = vrot.lane.b32.xlu0 %v9993_v22, %s12695_s22 }
 0x127   : > { %1971 = vrot.lane.b32.xlu1 %v9998_v25, %s12695_s22  ;;  %1975 = vrot.lane.b32.xlu0 %v10000_v27, %s12695_s22 }
 0x12b   : > { %1979 = vrot.lane.b32.xlu1 %v10006_v29, %s12695_s22  ;;  %2429 = vrot.lane.b32.xlu0 %v10008_v30, %s9515_s20 }
 0x12f   : > { %2433 = vrot.lane.b32.xlu1 %v10014_v31, %s9515_s20  ;;  %2437 = vrot.lane.b32.xlu0 %v10016_v32, %s9515_s20 }
 0x133   : > { %2441 = vrot.lane.b32.xlu1 %v10022_v33, %s9515_s20  ;;  %2662 = vrot.lane.b32.xlu0 %v9901_v54, %s12695_s22  ;;  %v835_v54 = vunpack.c.0.s8 %v834_v36 }
 0x135   : > { %v10051_v62 = vsub.s32 %v835_v54, %v9833_v17 }
 0x137   : > { %2666 = vrot.lane.b32.xlu1 %v9903_v55, %s12695_s22  ;;  %2670 = vrot.lane.b32.xlu0 %v9907_v57, %s12695_s22  ;;  %12739 = vst [vmem:[#allocation17_spill] sm:$0xff] %v10051_v62  ;;  %v10153_v44 = vrot.slane %v848_v49, %v10051_v62 }
 0x139   : > { %12745 = vst [vmem:[#allocation23_spill] sm:$0xff] %v10153_v44 }
 0x13b   : > { %2674 = vrot.lane.b32.xlu1 %v9909_v58, %s12695_s22  ;;  %1732 = vrot.lane.b32.xlu0 %v9993_v22, %s9515_s20 }
 0x13f   : > { %1736 = vrot.lane.b32.xlu1 %v9998_v25, %s9515_s20  ;;  %1740 = vrot.lane.b32.xlu0 %v10000_v27, %s9515_s20 }
 0x143   : > { %1744 = vrot.lane.b32.xlu1 %v10006_v29, %s9515_s20  ;;  %2664 = vrot.lane.b32.xlu0 %v10008_v30, %s12695_s22 }
 0x147   : > { %2668 = vrot.lane.b32.xlu1 %v10014_v31, %s12695_s22  ;;  %2672 = vrot.lane.b32.xlu0 %v10016_v32, %s12695_s22 }
 0x14b   : > { %2676 = vrot.lane.b32.xlu1 %v10022_v33, %s12695_s22  ;;  %s9532_s22 = smov 120  }
 0x15d   : > { %v1034_v34 = vpop.permute.xlu0 %1033 }
 0x161   : > { %v1038_v37 = vpop.permute.xlu1 %1037  ;;  %v1042_v38 = vpop.permute.xlu0 %1041 }
 0x162   : > { %v1057_v55 = vcombine.low %v1034_v34, %v1042_v38  ;;  %v1058_v57 = vcombine.high %v1034_v34, %v1042_v38 }
 0x164   : > { %v10054_v63 = vrot.slane %v1057_v55, %v9847_v28  ;;  %v1072_v1 = vrot.slane %v1058_v57, %v9847_v28 }
 0x165   : > { %v1046_v58 = vpop.permute.xlu1 %1045  ;;  %v1269_v59 = vpop.permute.xlu0 %1268 }
 0x166   : > { %v1073_v60 = vcombine.low %v1038_v37, %v1046_v58  ;;  %v1074_v61 = vcombine.high %v1038_v37, %v1046_v58  ;;  %v10072_v37 = vrot.slane %v1544_v50, %v10051_v62 }
 0x168   : > { %v10058_v2 = vrot.slane %v1073_v60, %v9847_v28  ;;  %v1088_v3 = vrot.slane %v1074_v61, %v9847_v28 }
 0x169   : > { %v1273_v4 = vpop.permute.xlu1 %1272  ;;  %v1277_v5 = vpop.permute.xlu0 %1276 }
 0x16a   : > { %v1090_v7 = vcombine.high %v10054_v63, %v10058_v2  ;;  %v1105_v17 = vcombine.low %v1072_v1, %v1088_v3  ;;  %v1292_v34 = vcombine.low %v1269_v59, %v1277_v5  ;;  %v1293_v35 = vcombine.high %v1269_v59, %v1277_v5 }
 0x16b   : > { %v10083_v59 = vrot.slane %v1559_v51, %v10051_v62 }
 0x16c   : > { %v10066_v36 = vrot.slane %v1090_v7, %v10051_v62  ;;  %v10077_v60 = vrot.slane %v1105_v17, %v10051_v62  ;;  %v10086_v61 = vrot.slane %v1292_v34, %v9847_v28  ;;  %v1307_v50 = vrot.slane %v1293_v35, %v9847_v28 }
 0x16d   : > { %v1281_v38 = vpop.permute.xlu1 %1280  ;;  %v1966_v54 = vpop.permute.xlu0 %1965  ;;  %v1106_v7 = vcombine.high %v1072_v1, %v1088_v3  ;;  %v10114_v3 = vrot.slane %v832_v48, %v10051_v62 }
 0x16e   : > { %v1308_v55 = vcombine.low %v1273_v4, %v1281_v38  ;;  %v1309_v57 = vcombine.high %v1273_v4, %v1281_v38  ;;  %v8855_v58 = vpack.i.bf16 %v10072_v37, %v10066_v36  ;;  %v8865_v35 = vpack.i.bf16 %v10083_v59, %v10077_v60 }
 0x170   : > { %v10090_v5 = vrot.slane %v1308_v55, %v9847_v28  ;;  %v1323_v4 = vrot.slane %v1309_v57, %v9847_v28  ;;  %8856 = vrot.lane.b32.xlu1 %v8855_v58, %s9518_s3  ;;  %v10104_v55 = vrot.slane %v847_v47, %v10051_v62  ;;  %v10120_v47 = vrot.slane %v1106_v7, %v10051_v62 }
 0x171   : > { %v1970_v17 = vpop.permute.xlu1 %1969  ;;  %v1974_v38 = vpop.permute.xlu0 %1973 }
 0x172   : > { %v1325_v34 = vcombine.high %v10086_v61, %v10090_v5  ;;  %v1340_v26 = vcombine.low %v1307_v50, %v1323_v4  ;;  %12740 = vst [vmem:[#allocation18_spill] sm:$0xff] %v10104_v55  ;;  %v1989_v57 = vcombine.low %v1966_v54, %v1974_v38  ;;  %12742 = vst [vmem:[#allocation20_spill] sm:$0xff] %v10120_v47 }
 0x173   : > { %v1341_v53 = vcombine.high %v1307_v50, %v1323_v4  ;;  %v10138_v50 = vrot.slane %v1560_v52, %v10051_v62  ;;  %v1990_v4 = vcombine.high %v1966_v54, %v1974_v38 }
 0x174   : > { %8866 = vrot.lane.b32.xlu1 %v8865_v35, %s9519_s26  ;;  %v10108_v1 = vrot.slane %v1340_v26, %v10051_v62  ;;  %v10117_v58 = vrot.slane %v1325_v34, %v10051_v62  ;;  %v10127_v48 = vrot.slane %v1989_v57, %v9847_v28 }
 0x175   : > { %v1978_v56 = vpop.permute.xlu1 %1977  ;;  %v2428_v51 = vpop.permute.xlu0 %2427  ;;  %12743 = vst [vmem:[#allocation21_spill] sm:$0xff] %v10138_v50  ;;  %v2004_v46 = vrot.slane %v1990_v4, %v9847_v28 }
 0x176   : > { %12741 = vst [vmem:[#allocation19_spill] sm:$0xff] %v10108_v1  ;;  %v2005_v6 = vcombine.low %v1970_v17, %v1978_v56  ;;  %v8870_v26 = vpack.i.bf16 %v10108_v1, %v10104_v55  ;;  %v8860_v35 = vpack.i.bf16 %v10117_v58, %v10114_v3  ;;  %v2006_v24 = vcombine.high %v1970_v17, %v1978_v56 }
 0x177   : > { %v10145_v17 = vrot.slane %v1341_v53, %v10051_v62 }
 0x178   : > { %v10130_v34 = vrot.slane %v2005_v6, %v9847_v28  ;;  %8871 = vrot.lane.b32.xlu1 %v8870_v26, %s9519_s26  ;;  %8861 = vrot.lane.b32.xlu0 %v8860_v35, %s9518_s3  ;;  %v8875_v6 = vpack.i.bf16 %v10138_v50, %v10120_v47  ;;  %v2020_v57 = vrot.slane %v2006_v24, %v9847_v28 }
 0x179   : > { %v2432_v7 = vpop.permute.xlu1 %2431  ;;  %v2436_v23 = vpop.permute.xlu0 %2435  ;;  %12744 = vst [vmem:[#allocation22_spill] sm:$0xff] %v10145_v17 }
 0x17a   : > { %v2451_v26 = vcombine.low %v2428_v51, %v2436_v23  ;;  %v2452_v35 = vcombine.high %v2428_v51, %v2436_v23  ;;  %v2022_v52 = vcombine.high %v10127_v48, %v10130_v34  ;;  %v8885_v23 = vpack.i.bf16 %v10145_v17, %v10153_v44 }
 0x17b   : > { %v2037_v51 = vcombine.low %v2004_v46, %v2020_v57 }
 0x17c   : > { %8876 = vrot.lane.b32.xlu0 %v8875_v6, %s9520_s27  ;;  %v2038_v6 = vcombine.high %v2004_v46, %v2020_v57  ;;  %v10163_v56 = vrot.slane %v2451_v26, %v9847_v28  ;;  %v2466_v40 = vrot.slane %v2452_v35, %v9847_v28 }
 0x17d   : > { %v2440_v53 = vpop.permute.xlu1 %2439  ;;  %v10158_v54 = vpop.permute.xlu0 %1730 }
 0x17e   : > { %v2467_v24 = vcombine.low %v2432_v7, %v2440_v53  ;;  %v2468_v38 = vcombine.high %v2432_v7, %v2440_v53  ;;  %v2036_v7 = vrot.slane %v2022_v52, %v10051_v62  ;;  %v10179_v53 = vrot.slane %v2037_v51, %v10051_v62 }
 0x180   : > { %v10167_v42 = vrot.slane %v2467_v24, %v9847_v28  ;;  %v2482_v49 = vrot.slane %v2468_v38, %v9847_v28  ;;  %8886 = vrot.lane.b32.xlu0 %v8885_v23, %s9520_s27  ;;  %v10182_v24 = vrot.slane %v2038_v6, %v10051_v62  ;;  %v10198_v6 = vcombine.high %v2036_v7, %v12659_v0 }
 0x181   : > { %v1735_v4 = vpop.permute.xlu1 %1734  ;;  %v10171_v19 = vpop.permute.xlu0 %1738 }
 0x182   : > { %v2484_v26 = vcombine.high %v10163_v56, %v10167_v42  ;;  %v2499_v46 = vcombine.low %v2466_v40, %v2482_v49  ;;  %v2500_v35 = vcombine.high %v2466_v40, %v2482_v49  ;;  %v1754_v38 = vcombine.low %v10158_v54, %v10171_v19  ;;  %12746 = vst [vmem:[#allocation24_spill] sm:$0xff] %v10198_v6 }
 0x183   : > { %v1579_v40 = vcombine.low %v9993_v22, %v10000_v27 }
 0x184   : > { %v2498_v23 = vrot.slane %v2484_v26, %v10051_v62  ;;  %v10188_v52 = vrot.slane %v2499_v46, %v10051_v62  ;;  %v10191_v57 = vrot.slane %v2500_v35, %v10051_v62  ;;  %v10205_v26 = vcombine.high %v10179_v53, %v12659_v0 }
 0x185   : > { %v1743_v49 = vpop.permute.xlu1 %1742  ;;  %v10195_v51 = vpop.permute.xlu0 %1035  ;;  %v10213_v35 = vcombine.high %v10182_v24, %v12659_v0  ;;  %v1587_v47 = vrot.slane %v1579_v40, %v9847_v28 }
 0x186   : > { %v1770_v18 = vcombine.low %v1735_v4, %v1743_v49  ;;  %v8880_v16 = vpack.i.bf16 %v2498_v23, %v2036_v7  ;;  %v10201_v15 = vcombine.high %v2498_v23, %v12659_v0  ;;  %12748 = vst [vmem:[#allocation26_spill] sm:$0xff] %v10205_v26  ;;  %v10209_v46 = vcombine.high %v10188_v52, %v12659_v0 }
 0x187   : > { %12750 = vst [vmem:[#allocation28_spill] sm:$0xff] %v10213_v35  ;;  %v10217_v14 = vcombine.high %v10191_v57, %v12659_v0  ;;  %v1595_v7 = vcombine.low %v9998_v25, %v10006_v29  ;;  %v10222_v23 = vrot.slane %v1754_v38, %v9847_v28  ;;  %v12755_v0 = vcombine.high %v9925_v8, %v9928_v9 }
 0x188   : > { %12747 = vst [vmem:[#allocation25_spill] sm:$0xff] %v10201_v15  ;;  %12749 = vst [vmem:[#allocation27_spill] sm:$0xff] %v10209_v46  ;;  %v10225_v44 = vrot.slane %v1770_v18, %v9847_v28  ;;  %8881 = vrot.lane.b32.xlu1 %v8880_v16, %s9518_s3  ;;  %v1771_v46 = vcombine.high %v1735_v4, %v1743_v49  ;;  %v1580_v9 = vcombine.high %v9993_v22, %v10000_v27 }
 0x189   : > { %12751 = vst [vmem:[#allocation29_spill] sm:$0xff] %v10217_v14  ;;  %12752 = vst [vmem:[#allocation30_spill] sm:$0xff] %v10222_v23  ;;  %v1040_v55 = vpop.permute.xlu1 %1039  ;;  %v1044_v1 = vpop.permute.xlu0 %1043  ;;  %v1603_v16 = vrot.slane %v1595_v7, %v9847_v28  ;;  %v10248_v50 = vrot.slane %v12755_v0, %v10051_v62  ;;  %v1755_v8 = vcombine.high %v10158_v54, %v10171_v19 }
 0x18a   : > { %12753 = vst [vmem:[#allocation31_spill] sm:$0xff] %v10225_v44  ;;  %v1787_v18 = vcombine.high %v10222_v23, %v10225_v44  ;;  %v1125_v17 = vcombine.low %v10195_v51, %v1044_v1  ;;  %v10274_v49 = vrot.slane %v1771_v46, %v9847_v28 }
 0x18b   : > { %12756 = vst [vmem:[#allocation33_spill] sm:$0xff] %v10248_v50 }
 0x18c   : > { %v10242_v6 = vrot.slane %v1787_v18, %v10051_v62  ;;  %v1133_v7 = vrot.slane %v1125_v17, %v9847_v28  ;;  %v1611_v18 = vcombine.low %v1587_v47, %v1603_v16 }
 0x18d   : > { %v1048_v35 = vpop.permute.xlu1 %1047  ;;  %v10250_v38 = vpop.permute.xlu0 %1270 }
 0x18e   : > { %12754 = vst [vmem:[#allocation32_spill] sm:$0xff] %v10242_v6  ;;  %v1141_v14 = vcombine.low %v1040_v55, %v1048_v35  ;;  %v8895_v40 = vpack.i.bf16 %v10248_v50, %v10242_v6  ;;  %v1596_v50 = vcombine.high %v9998_v25, %v10006_v29  ;;  %v10271_v4 = vrot.slane %v1611_v18, %v10051_v62 }
 0x18f   : > { %v10281_v29 = vrot.slane %v1580_v9, %v9847_v28  ;;  %v1126_v18 = vcombine.high %v10195_v51, %v1044_v1 }
 0x190   : > { %v1149_v26 = vrot.slane %v1141_v14, %v9847_v28  ;;  %8896 = vrot.lane.b32.xlu0 %v8895_v40, %s9518_s3  ;;  %12758 = vst [vmem:[#allocation35_spill] sm:$0xff] %v10271_v4  ;;  %v1142_v40 = vcombine.high %v1040_v55, %v1048_v35  ;;  %v10288_v46 = vrot.slane %v1596_v50, %v9847_v28 }
 0x191   : > { %v1275_v15 = vpop.permute.xlu1 %1274  ;;  %v10257_v44 = vpop.permute.xlu0 %1278  ;;  %v8900_v50 = vpack.i.bf16 %v10188_v52, %v10179_v53 }
 0x192   : > { %v1157_v0 = vcombine.low %v1133_v7, %v1149_v26  ;;  %v1360_v14 = vcombine.low %v10250_v38, %v10257_v44  ;;  %v1158_v19 = vcombine.high %v1133_v7, %v1149_v26  ;;  %v1612_v26 = vcombine.high %v1587_v47, %v1603_v16 }
 0x193   : > { %v10296_v7 = vrot.slane %v1142_v40, %v9847_v28  ;;  %v12759_v16 = vcombine.low %v9931_v10, %v9934_v11  ;;  %v1627_v53 = vcombine.low %v10281_v29, %v10288_v46  ;;  %v1361_v23 = vcombine.high %v10250_v38, %v10257_v44 }
 0x194   : > { %v10268_v17 = vrot.slane %v1157_v0, %v10051_v62  ;;  %v10284_v0 = vrot.slane %v1755_v8, %v9847_v28  ;;  %v1368_v55 = vrot.slane %v1360_v14, %v9847_v28  ;;  %v10301_v51 = vrot.slane %v1158_v19, %v10051_v62 }
 0x195   : > { %v1283_v22 = vpop.permute.xlu1 %1282  ;;  %v10276_v27 = vpop.permute.xlu0 %1967  ;;  %v10304_v14 = vrot.slane %v1126_v18, %v9847_v28  ;;  %v10308_v47 = vrot.slane %v1612_v26, %v10051_v62  ;;  %v10314_v40 = vrot.slane %v12759_v16, %v10051_v62  ;;  %v12765_v44 = vcombine.high %v9931_v10, %v9934_v11 }
 0x196   : > { %12757 = vst [vmem:[#allocation34_spill] sm:$0xff] %v10268_v17  ;;  %v1376_v54 = vcombine.low %v1275_v15, %v1283_v22  ;;  %v8890_v25 = vpack.i.bf16 %v10271_v4, %v10268_v17  ;;  %v1802_v9 = vcombine.low %v10284_v0, %v10274_v49 }
 0x197   : > { %12760 = vst [vmem:[#allocation36_spill] sm:$0xff] %v10314_v40  ;;  %v1173_v19 = vcombine.low %v10304_v14, %v10296_v7  ;;  %v10352_v38 = vrot.slane %v12765_v44, %v10051_v62 }
 0x198   : > { %v1384_v35 = vrot.slane %v1376_v54, %v9847_v28  ;;  %8891 = vrot.lane.b32.xlu1 %v8890_v25, %s9521_s0  ;;  %v1377_v25 = vcombine.high %v1275_v15, %v1283_v22 }
 0x199   : > { %v1972_v8 = vpop.permute.xlu1 %1971  ;;  %v1976_v6 = vpop.permute.xlu0 %1975  ;;  %12766 = vst [vmem:[#allocation40_spill] sm:$0xff] %v10352_v38  ;;  %v10366_v11 = vrot.slane %v1173_v19, %v10051_v62 }
 0x19a   : > { %v1392_v1 = vcombine.low %v1368_v55, %v1384_v35  ;;  %v1393_v16 = vcombine.high %v1368_v55, %v1384_v35  ;;  %v2057_v15 = vcombine.low %v10276_v27, %v1976_v6  ;;  %v12762_v55 = vcombine.low %v9937_v12, %v9940_v13 }
 0x19b   : > { %12767 = vst [vmem:[#allocation41_spill] sm:$0xff] %v10366_v11 }
 0x19c   : > { %8901 = vrot.lane.b32.xlu1 %v8900_v50, %s9519_s26  ;;  %v10317_v54 = vrot.slane %v1392_v1, %v10051_v62  ;;  %v10326_v50 = vrot.slane %v1802_v9, %v10051_v62  ;;  %v8910_v1 = vpack.i.bf16 %v10308_v47, %v10301_v51  ;;  %v10343_v35 = vrot.slane %v12762_v55, %v10051_v62 }
 0x19d   : > { %v1980_v18 = vpop.permute.xlu1 %1979  ;;  %v2430_v26 = vpop.permute.xlu0 %2429  ;;  %v10346_v9 = vrot.slane %v1627_v53, %v10051_v62  ;;  %v8920_v53 = vpack.i.bf16 %v10191_v57, %v10182_v24  ;;  %v12769_v57 = vcombine.high %v9937_v12, %v9940_v13 }
 0x19e   : > { %12761 = vst [vmem:[#allocation37_spill] sm:$0xff] %v10326_v50  ;;  %v2073_v4 = vcombine.low %v1972_v8, %v1980_v18  ;;  %v8905_v17 = vpack.i.bf16 %v10317_v54, %v10314_v40  ;;  %v2074_v22 = vcombine.high %v1972_v8, %v1980_v18  ;;  %12763 = vst [vmem:[#allocation38_spill] sm:$0xff] %v10343_v35 }
 0x19f   : > { %12764 = vst [vmem:[#allocation39_spill] sm:$0xff] %v10346_v9  ;;  %v1803_v8 = vcombine.high %v10284_v0, %v10274_v49  ;;  %v2058_v18 = vcombine.high %v10276_v27, %v1976_v6  ;;  %v8915_v10 = vpack.i.bf16 %v10343_v35, %v10326_v50  ;;  %v10369_v49 = vrot.slane %v1393_v16, %v10051_v62 }
 0x1a0   : > { %8911 = vrot.lane.b32.xlu1 %v8910_v1, %s9522_s5  ;;  %8906 = vrot.lane.b32.xlu0 %v8905_v17, %s9521_s0  ;;  %v10357_v17 = vrot.slane %v1377_v25, %v9847_v28  ;;  %v2081_v1 = vrot.slane %v2073_v4, %v9847_v28  ;;  %v10372_v0 = vrot.slane %v1361_v23, %v9847_v28 }
 0x1a1   : > { %v2434_v55 = vpop.permute.xlu1 %2433  ;;  %v2438_v52 = vpop.permute.xlu0 %2437  ;;  %12768 = vst [vmem:[#allocation42_spill] sm:$0xff] %v10369_v49  ;;  %v2065_v6 = vrot.slane %v2057_v15, %v9847_v28  ;;  %v2088_v4 = vrot.slane %v2074_v22, %v9847_v28  ;;  %v10382_v24 = vrot.slane %v12769_v57, %v10051_v62  ;;  %v1628_v23 = vcombine.high %v10281_v29, %v10288_v46 }
 0x1a2   : > { %v2519_v27 = vcombine.low %v2430_v26, %v2438_v52  ;;  %v2520_v25 = vcombine.high %v2430_v26, %v2438_v52  ;;  %v1408_v19 = vcombine.low %v10372_v0, %v10357_v17  ;;  %v2072_v16 = vrot.slane %v2058_v18, %v9847_v28 }
 0x1a3   : > { %12770 = vst [vmem:[#allocation43_spill] sm:$0xff] %v10382_v24  ;;  %v2089_v15 = vcombine.low %v2065_v6, %v2081_v1  ;;  %v10392_v22 = vrot.slane %v1803_v8, %v10051_v62  ;;  %v8930_v12 = vpack.i.bf16 %v10346_v9, %v10366_v11  ;;  %v8925_v13 = vpack.i.bf16 %v10369_v49, %v10352_v38 }
 0x1a4   : > { %8921 = vrot.lane.b32.xlu1 %v8920_v53, %s9520_s27  ;;  %8916 = vrot.lane.b32.xlu0 %v8915_v10, %s9519_s26  ;;  %v2090_v29 = vcombine.high %v2065_v6, %v2081_v1  ;;  %v2105_v46 = vcombine.low %v2072_v16, %v2088_v4  ;;  %v2106_v10 = vcombine.high %v2072_v16, %v2088_v4 }
 0x1a5   : > { %v2442_v52 = vpop.permute.xlu1 %2441  ;;  %v10389_v26 = vpop.permute.xlu0 %2662  ;;  %12771 = vst [vmem:[#allocation44_spill] sm:$0xff] %v10392_v22  ;;  %v2527_v18 = vrot.slane %v2519_v27, %v9847_v28  ;;  %v2534_v57 = vrot.slane %v2520_v25, %v9847_v28  ;;  %v8935_v6 = vpack.i.bf16 %v10382_v24, %v10392_v22  ;;  %v10413_v4 = vrot.slane %v1408_v19, %v10051_v62 }
 0x1a6   : > { %v2535_v44 = vcombine.low %v2434_v55, %v2442_v52  ;;  %v2536_v53 = vcombine.high %v2434_v55, %v2442_v52  ;;  %v1174_v55 = vcombine.high %v10304_v14, %v10296_v7  ;;  %v2097_v27 = vrot.slane %v2089_v15, %v10051_v62 }
 0x1a7   : > { %12772 = vst [vmem:[#allocation45_spill] sm:$0xff] %v10413_v4  ;;  %v12773_v7 = vcombine.low %v9957_v20, %v9960_v21  ;;  %v10427_v19 = vrot.slane %v2105_v46, %v10051_v62  ;;  %v12783_v40 = vcombine.low %v10008_v30, %v10016_v32 }
 0x1a8   : > { %v2543_v35 = vrot.slane %v2535_v44, %v9847_v28  ;;  %v2550_v8 = vrot.slane %v2536_v53, %v9847_v28  ;;  %8931 = vrot.lane.b32.xlu1 %v8930_v12, %s9523_s6  ;;  %8926 = vrot.lane.b32.xlu0 %v8925_v13, %s9522_s5  ;;  %v2104_v12 = vrot.slane %v2090_v29, %v10051_v62 }
 0x1a9   : > { %v10406_v52 = vpop.permute.xlu1 %2666  ;;  %v10408_v1 = vpop.permute.xlu0 %2670  ;;  %v10420_v14 = vrot.slane %v12773_v7, %v10051_v62  ;;  %v10424_v13 = vrot.slane %v2106_v10, %v10051_v62  ;;  %v10442_v46 = vrot.slane %v1174_v55, %v10051_v62  ;;  %v10445_v7 = vrot.slane %v1628_v23, %v10051_v62 }
 0x1aa   : > { %v2551_v25 = vcombine.low %v2527_v18, %v2543_v35  ;;  %v2552_v16 = vcombine.high %v2527_v18, %v2543_v35  ;;  %v2567_v44 = vcombine.low %v2534_v57, %v2550_v8  ;;  %v2568_v53 = vcombine.high %v2534_v57, %v2550_v8 }
 0x1ab   : > { %12774 = vst [vmem:[#allocation46_spill] sm:$0xff] %v10420_v14  ;;  %v2686_v15 = vcombine.low %v10389_v26, %v10408_v1  ;;  %v8945_v10 = vpack.i.bf16 %v10413_v4, %v10420_v14  ;;  %12775 = vst [vmem:[#allocation47_spill] sm:$0xff] %v10445_v7  ;;  %v8950_v50 = vpack.i.bf16 %v10445_v7, %v10442_v46 }
 0x1ac   : > { %8936 = vrot.lane.b32.xlu0 %v8935_v6, %s9520_s27  ;;  %v2559_v35 = vrot.slane %v2551_v25, %v10051_v62  ;;  %v2566_v18 = vrot.slane %v2552_v16, %v10051_v62  ;;  %v10435_v57 = vrot.slane %v2568_v53, %v10051_v62  ;;  %v10448_v6 = vrot.slane %v2567_v44, %v10051_v62 }
 0x1ad   : > { %v2675_v8 = vpop.permute.xlu1 %2674  ;;  %v10437_v29 = vpop.permute.xlu0 %1732  ;;  %v12776_v16 = vmov 0.0   ;;  %v10472_v4 = vrot.slane %v2686_v15, %v9847_v28  ;;  %v2284_v15 = vrot.slane %v12783_v40, %v9847_v28  ;;  %v2687_v40 = vcombine.high %v10389_v26, %v10408_v1 }
 0x1ae   : > { %v2702_v25 = vcombine.low %v10406_v52, %v2675_v8  ;;  %v10452_v53 = vcombine.high %v2097_v27, %v12776_v16  ;;  %v8940_v24 = vpack.i.bf16 %v2559_v35, %v2097_v27  ;;  %v10455_v22 = vcombine.high %v2559_v35, %v12776_v16  ;;  %8221 = vmatprep.mubr.msk.f32.mxu0 %vm12712_vm3, %v12776_v16 }
 0x1af   : > { %v10458_v14 = vcombine.high %v2104_v12, %v12776_v16  ;;  %v10461_v55 = vcombine.high %v2566_v18, %v12776_v16  ;;  %v10465_v23 = vcombine.high %v10424_v13, %v12776_v16  ;;  %v10469_v44 = vcombine.high %v10435_v57, %v12776_v16  ;;  %8242 = vmatprep.mubr.msk.f32.mxu1 %vm12712_vm3, %v12776_v16 }
 0x1b0   : > { %v10475_v27 = vrot.slane %v2702_v25, %v9847_v28  ;;  %8946 = vrot.lane.b32.xlu0 %v8945_v10, %s9523_s6  ;;  %8941 = vrot.lane.b32.xlu1 %v8940_v24, %s9521_s0  ;;  %v10481_v35 = vcombine.high %v10427_v19, %v12776_v16  ;;  %v10485_v9 = vcombine.high %v10448_v6, %v12776_v16  ;;  %vm2909_vm3 = vcmask 1043456  }
 0x1b1   : > { %12777 = vst [vmem:[#allocation48_spill] sm:$0xff] %v10458_v14  ;;  %12778 = vst [vmem:[#allocation49_spill] sm:$0xff] %v10461_v55  ;;  %v1737_v38 = vpop.permute.xlu1 %1736  ;;  %v1741_v49 = vpop.permute.xlu0 %1740  ;;  %v12784_v25 = vcombine.low %v10014_v31, %v10022_v33  ;;  %v8960_v11 = vpack.i.bf16 %v2566_v18, %v2104_v12  ;;  %v1409_v26 = vcombine.high %v10372_v0, %v10357_v17 }
 0x1b2   : > { %12779 = vst [vmem:[#allocation50_spill] sm:$0xff] %v10465_v23  ;;  %12780 = vst [vmem:[#allocation51_spill] sm:$0xff] %v10469_v44  ;;  %v1822_v10 = vcombine.low %v10437_v29, %v1741_v49  ;;  %v2703_v23 = vcombine.high %v10406_v52, %v2675_v8  ;;  %v2277_v17 = vcombine.high %v10008_v30, %v10016_v32 }
 0x1b3   : > { %12781 = vst [vmem:[#allocation52_spill] sm:$0xff] %v10481_v35  ;;  %12782 = vst [vmem:[#allocation53_spill] sm:$0xff] %v10485_v9  ;;  %v2300_v14 = vrot.slane %v12784_v25, %v9847_v28  ;;  %v2719_v35 = vcombine.high %v10472_v4, %v10475_v27  ;;  %v1823_v0 = vcombine.high %v10437_v29, %v1741_v49 }
 0x1b4   : > { %8951 = vrot.lane.b32.xlu1 %v8950_v50, %s9524_s23  ;;  %v1830_v9 = vrot.slane %v1822_v10, %v9847_v28  ;;  %v2717_v52 = vrot.slane %v2703_v23, %v9847_v28  ;;  %v10555_v30 = vrot.slane %v1409_v26, %v10051_v62  ;;  %v12785_v29 = vcombine.high %v9957_v20, %v9960_v21 }
 0x1b5   : > { %v1745_v24 = vpop.permute.xlu1 %1744  ;;  %v2309_v55 = vcombine.high %v2284_v15, %v2300_v14  ;;  %v2308_v50 = vcombine.low %v2284_v15, %v2300_v14  ;;  %v10521_v18 = vrot.slane %v2719_v35, %v10051_v62  ;;  %v10525_v10 = vpop.permute.xlu0 %2664 }
 0x1b6   : > { %v1838_v44 = vcombine.low %v1737_v38, %v1745_v24  ;;  %v1839_v1 = vcombine.high %v1737_v38, %v1745_v24  ;;  %v2293_v38 = vcombine.high %v10014_v31, %v10022_v33  ;;  %v2291_v31 = vrot.slane %v2277_v17, %v9847_v28 }
 0x1b7   : > { %v10534_v14 = vrot.slane %v2309_v55, %v10051_v62  ;;  %v10545_v23 = vrot.slane %v2308_v50, %v10051_v62  ;;  %v1837_v33 = vrot.slane %v1823_v0, %v9847_v28  ;;  %v8985_v17 = vpack.i.bf16 %v10435_v57, %v10424_v13 }
 0x1b8   : > { %v1846_v25 = vrot.slane %v1838_v44, %v9847_v28  ;;  %8961 = vrot.lane.b32.xlu1 %v8960_v11, %s9522_s5  ;;  %v2701_v44 = vrot.slane %v2687_v40, %v9847_v28  ;;  %v1853_v55 = vrot.slane %v1839_v1, %v9847_v28  ;;  %v2307_v32 = vrot.slane %v2293_v38, %v9847_v28 }
 0x1b9   : > { %v10517_v7 = vpop.permute.xlu1 %2668  ;;  %v10561_v49 = vpop.permute.xlu0 %2672 }
 0x1ba   : > { %v1854_v8 = vcombine.low %v1830_v9, %v1846_v25  ;;  %v1855_v12 = vcombine.high %v1830_v9, %v1846_v25  ;;  %v2734_v15 = vcombine.low %v2701_v44, %v2717_v52  ;;  %v10568_v25 = vrot.slane %v12785_v29, %v10051_v62 }
 0x1bb   : > { %v2754_v1 = vcombine.low %v10525_v10, %v10561_v49  ;;  %v2324_v20 = vcombine.low %v2291_v31, %v2307_v32  ;;  %v2735_v38 = vcombine.high %v2701_v44, %v2717_v52  ;;  %v1871_v0 = vcombine.high %v1837_v33, %v1853_v55 }
 0x1bc   : > { %2827 = vrot.lane.b32.xlu1 %v10521_v18, %s9518_s3  ;;  %v10531_v11 = vrot.slane %v1855_v12, %v10051_v62  ;;  %v10537_v9 = vrot.slane %v1854_v8, %v10051_v62  ;;  %v10573_v8 = vrot.slane %v2734_v15, %v10051_v62  ;;  %v1870_v12 = vcombine.low %v1837_v33, %v1853_v55 }
 0x1bd   : > { %v10550_v24 = vpop.permute.xlu1 %2676  ;;  %v8965_v26 = vpack.i.bf16 %v10555_v30, %v10568_v25  ;;  %v10594_v29 = vrot.slane %v2324_v20, %v10051_v62  ;;  %v10597_v13 = vrot.slane %v2735_v38, %v10051_v62  ;;  %v12786_v52 = vcombine.low %v10054_v63, %v10058_v2 }
 0x1be   : > { %v8970_v35 = vpack.i.bf16 %v10534_v14, %v10531_v11  ;;  %v8955_v40 = vpack.i.bf16 %v10545_v23, %v10537_v9  ;;  %v2770_v50 = vcombine.low %v10517_v7, %v10550_v24  ;;  %v10588_v15 = vrot.slane %v1870_v12, %v10051_v62 }
 0x1bf   : > { %v10608_v44 = vrot.slane %v12786_v52, %v10051_v62  ;;  %v1576_v38 = vcombine.high %v10072_v37, %v12776_v16  ;;  %v1577_v37 = vcombine.high %v10083_v59, %v12776_v16  ;;  %v12793_v59 = vld [vmem:[#allocation21_spill] sm:$0xff] }
 0x1c0   : > { %8971 = vrot.lane.b32.xlu1 %v8970_v35, %s9522_s5  ;;  %8956 = vrot.lane.b32.xlu0 %v8955_v40, %s9521_s0  ;;  %v2778_v21 = vrot.slane %v2770_v50, %v9847_v28  ;;  %v8975_v35 = vpack.i.bf16 %v10448_v6, %v10427_v19  ;;  %v2762_v40 = vrot.slane %v2754_v1, %v9847_v28 }
 0x1c1   : > { %v2325_v50 = vcombine.high %v2291_v31, %v2307_v32  ;;  %v8980_v19 = vpack.i.bf16 %v10594_v29, %v10588_v15  ;;  %v10602_v6 = vrot.slane %v1871_v0, %v10051_v62  ;;  %v12787_v31 = vcombine.low %v9874_v43, %v9880_v45 }
 0x1c2   : > { %v2786_v57 = vcombine.low %v2762_v40, %v2778_v21  ;;  %v2787_v63 = vcombine.high %v2762_v40, %v2778_v21  ;;  %v1121_v12 = vcombine.high %v10608_v44, %v12776_v16  ;;  %v12789_v45 = vcombine.low %v9862_v39, %v9868_v41 }
 0x1c3   : > { %v10614_v55 = vrot.slane %v2325_v50, %v10051_v62  ;;  %v10620_v32 = vrot.slane %v12787_v31, %v10051_v62  ;;  %v12790_v40 = vcombine.low %v10163_v56, %v10167_v42  ;;  %v12792_v56 = vld [vmem:[#allocation20_spill] sm:$0xff] }
 0x1c4   : > { %2835 = vrot.lane.b32.xlu1 %v10573_v8, %s9519_s26  ;;  %8966 = vrot.lane.b32.xlu0 %v8965_v26, %s9524_s23  ;;  %v10623_v33 = vrot.slane %v2786_v57, %v10051_v62  ;;  %v12788_v26 = vcombine.low %v10086_v61, %v10090_v5  ;;  %v10644_v20 = vrot.slane %v12789_v45, %v10051_v62 }
 0x1c5   : > { %v8990_v2 = vpack.i.bf16 %v10614_v55, %v10602_v6  ;;  %v1575_v43 = vcombine.high %v10620_v32, %v12776_v16  ;;  %v10647_v21 = vrot.slane %v2787_v63, %v10051_v62  ;;  %v1122_v61 = vcombine.high %v10066_v36, %v12776_v16 }
 0x1c6   : > { %v10633_v1 = vrot.slane %v12788_v26, %v10051_v62  ;;  %v863_v39 = vcombine.high %v10644_v20, %v12776_v16  ;;  %v1123_v36 = vcombine.high %v10077_v60, %v12776_v16  ;;  %v10668_v50 = vrot.slane %v12790_v40, %v10051_v62  ;;  %v12795_v26 = vld [vmem:[#allocation30_spill] sm:$0xff] }
 0x1c7   : > { %v8995_v5 = vpack.i.bf16 %v1575_v43, %v1121_v12  ;;  %v9005_v41 = vpack.i.bf16 %v1576_v38, %v1122_v61  ;;  %v864_v60 = vcombine.high %v10114_v3, %v12776_v16  ;;  %v1124_v42 = vcombine.high %v12792_v56, %v12776_v16  ;;  %v12796_v43 = vld [vmem:[#allocation31_spill] sm:$0xff]  ;;  %v12804_v56 = vld [vmem:[#allocation25_spill] sm:$0xff] }
 0x1c8   : > { %8986 = vrot.lane.b32.xlu1 %v8985_v17, %s9524_s23  ;;  %8976 = vrot.lane.b32.xlu0 %v8975_v35, %s9523_s6  ;;  %v1356_v17 = vcombine.high %v10633_v1, %v12776_v16  ;;  %v1357_v35 = vcombine.high %v10117_v58, %v12776_v16  ;;  %v12791_v58 = vcombine.low %v10127_v48, %v10130_v34  ;;  %v12799_v38 = vld [vmem:[#allocation15_spill] sm:$0xff] }
 0x1c9   : > { %v2515_v31 = vcombine.high %v10668_v50, %v12776_v16  ;;  %v1578_v63 = vcombine.high %v12793_v59, %v12776_v16  ;;  %v12797_v45 = vcombine.low %v12795_v26, %v12796_v43 }
 0x1ca   : > { %v9000_v0 = vpack.i.bf16 %v1356_v17, %v863_v39  ;;  %v10680_v57 = vrot.slane %v12791_v58, %v10051_v62  ;;  %v9010_v52 = vpack.i.bf16 %v1357_v35, %v864_v60  ;;  %v12800_v39 = vld [vmem:[#allocation16_spill] sm:$0xff]  ;;  %v12803_v60 = vld [vmem:[#allocation35_spill] sm:$0xff] }
 0x1cb   : > { %v9030_v48 = vpack.i.bf16 %v1578_v63, %v1124_v42  ;;  %v10698_v61 = vrot.slane %v12797_v45, %v10051_v62  ;;  %v1643_v58 = vcombine.high %v12803_v60, %v12776_v16  ;;  %v12805_v42 = vld [vmem:[#allocation24_spill] sm:$0xff]  ;;  %v12807_v63 = vld [vmem:[#allocation22_spill] sm:$0xff]  ;;  %v1644_v45 = vcombine.high %v10308_v47, %v12776_v16 }
 0x1cc   : > { %2843 = vrot.lane.b32.xlu1 %v10597_v13, %s9520_s27  ;;  %8981 = vrot.lane.b32.xlu0 %v8980_v19, %s9523_s6  ;;  %v9015_v19 = vpack.i.bf16 %v1577_v37, %v1123_v36  ;;  %v2053_v3 = vcombine.high %v10680_v57, %v12776_v16  ;;  %v12814_v47 = vld [vmem:[#allocation36_spill] sm:$0xff] }
 0x1cd   : > { %v1818_v37 = vcombine.high %v10698_v61, %v12776_v16 }
 0x1ce   : > { %v9020_v34 = vpack.i.bf16 %v2515_v31, %v2053_v3  ;;  %v1359_v3 = vcombine.high %v12807_v63, %v12776_v16  ;;  %v12821_v63 = vld [vmem:[#allocation38_spill] sm:$0xff] }
 0x1d0   : > { %2851 = vrot.lane.b32.xlu1 %v10623_v33, %s9521_s0  ;;  %8991 = vrot.lane.b32.xlu0 %v8990_v2, %s9524_s23  ;;  %v12794_v2 = vld [vmem:[#allocation19_spill] sm:$0xff] }
 0x1d1   : > { %v1358_v12 = vcombine.high %v12794_v2, %v12776_v16  ;;  %v1190_v2 = vcombine.high %v10301_v51, %v12776_v16  ;;  %v1424_v51 = vcombine.high %v10317_v54, %v12776_v16  ;;  %v12818_v54 = vld [vmem:[#allocation29_spill] sm:$0xff] }
 0x1d4   : > { %2859 = vrot.lane.b32.xlu1 %v10647_v21, %s9522_s5  ;;  %8996 = vrot.lane.b32.xlu0 %v8995_v5, %s9525_s4  ;;  %v12798_v5 = vld [vmem:[#allocation18_spill] sm:$0xff] }
 0x1d5   : > { %v865_v17 = vcombine.high %v12798_v5, %v12776_v16  ;;  %v12810_v5 = vld [vmem:[#allocation27_spill] sm:$0xff] }
 0x1d7   : > { %v9025_v40 = vpack.i.bf16 %v1358_v12, %v865_v17  ;;  %v12809_v12 = vld [vmem:[#allocation32_spill] sm:$0xff]  ;;  %v12811_v17 = vld [vmem:[#allocation26_spill] sm:$0xff] }
 0x1d8   : > { %9006 = vrot.lane.b32.xlu1 %v9005_v41, %s12701_s17  ;;  %9001 = vrot.lane.b32.xlu0 %v9000_v0, %s9525_s4  ;;  %v12801_v41 = vcombine.low %v12799_v38, %v12800_v39  ;;  %v12802_v0 = vld [vmem:[#allocation34_spill] sm:$0xff]  ;;  %v1819_v26 = vcombine.high %v12809_v12, %v12776_v16  ;;  %v12812_v38 = vpack.i.bf16 %v12810_v5, %v12811_v17  ;;  %v12813_v39 = vld [vmem:[#allocation33_spill] sm:$0xff] }
 0x1d9   : > { %v1189_v35 = vcombine.high %v12802_v0, %v12776_v16  ;;  %v9070_v0 = vpack.i.bf16 %v1644_v45, %v1190_v2  ;;  %v12822_v2 = vld [vmem:[#allocation42_spill] sm:$0xff]  ;;  %v12824_v5 = vld [vmem:[#allocation45_spill] sm:$0xff] }
 0x1da   : > { %v10708_v36 = vrot.slane %v12801_v41, %v10051_v62  ;;  %v2273_v41 = vcombine.high %v12813_v39, %v12776_v16  ;;  %v1425_v12 = vcombine.high %v12822_v2, %v12776_v16  ;;  %v1426_v17 = vcombine.high %v12824_v5, %v12776_v16 }
 0x1db   : > { %v9050_v31 = vpack.i.bf16 %v1643_v58, %v1189_v35  ;;  %v12816_v58 = vld [vmem:[#allocation37_spill] sm:$0xff]  ;;  %v2771_v2 = vcombine.high %v10517_v7, %v10550_v24  ;;  %v2342_v7 = vcombine.high %v10594_v29, %v12776_v16  ;;  %v934_v24 = vcombine.high %v10568_v25, %v12776_v16 }
 0x1dc   : > { %9016 = vrot.lane.b32.xlu1 %v9015_v19, %s12699_s29  ;;  %9011 = vrot.lane.b32.xlu0 %v9010_v52, %s12701_s17  ;;  %v12806_v19 = vpack.i.bf16 %v12804_v56, %v12805_v42  ;;  %v2272_v52 = vcombine.high %v10708_v36, %v12776_v16  ;;  %v9055_v35 = vpack.i.bf16 %v2273_v41, %v1819_v26 }
 0x1dd   : > { %v1820_v56 = vcombine.high %v12816_v58, %v12776_v16  ;;  %v2785_v5 = vrot.slane %v2771_v2, %v9847_v28  ;;  %v2753_v29 = vcombine.high %v10597_v13, %v12776_v16  ;;  %v9535_v2 = vmov 0  }
 0x1de   : > { %v9035_v59 = vpack.i.bf16 %v2272_v52, %v1818_v37  ;;  %v12815_v37 = vld [vmem:[#allocation41_spill] sm:$0xff]  ;;  %9155 = vset.pattern.permute.xlu1 %v9535_v2  ;;  %9156 = vset.pattern.permute.xlu0 %v9535_v2 }
 0x1df   : > { %v1191_v60 = vcombine.high %v12815_v37, %v12776_v16 }
 0x1e0   : > { %9031 = vrot.lane.b32.xlu1 %v9030_v48, %s12697_s1  ;;  %9021 = vrot.lane.b32.xlu0 %v9020_v34, %s9525_s4  ;;  %v12808_v48 = vld [vmem:[#allocation23_spill] sm:$0xff] }
 0x1e1   : > { %v866_v34 = vcombine.high %v12808_v48, %v12776_v16 }
 0x1e2   : > { %v10761_v48 = vpop.permute.xlu1 %8856 }
 0x1e3   : > { %v9045_v43 = vpack.i.bf16 %v1359_v3, %v866_v34  ;;  %v2274_v3 = vcombine.high %v12821_v63, %v12776_v16 }
 0x1e4   : > { %9041 = vrot.lane.b32.xlu1 %v12806_v19, %s12701_s17  ;;  %9026 = vrot.lane.b32.xlu0 %v9025_v40, %s12699_s29  ;;  %v931_v40 = vcombine.high %v12814_v47, %v12776_v16  ;;  %v12817_v19 = vld [vmem:[#allocation39_spill] sm:$0xff]  ;;  %v12827_v47 = vpack.i.bf16 %v10455_v22, %v10452_v53  ;;  %v2340_v22 = vcombine.high %v10545_v23, %v12776_v16 }
 0x1e5   : > { %v1645_v52 = vcombine.high %v12817_v19, %v12776_v16  ;;  %v9075_v26 = vpack.i.bf16 %v2274_v3, %v1820_v56  ;;  %v2341_v3 = vcombine.high %v10534_v14, %v12776_v16  ;;  %v12703_v14 = vmov 0.0|0.0  }
 0x1e6   : > { %v9065_v42 = vpack.i.bf16 %v1424_v51, %v931_v40  ;;  %v12828_v40 = vld [vmem:[#allocation43_spill] sm:$0xff]  ;;  %8586 = vmatprep.subr.bf16.mxu0 %v12703_v14  ;;  %8592 = vmatprep.subr.bf16.mxu1 %v12703_v14 }
 0x1e7   : > { %v9090_v34 = vpack.i.bf16 %v1645_v52, %v1191_v60  ;;  %v2275_v37 = vcombine.high %v12828_v40, %v12776_v16  ;;  %v1886_v60 = vcombine.high %v10537_v9, %v12776_v16  ;;  %v1192_v9 = vcombine.high %v10442_v46, %v12776_v16 }
 0x1e8   : > { %9051 = vrot.lane.b32.xlu1 %v9050_v31, %s9529_s24  ;;  %9036 = vrot.lane.b32.xlu0 %v9035_v59, %s9525_s4  ;;  %v12819_v31 = vld [vmem:[#allocation28_spill] sm:$0xff] }
 0x1e9   : > { %v12820_v59 = vpack.i.bf16 %v12818_v54, %v12819_v31  ;;  %v9115_v52 = vpack.i.bf16 %v2340_v22, %v1886_v60  ;;  %v2751_v31 = vcombine.high %v10521_v18, %v12776_v16  ;;  %v1888_v18 = vcombine.high %v10588_v15, %v12776_v16  ;;  %v12831_v15 = vld [vmem:[#allocation49_spill] sm:$0xff] }
 0x1ea   : > { %v10800_v54 = vpop.permute.xlu0 %8861  ;;  %v1889_v22 = vcombine.high %v10602_v6, %v12776_v16  ;;  %v2818_v6 = vcombine.high %v10623_v33, %v12776_v16  ;;  %v2819_v33 = vcombine.high %v10647_v21, %v12776_v16 }
 0x1ec   : > { %9061 = vrot.lane.b32.xlu1 %v12812_v38, %s12699_s29  ;;  %9046 = vrot.lane.b32.xlu0 %v9045_v43, %s12697_s1  ;;  %v12823_v43 = vld [vmem:[#allocation40_spill] sm:$0xff] }
 0x1ed   : > { %v932_v45 = vcombine.high %v12823_v43, %v12776_v16  ;;  %v12825_v38 = vld [vmem:[#allocation44_spill] sm:$0xff]  ;;  %v2755_v43 = vcombine.high %v10525_v10, %v10561_v49 }
 0x1ee   : > { %v1821_v39 = vcombine.high %v12825_v38, %v12776_v16  ;;  %v9140_v38 = vpack.i.bf16 %v2342_v7, %v1888_v18 }
 0x1ef   : > { %v9085_v41 = vpack.i.bf16 %v1425_v12, %v932_v45  ;;  %v12832_v45 = vld [vmem:[#allocation48_spill] sm:$0xff]  ;;  %v2769_v49 = vrot.slane %v2755_v43, %v9847_v28 }
 0x1f0   : > { %9071 = vrot.lane.b32.xlu1 %v9070_v0, %s9530_s30  ;;  %9056 = vrot.lane.b32.xlu0 %v9055_v35, %s12701_s17  ;;  %v12826_v0 = vld [vmem:[#allocation46_spill] sm:$0xff]  ;;  %v10775_v35 = vpop.permute.xlu1 %8866  ;;  %v9095_v56 = vpack.i.bf16 %v2275_v37, %v1821_v39 }
 0x1f1   : > { %v933_v51 = vcombine.high %v12826_v0, %v12776_v16  ;;  %v2802_v25 = vcombine.low %v2769_v49, %v2785_v5  ;;  %v2803_v37 = vcombine.high %v2769_v49, %v2785_v5 }
 0x1f3   : > { %v9105_v58 = vpack.i.bf16 %v1426_v17, %v933_v51  ;;  %v12834_v51 = vld [vmem:[#allocation53_spill] sm:$0xff]  ;;  %v2810_v60 = vrot.slane %v2802_v25, %v10051_v62 }
 0x1f4   : > { %9081 = vrot.lane.b32.xlu1 %v12820_v59, %s12697_s1  ;;  %9066 = vrot.lane.b32.xlu0 %v9065_v42, %s9529_s24  ;;  %v12829_v42 = vcombine.low %v10472_v4, %v10475_v27  ;;  %v10796_v53 = vpop.permute.xlu1 %8871  ;;  %v12830_v27 = vld [vmem:[#allocation47_spill] sm:$0xff]  ;;  %v1887_v59 = vcombine.high %v10531_v11, %v12776_v16 }
 0x1f5   : > { %v1646_v23 = vcombine.high %v12830_v27, %v12776_v16 }
 0x1f6   : > { %v10790_v19 = vrot.slane %v12829_v42, %v10051_v62  ;;  %v9130_v12 = vpack.i.bf16 %v2341_v3, %v1887_v59  ;;  %v2817_v42 = vrot.slane %v2803_v37, %v10051_v62 }
 0x1f7   : > { %v9110_v46 = vpack.i.bf16 %v1646_v23, %v1192_v9 }
 0x1f8   : > { %9091 = vrot.lane.b32.xlu1 %v9090_v34, %s9531_s25  ;;  %9076 = vrot.lane.b32.xlu0 %v9075_v26, %s12699_s29  ;;  %v2750_v4 = vcombine.high %v10790_v19, %v12776_v16  ;;  %v10817_v34 = vpop.permute.xlu0 %8876  ;;  %v1427_v26 = vcombine.high %v10555_v30, %v12776_v16  ;;  %v12833_v30 = vpack.i.bf16 %v12831_v15, %v12832_v45 }
 0x1f9   : > { %v2821_v21 = vcombine.high %v2817_v42, %v12776_v16 }
 0x1fa   : > { %v10812_v63 = vpop.permute.xlu1 %8881  ;;  %v9125_v10 = vpack.i.bf16 %v1427_v26, %v934_v24  ;;  %v2820_v26 = vcombine.high %v2810_v60, %v12776_v16 }
 0x1fc   : > { %9101 = vrot.lane.b32.xlu1 %v12827_v47, %s9529_s24  ;;  %9086 = vrot.lane.b32.xlu0 %v9085_v41, %s9530_s30  ;;  %v10844_v39 = vpop.permute.xlu0 %8886  ;;  %v12835_v47 = vld [vmem:[#allocation52_spill] sm:$0xff] }
 0x1fd   : > { %v12836_v40 = vpack.i.bf16 %v12834_v51, %v12835_v47 }
 0x200   : > { %9106 = vrot.lane.b32.xlu1 %v9105_v58, %s9531_s25  ;;  %9096 = vrot.lane.b32.xlu0 %v9095_v56, %s12697_s1  ;;  %v2752_v58 = vcombine.high %v10573_v8, %v12776_v16  ;;  %v12837_v8 = vld [vmem:[#allocation51_spill] sm:$0xff] }
 0x202   : > { %v10853_v0 = vpop.permute.xlu0 %8896 }
 0x204   : > { %9116 = vrot.lane.b32.xlu1 %v9115_v52, %s9529_s24  ;;  %2823 = vrot.lane.b32.xlu0 %v2750_v4, %s9525_s4  ;;  %v2343_v52 = vcombine.high %v10614_v55, %v12776_v16  ;;  %v12838_v4 = vld [vmem:[#allocation50_spill] sm:$0xff] }
 0x205   : > { %v12839_v27 = vpack.i.bf16 %v12837_v8, %v12838_v4  ;;  %v8859_v8 = vunpack.i.h.bf16 %v10761_v48  ;;  %v8858_v4 = vunpack.i.l.bf16 %v10761_v48  ;;  %v12845_v48 = vunpack.i.l.bf16 %v10775_v35 }
 0x208   : > { %2831 = vrot.lane.b32.xlu1 %v2751_v31, %s12701_s17  ;;  %9111 = vrot.lane.b32.xlu0 %v9110_v46, %s9532_s22  ;;  %v9150_v31 = vpack.i.bf16 %v2343_v52, %v1889_v22  ;;  %s12840_s17 = sld [smem:[#allocation56_spill]] }
 0x20a   : > { %v10824_v11 = vpop.permute.xlu1 %8891 }
 0x20c   : > { %9131 = vrot.lane.b32.xlu1 %v9130_v12, %s9530_s30  ;;  %9121 = vrot.lane.b32.xlu0 %v12833_v30, %s9530_s30 }
 0x20e   : > { %v10842_v17 = vpop.permute.xlu1 %8901  ;;  %v2915_v3 = vld [vmem:[%s12840_s17] sm:$0xff]  ;;  %s12913_s17 = smov 56  }
 0x210   : > { %9141 = vrot.lane.b32.xlu1 %v9140_v38, %s9531_s25  ;;  %9126 = vrot.lane.b32.xlu0 %v9125_v10, %s9532_s22 }
 0x212   : > { %v10851_v41 = vpop.permute.xlu1 %8911  ;;  %v10863_v56 = vpop.permute.xlu0 %8906 }
 0x214   : > { %2847 = vrot.lane.b32.xlu1 %v2753_v29, %s12697_s1  ;;  %9136 = vrot.lane.b32.xlu0 %v12836_v40, %s9531_s25  ;;  %s12841_s1 = sld [smem:[#allocation57_spill]] }
 0x216   : > { %v10865_v13 = vpop.permute.xlu1 %8921  ;;  %v10875_v9 = vpop.permute.xlu0 %8916 }
 0x218   : > { %2867 = vrot.lane.b32.xlu1 %v2810_v60, %s9523_s6  ;;  %2839 = vrot.lane.b32.xlu0 %v2752_v58, %s12699_s29  ;;  %s12920_s29 = sld [smem:[#allocation59_spill]] }
 0x21a   : > { %v10881_v23 = vpop.permute.xlu1 %8931  ;;  %v10888_v46 = vpop.permute.xlu0 %8926  ;;  %v2916_v15 = vld [vmem:[%s12841_s1] sm:$0xff] }
 0x21c   : > { %2875 = vrot.lane.b32.xlu1 %v2817_v42, %s9524_s23  ;;  %9146 = vrot.lane.b32.xlu0 %v12839_v27, %s9532_s22 }
 0x21e   : > { %v10902_v18 = vpop.permute.xlu0 %8936 }
 0x220   : > { %9151 = vrot.lane.b32.xlu0 %v9150_v31, %s9532_s22  ;;  %2996 = vperm.xlu1 %9155, %v2915_v3  }
 0x222   : > { %v10884_v59 = vpop.permute.xlu1 %8941  ;;  %v10911_v7 = vpop.permute.xlu0 %8946 }
 0x224   : > { %2855 = vrot.lane.b32.xlu0 %v2818_v6, %s9529_s24  ;;  %s12934_s24 = sld [smem:[#allocation63_spill]] }
 0x226   : > { %v10891_v55 = vpop.permute.xlu1 %8951 }
 0x228   : > { %2863 = vrot.lane.b32.xlu0 %v2819_v33, %s9530_s30  ;;  %s12921_s30 = sld [smem:[#allocation60_spill]] }
 0x22a   : > { %v10905_v12 = vpop.permute.xlu1 %8961 }
 0x22c   : > { %2871 = vrot.lane.b32.xlu0 %v2820_v26, %s9531_s25  ;;  %s12892_s25 = sld [smem:[#allocation55_spill]] }
 0x22e   : > { %v10909_v43 = vpop.permute.xlu1 %2827 }
 0x230   : > { %2879 = vrot.lane.b32.xlu0 %v2821_v21, %s9532_s22 }
 0x232   : > { %v10915_v24 = vpop.permute.xlu1 %8971  ;;  %v10920_v45 = vpop.permute.xlu0 %8956 }
 0x234   : > { %3002 = vperm.xlu0 %9156, %v2916_v15  }
 0x236   : > { %v10922_v30 = vpop.permute.xlu1 %2835  ;;  %v10924_v5 = vpop.permute.xlu0 %8966 }
 0x23a   : > { %v10926_v38 = vpop.permute.xlu1 %8986  ;;  %v10928_v10 = vpop.permute.xlu0 %8976 }
 0x23e   : > { %v10930_v49 = vpop.permute.xlu1 %2843  ;;  %v10932_v25 = vpop.permute.xlu0 %8981 }
 0x242   : > { %v10934_v29 = vpop.permute.xlu1 %2851  ;;  %v10936_v51 = vpop.permute.xlu0 %8991 }
 0x243   : > { %12842 = vst [vmem:[#allocation20_spill] sm:$0xff] %v10934_v29  ;;  %12843 = vst [vmem:[#allocation21_spill] sm:$0xff] %v10936_v51 }
 0x246   : > { %v10938_v47 = vpop.permute.xlu1 %2859  ;;  %v8997_v40 = vpop.permute.xlu0 %8996 }
 0x247   : > { %12844 = vst [vmem:[#allocation19_spill] sm:$0xff] %v10938_v47  ;;  %v8999_v62 = vunpack.i.h.bf16 %v8997_v40  ;;  %v8998_v26 = vunpack.i.l.bf16 %v8997_v40 }
 0x249   : > { %v1707_v6 = vsel %vm995_vm4, %v10620_v32, %v8999_v62  ;;  %v1253_v3 = vsel %vm995_vm4, %v10608_v44, %v8998_v26  ;;  %v12847_v62 = vunpack.i.l.bf16 %v10800_v54 }
 0x24a   : > { %v10940_v37 = vpop.permute.xlu1 %9006  ;;  %v10942_v60 = vpop.permute.xlu0 %9001  ;;  %v1254_v28 = vsel %vm997_vm5, %v1253_v3, %v8858_v4  ;;  %v1708_v21 = vsel %vm997_vm5, %v1707_v6, %v8859_v8  ;;  %v12848_v8 = vunpack.i.h.bf16 %v10800_v54 }
 0x24b   : > { %v9009_v31 = vunpack.i.h.bf16 %v10940_v37  ;;  %v9008_v2 = vunpack.i.l.bf16 %v10940_v37  ;;  %v9003_v14 = vunpack.i.l.bf16 %v10942_v60  ;;  %v9004_v32 = vunpack.i.h.bf16 %v10942_v60 }
 0x24d   : > { %v1255_v44 = vsel %vm999_vm6, %v1254_v28, %v9008_v2  ;;  %v1709_v60 = vsel %vm999_vm6, %v1708_v21, %v9009_v31  ;;  %v996_v29 = vsel %vm995_vm4, %v10644_v20, %v9003_v14  ;;  %v1488_v6 = vsel %vm995_vm4, %v10633_v1, %v9004_v32 }
 0x24e   : > { %v10944_v58 = vpop.permute.xlu1 %9016  ;;  %v10946_v42 = vpop.permute.xlu0 %9011  ;;  %v1256_v1 = vsel %vm1001_vm7, %v1255_v44, %v12845_v48  ;;  %v998_v20 = vsel %vm997_vm5, %v996_v29, %v12847_v62  ;;  %v1489_v51 = vsel %vm997_vm5, %v1488_v6, %v12848_v8  ;;  %v8959_v8 = vunpack.i.h.bf16 %v10920_v45 }
 0x24f   : > { %v9019_v26 = vunpack.i.h.bf16 %v10944_v58  ;;  %v9018_v16 = vunpack.i.l.bf16 %v10944_v58  ;;  %v9013_v4 = vunpack.i.l.bf16 %v10946_v42  ;;  %v9014_v28 = vunpack.i.h.bf16 %v10946_v42 }
 0x250   : > { %v12846_v42 = vunpack.i.h.bf16 %v10775_v35 }
 0x251   : > { %v1257_v14 = vsel %vm1003_vm8, %v1256_v1, %v9018_v16  ;;  %v1490_v35 = vsel %vm999_vm6, %v1489_v51, %v9014_v28  ;;  %v12849_v28 = vunpack.i.l.bf16 %v10817_v34  ;;  %v12853_v51 = vunpack.i.h.bf16 %v10812_v63 }
 0x252   : > { %v10948_v22 = vpop.permute.xlu1 %9031  ;;  %v10950_v52 = vpop.permute.xlu0 %9021  ;;  %v1710_v32 = vsel %vm1001_vm7, %v1709_v60, %v12846_v42  ;;  %v12852_v42 = vunpack.i.l.bf16 %v10812_v63 }
 0x253   : > { %v9024_v31 = vunpack.i.h.bf16 %v10950_v52  ;;  %v9023_v21 = vunpack.i.l.bf16 %v10950_v52  ;;  %v1711_v58 = vsel %vm1003_vm8, %v1710_v32, %v9019_v26  ;;  %v1000_v52 = vsel %vm999_vm6, %v998_v20, %v9013_v4 }
 0x254   : > { %v9034_v44 = vunpack.i.h.bf16 %v10948_v22  ;;  %v9033_v60 = vunpack.i.l.bf16 %v10948_v22  ;;  %v8958_v22 = vunpack.i.l.bf16 %v10920_v45  ;;  %v12851_v20 = vunpack.i.l.bf16 %v10796_v53 }
 0x255   : > { %v2647_v16 = vsel %vm995_vm4, %v10668_v50, %v9024_v31  ;;  %v2185_v62 = vsel %vm995_vm4, %v10680_v57, %v9023_v21  ;;  %v8969_v50 = vunpack.i.h.bf16 %v10924_v5  ;;  %v1258_v57 = vsel %vm1005_vm9, %v1257_v14, %v12849_v28 }
 0x256   : > { %v10958_v33 = vpop.permute.xlu1 %9041  ;;  %v10964_v15 = vpop.permute.xlu0 %9026  ;;  %v12850_v31 = vunpack.i.h.bf16 %v10817_v34  ;;  %v1002_v21 = vsel %vm1001_vm7, %v1000_v52, %v12851_v20  ;;  %v2186_v32 = vsel %vm997_vm5, %v2185_v62, %v12852_v42  ;;  %v2648_v14 = vsel %vm997_vm5, %v2647_v16, %v12853_v51 }
 0x257   : > { %v9044_v54 = vunpack.i.h.bf16 %v10958_v33  ;;  %v9043_v26 = vunpack.i.l.bf16 %v10958_v33  ;;  %v9028_v4 = vunpack.i.l.bf16 %v10964_v15  ;;  %v9029_v6 = vunpack.i.h.bf16 %v10964_v15 }
 0x258   : > { %v1712_v33 = vsel %vm1005_vm9, %v1711_v58, %v12850_v31  ;;  %v1259_v15 = vsel %vm1007_vm10, %v1258_v57, %v9033_v60  ;;  %v12854_v34 = vunpack.i.h.bf16 %v10796_v53  ;;  %v12884_v45 = vunpack.i.h.bf16 %v10905_v12 }
 0x259   : > { %v1713_v52 = vsel %vm1007_vm10, %v1712_v33, %v9034_v44  ;;  %v2187_v31 = vsel %vm999_vm6, %v2186_v32, %v9043_v26  ;;  %v2649_v60 = vsel %vm999_vm6, %v2648_v14, %v9044_v54  ;;  %v1004_v57 = vsel %vm1003_vm8, %v1002_v21, %v9028_v4 }
 0x25a   : > { %v10976_v27 = vpop.permute.xlu1 %9051  ;;  %v10982_v40 = vpop.permute.xlu0 %9036  ;;  %v1491_v58 = vsel %vm1001_vm7, %v1490_v35, %v12854_v34  ;;  %v8968_v4 = vunpack.i.l.bf16 %v10924_v5  ;;  %v12858_v32 = vunpack.i.h.bf16 %v10842_v17  ;;  %v12859_v34 = vunpack.i.l.bf16 %v10844_v39 }
 0x25b   : > { %v1492_v62 = vsel %vm1003_vm8, %v1491_v58, %v9029_v6  ;;  %v9054_v63 = vunpack.i.h.bf16 %v10976_v27  ;;  %v9053_v16 = vunpack.i.l.bf16 %v10976_v27  ;;  %v9039_v53 = vunpack.i.h.bf16 %v10982_v40 }
 0x25c   : > { %v9038_v35 = vunpack.i.l.bf16 %v10982_v40  ;;  %v12855_v6 = vunpack.i.l.bf16 %v10824_v11  ;;  %v12856_v27 = vunpack.i.h.bf16 %v10824_v11  ;;  %v2650_v14 = vsel %vm1001_vm7, %v2649_v60, %v12858_v32 }
 0x25d   : > { %v12860_v11 = vunpack.i.h.bf16 %v10844_v39 }
 0x25e   : > { %v10998_v47 = vpop.permute.xlu1 %9061  ;;  %v11004_v37 = vpop.permute.xlu0 %9046  ;;  %v1260_v33 = vsel %vm1009_vm11, %v1259_v15, %v12855_v6  ;;  %v1714_v20 = vsel %vm1009_vm11, %v1713_v52, %v12856_v27  ;;  %v1006_v15 = vsel %vm1005_vm9, %v1004_v57, %v12859_v34  ;;  %v2404_v6 = vsel %vm995_vm4, %v10708_v36, %v9039_v53 }
 0x25f   : > { %v9064_v51 = vunpack.i.h.bf16 %v10998_v47  ;;  %v9063_v44 = vunpack.i.l.bf16 %v10998_v47  ;;  %v9048_v26 = vunpack.i.l.bf16 %v11004_v37  ;;  %v9049_v40 = vunpack.i.h.bf16 %v11004_v37 }
 0x260   : > { %v12857_v47 = vunpack.i.l.bf16 %v10842_v17  ;;  %v1493_v58 = vsel %vm1005_vm9, %v1492_v62, %v12860_v11  ;;  %v1261_v37 = vsel %vm1011_vm12, %v1260_v33, %v9053_v16  ;;  %v1715_v52 = vsel %vm1011_vm12, %v1714_v20, %v9054_v63 }
 0x261   : > { %v1950_v17 = vsel %vm995_vm4, %v10698_v61, %v9038_v35  ;;  %v2651_v57 = vsel %vm1003_vm8, %v2650_v14, %v9064_v51  ;;  %v1008_v39 = vsel %vm1007_vm10, %v1006_v15, %v9048_v26  ;;  %v1494_v16 = vsel %vm1007_vm10, %v1493_v58, %v9049_v40 }
 0x262   : > { %v11019_v3 = vpop.permute.xlu1 %9071  ;;  %v11026_v2 = vpop.permute.xlu0 %9056  ;;  %v2188_v42 = vsel %vm1001_vm7, %v2187_v31, %v12857_v47  ;;  %v12861_v61 = vunpack.i.l.bf16 %v10851_v41  ;;  %v12862_v51 = vunpack.i.h.bf16 %v10851_v41  ;;  %v12863_v20 = vunpack.i.l.bf16 %v10853_v0 }
 0x263   : > { %v9073_v31 = vunpack.i.l.bf16 %v11019_v3  ;;  %v2189_v60 = vsel %vm1003_vm8, %v2188_v42, %v9063_v44  ;;  %v9074_v63 = vunpack.i.h.bf16 %v11019_v3  ;;  %v9059_v36 = vunpack.i.h.bf16 %v11026_v2 }
 0x264   : > { %v9058_v53 = vunpack.i.l.bf16 %v11026_v2  ;;  %v1262_v35 = vsel %vm1013_vm13, %v1261_v37, %v12861_v61  ;;  %v1716_v44 = vsel %vm1013_vm13, %v1715_v52, %v12862_v51  ;;  %v1951_v2 = vsel %vm997_vm5, %v1950_v17, %v12863_v20 }
 0x265   : > { %v1263_v3 = vsel %vm1015_vm14, %v1262_v35, %v9073_v31  ;;  %v12864_v40 = vunpack.i.h.bf16 %v10853_v0  ;;  %v12865_v41 = vunpack.i.l.bf16 %v10865_v13  ;;  %v12866_v14 = vunpack.i.h.bf16 %v10865_v13 }
 0x266   : > { %v11048_v48 = vpop.permute.xlu1 %9081  ;;  %v11055_v29 = vpop.permute.xlu0 %9066  ;;  %v12867_v15 = vunpack.i.l.bf16 %v10863_v56  ;;  %v12868_v58 = vunpack.i.h.bf16 %v10863_v56  ;;  %v1717_v37 = vsel %vm1015_vm14, %v1716_v44, %v9074_v63  ;;  %v12869_v56 = vunpack.i.l.bf16 %v10881_v23 }
 0x267   : > { %v9083_v26 = vunpack.i.l.bf16 %v11048_v48  ;;  %v9068_v27 = vunpack.i.l.bf16 %v11055_v29  ;;  %v2405_v47 = vsel %vm997_vm5, %v2404_v6, %v12864_v40  ;;  %v9069_v42 = vunpack.i.h.bf16 %v11055_v29 }
 0x268   : > { %v2190_v32 = vsel %vm1005_vm9, %v2189_v60, %v12865_v41  ;;  %v2652_v34 = vsel %vm1005_vm9, %v2651_v57, %v12866_v14  ;;  %v1010_v11 = vsel %vm1009_vm11, %v1008_v39, %v12867_v15  ;;  %v1495_v0 = vsel %vm1009_vm11, %v1494_v16, %v12868_v58 }
 0x269   : > { %v1952_v29 = vsel %vm999_vm6, %v1951_v2, %v9058_v53  ;;  %v2406_v52 = vsel %vm999_vm6, %v2405_v47, %v9059_v36  ;;  %v9084_v6 = vunpack.i.h.bf16 %v11048_v48  ;;  %v2191_v31 = vsel %vm1007_vm10, %v2190_v32, %v9083_v26 }
 0x26a   : > { %v11076_v1 = vpop.permute.xlu1 %9091  ;;  %v11088_v28 = vpop.permute.xlu0 %9076  ;;  %v1012_v17 = vsel %vm1011_vm12, %v1010_v11, %v9068_v27  ;;  %v1264_v60 = vsel %vm1017_vm15, %v1263_v3, %v12869_v56  ;;  %v1496_v16 = vsel %vm1011_vm12, %v1495_v0, %v9069_v42  ;;  %v12870_v53 = vunpack.i.h.bf16 %v10881_v23 }
 0x26b   : > { %v9094_v63 = vunpack.i.h.bf16 %v11076_v1  ;;  %v9093_v48 = vunpack.i.l.bf16 %v11076_v1  ;;  %v9078_v35 = vunpack.i.l.bf16 %v11088_v28  ;;  %v12871_v51 = vunpack.i.l.bf16 %v10875_v9 }
 0x26c   : > { %v1718_v61 = vsel %vm1017_vm15, %v1717_v37, %v12870_v53  ;;  %v12872_v26 = vunpack.i.h.bf16 %v10875_v9  ;;  %v2653_v3 = vsel %vm1007_vm10, %v2652_v34, %v9084_v6  ;;  %v9079_v1 = vunpack.i.h.bf16 %v11088_v28 }
 0x26d   : > { %v1953_v44 = vsel %vm1001_vm7, %v1952_v29, %v12871_v51  ;;  %v12874_v20 = vunpack.i.l.bf16 %v10888_v46  ;;  %v12875_v9 = vunpack.i.h.bf16 %v10888_v46  ;;  %v1265_v28 = vsel %vm1019_vm0, %v1264_v60, %v9093_v48 }
 0x26e   : > { %v11102_v54 = vpop.permute.xlu1 %9101  ;;  %v11112_v21 = vpop.permute.xlu0 %9086  ;;  %v2407_v27 = vsel %vm1001_vm7, %v2406_v52, %v12872_v26  ;;  %v1719_v14 = vsel %vm1019_vm0, %v1718_v61, %v9094_v63  ;;  %v1954_v11 = vsel %vm1003_vm8, %v1953_v44, %v9078_v35  ;;  %v12876_v52 = vunpack.i.l.bf16 %v10911_v7 }
 0x26f   : > { %v9088_v57 = vunpack.i.l.bf16 %v11112_v21  ;;  %v9089_v36 = vunpack.i.h.bf16 %v11112_v21  ;;  %v12873_v21 = vunpack.i.l.bf16 %v10884_v59  ;;  %v1014_v2 = vsel %vm1013_vm13, %v1012_v17, %v12874_v20 }
 0x270   : > { %v9103_v47 = vunpack.i.l.bf16 %v11102_v54  ;;  %v1497_v41 = vsel %vm1013_vm13, %v1496_v16, %v12875_v9  ;;  %v9104_v58 = vunpack.i.h.bf16 %v11102_v54  ;;  %v2408_v29 = vsel %vm1003_vm8, %v2407_v27, %v9079_v1 }
 0x271   : > { %v2192_v23 = vsel %vm1009_vm11, %v2191_v31, %v12873_v21  ;;  %v1016_v42 = vsel %vm1015_vm14, %v1014_v2, %v9088_v57  ;;  %v1498_v34 = vsel %vm1015_vm14, %v1497_v41, %v9089_v36  ;;  %v12877_v60 = vunpack.i.h.bf16 %v10884_v59 }
 0x272   : > { %v11136_v62 = vpop.permute.xlu1 %9106  ;;  %v11142_v33 = vpop.permute.xlu0 %9096  ;;  %v1018_v6 = vsel %vm1017_vm15, %v1016_v42, %v12876_v52  ;;  %v12878_v16 = vunpack.i.h.bf16 %v10911_v7  ;;  %v12879_v36 = vunpack.i.l.bf16 %v10902_v18  ;;  %v12881_v59 = vunpack.i.h.bf16 %v10891_v55 }
 0x273   : > { %v9108_v32 = vunpack.i.l.bf16 %v11136_v62  ;;  %v9109_v15 = vunpack.i.h.bf16 %v11136_v62  ;;  %v9099_v31 = vunpack.i.h.bf16 %v11142_v33  ;;  %v9098_v17 = vunpack.i.l.bf16 %v11142_v33 }
 0x274   : > { %v2193_v62 = vsel %vm1011_vm12, %v2192_v23, %v9103_v47  ;;  %v2654_v54 = vsel %vm1009_vm11, %v2653_v3, %v12877_v60  ;;  %v1499_v63 = vsel %vm1017_vm15, %v1498_v34, %v12878_v16  ;;  %v1955_v53 = vsel %vm1005_vm9, %v1954_v11, %v12879_v36 }
 0x275   : > { %v1020_v57 = vsel %vm1019_vm0, %v1018_v6, %v9108_v32  ;;  %v1500_v48 = vsel %vm1019_vm0, %v1499_v63, %v9109_v15  ;;  %v12880_v33 = vunpack.i.l.bf16 %v10891_v55  ;;  %v1720_v35 = vsel %vm1021_vm1, %v1719_v14, %v12881_v59 }
 0x276   : > { %v11176_v13 = vpop.permute.xlu0 %2823  ;;  %v11184_v39 = vpop.permute.xlu1 %9116  ;;  %v2655_v51 = vsel %vm1011_vm12, %v2654_v54, %v9104_v58  ;;  %v12882_v7 = vunpack.i.h.bf16 %v10902_v18  ;;  %v1956_v3 = vsel %vm1007_vm10, %v1955_v53, %v9098_v17  ;;  %v12883_v21 = vunpack.i.l.bf16 %v10905_v12 }
 0x277   : > { %v1266_v61 = vsel %vm1021_vm1, %v1265_v28, %v12880_v33  ;;  %v1022_v20 = vsel %vm1021_vm1, %v1020_v57, %v8968_v4  ;;  %v9118_v18 = vunpack.i.l.bf16 %v11184_v39  ;;  %v1501_v42 = vsel %vm1021_vm1, %v1500_v48, %v8969_v50 }
 0x278   : > { %v2409_v44 = vsel %vm1005_vm9, %v2408_v29, %v12882_v7  ;;  %v2194_v55 = vsel %vm1013_vm13, %v2193_v62, %v12883_v21  ;;  %v9119_v9 = vunpack.i.h.bf16 %v11184_v39  ;;  %v2882_v41 = vsel %vm995_vm4, %v10790_v19, %v11176_v13 }
 0x279   : > { %v2410_v1 = vsel %vm1007_vm10, %v2409_v44, %v9099_v31  ;;  %v1957_v5 = vsel %vm1009_vm11, %v1956_v3, %v8958_v22  ;;  %v2883_v58 = vsel %vm997_vm5, %v2882_v41, %v10909_v43  ;;  %v8979_v43 = vunpack.i.h.bf16 %v10928_v10 }
 0x27a   : > { %v9112_v40 = vpop.permute.xlu0 %9111  ;;  %v2832_v0 = vpop.permute.xlu1 %2831  ;;  %v2411_v50 = vsel %vm1009_vm11, %v2410_v1, %v8959_v8  ;;  %v1958_v13 = vsel %vm1011_vm12, %v1957_v5, %v9118_v18  ;;  %v2656_v8 = vsel %vm1013_vm13, %v2655_v51, %v12884_v45  ;;  %v8978_v60 = vunpack.i.l.bf16 %v10928_v10 }
 0x27b   : > { %v9114_v37 = vunpack.i.h.bf16 %v9112_v40  ;;  %v9113_v46 = vunpack.i.l.bf16 %v9112_v40  ;;  %v2412_v29 = vsel %vm1011_vm12, %v2411_v50, %v9119_v9  ;;  %v2884_v22 = vsel %vm999_vm6, %v2883_v58, %v2832_v0 }
 0x27c   : > { %v12885_v54 = vunpack.i.l.bf16 %v10915_v24  ;;  %v12886_v12 = vmov 0.0|0.0   ;;  %v8983_v16 = vunpack.i.l.bf16 %v10932_v25  ;;  %v12887_v48 = vunpack.i.h.bf16 %v10915_v24 }
 0x27d   : > { %v1267_v26 = vsel %vm1023_vm2, %v1266_v61, %v9113_v46  ;;  %v1721_v27 = vsel %vm1023_vm2, %v1720_v35, %v9114_v37  ;;  %v2885_v53 = vsel %vm1001_vm7, %v2884_v22, %v10922_v30  ;;  %v8989_v24 = vunpack.i.h.bf16 %v10926_v38  ;;  %v12890_v22 = vld [vmem:[#allocation19_spill] sm:$0xff] }
 0x27e   : > { %v9122_v56 = vpop.permute.xlu0 %9121  ;;  %v9132_v2 = vpop.permute.xlu1 %9131  ;;  %v2898_v32 = vrot.slane %v1267_v26, 4  ;;  %v2901_v28 = vrot.slane %v1721_v27, 4  ;;  %v1959_v0 = vsel %vm1013_vm13, %v1958_v13, %v12885_v54  ;;  %v2413_v36 = vsel %vm1013_vm13, %v2412_v29, %v12887_v48 }
 0x27f   : > { %v9124_v14 = vunpack.i.h.bf16 %v9122_v56  ;;  %v9123_v34 = vunpack.i.l.bf16 %v9122_v56  ;;  %v9133_v37 = vunpack.i.l.bf16 %v9132_v2  ;;  %v9134_v52 = vunpack.i.h.bf16 %v9132_v2 }
 0x280   : > { %v8988_v26 = vunpack.i.l.bf16 %v10926_v38  ;;  %v8984_v30 = vunpack.i.h.bf16 %v10932_v25 }
 0x281   : > { %v2195_v6 = vsel %vm1015_vm14, %v2194_v55, %v9123_v34  ;;  %v2657_v31 = vsel %vm1015_vm14, %v2656_v8, %v9124_v14  ;;  %v1960_v63 = vsel %vm1015_vm14, %v1959_v0, %v9133_v37  ;;  %v2414_v10 = vsel %vm1015_vm14, %v2413_v36, %v9134_v52  ;;  %v2914_v0 = vld [vmem:[%s12892_s25] sm:$0xff]  ;;  %s12931_s25 = sld [smem:[#allocation58_spill]] }
 0x282   : > { %v9127_v23 = vpop.permute.xlu0 %9126  ;;  %v9142_v17 = vpop.permute.xlu1 %9141  ;;  %v2196_v61 = vsel %vm1017_vm15, %v2195_v6, %v8978_v60  ;;  %v2658_v59 = vsel %vm1017_vm15, %v2657_v31, %v8979_v43  ;;  %v1961_v3 = vsel %vm1017_vm15, %v1960_v63, %v8983_v16  ;;  %v2415_v55 = vsel %vm1017_vm15, %v2414_v10, %v8984_v30 }
 0x283   : > { %v9129_v40 = vunpack.i.h.bf16 %v9127_v23  ;;  %v9128_v47 = vunpack.i.l.bf16 %v9127_v23  ;;  %v9144_v33 = vunpack.i.h.bf16 %v9142_v17  ;;  %v9143_v35 = vunpack.i.l.bf16 %v9142_v17 }
 0x284   : > { %v12891_v8 = vmov 0.0  }
 0x285   : > { %v1024_v4 = vsel %vm1023_vm2, %v1022_v20, %v9128_v47  ;;  %v1502_v15 = vsel %vm1023_vm2, %v1501_v42, %v9129_v40  ;;  %v1962_v2 = vsel %vm1019_vm0, %v1961_v3, %v9143_v35  ;;  %v2416_v38 = vsel %vm1019_vm0, %v2415_v55, %v9144_v33  ;;  %v12888_v47 = vld [vmem:[#allocation21_spill] sm:$0xff] }
 0x286   : > { %v9137_v39 = vpop.permute.xlu0 %9136  ;;  %v2910_v11 = vsel %vm2909_vm3, %v1024_v4, %v2898_v32  ;;  %v2911_v19 = vsel %vm2909_vm3, %v1502_v15, %v2901_v28  ;;  %v8994_v42 = vunpack.i.h.bf16 %v12888_v47  ;;  %v8993_v9 = vunpack.i.l.bf16 %v12888_v47  ;;  %v2848_v41 = vpop.permute.xlu1 %2847 }
 0x287   : > { %v8587_v46 = vpack.c.bf16 %v2911_v19, %v2910_v11  ;;  %v9139_v56 = vunpack.i.h.bf16 %v9137_v39  ;;  %v9138_v62 = vunpack.i.l.bf16 %v9137_v39  ;;  %v12889_v11 = vld [vmem:[#allocation20_spill] sm:$0xff] }
 0x288   : > { %v1963_v15 = vsel %vm1021_vm1, %v1962_v2, %v8993_v9  ;;  %v2417_v5 = vsel %vm1021_vm1, %v2416_v38, %v8994_v42 }
 0x289   : > { %8588 = vmatpush3.bf16.msra.mxu0 %v8587_v46  ;;  %v2197_v51 = vsel %vm1019_vm0, %v2196_v61, %v9138_v62  ;;  %v2659_v7 = vsel %vm1019_vm0, %v2658_v59, %v9139_v56 }
 0x28a   : > { %v2840_v57 = vpop.permute.xlu0 %2839  ;;  %8589 = vmatprep.subr.bf16.mxu0 %v12886_v12  ;;  %v2198_v20 = vsel %vm1021_vm1, %v2197_v51, %v8988_v26  ;;  %v2660_v18 = vsel %vm1021_vm1, %v2659_v7, %v8989_v24  ;;  %v2868_v6 = vpop.permute.xlu1 %2867 }
 0x28b   : > { %v2886_v44 = vsel %vm1003_vm8, %v2885_v53, %v2840_v57 }
 0x28c   : > { %v2887_v23 = vsel %vm1005_vm9, %v2886_v44, %v10930_v49 }
 0x28d   : > { %v2888_v14 = vsel %vm1007_vm10, %v2887_v23, %v2848_v41 }
 0x28e   : > { %v9147_v27 = vpop.permute.xlu0 %9146  ;;  %v2889_v19 = vsel %vm1009_vm11, %v2888_v14, %v12889_v11  ;;  %v2876_v43 = vpop.permute.xlu1 %2875  ;;  %vm2917_vm11 = vcmask 293888  }
 0x28f   : > { %v9149_v1 = vunpack.i.h.bf16 %v9147_v27  ;;  %v9148_v21 = vunpack.i.l.bf16 %v9147_v27 }
 0x291   : > { %v2199_v25 = vsel %vm1023_vm2, %v2198_v20, %v9148_v21  ;;  %v2661_v40 = vsel %vm1023_vm2, %v2660_v18, %v9149_v1  ;;  %v12894_v21 = vld [vmem:[#allocation14_spill] sm:$0xff] }
 0x292   : > { %v9152_v32 = vpop.permute.xlu0 %9151  ;;  %v2904_v34 = vrot.slane %v2199_v25, 4  ;;  %v2907_v4 = vrot.slane %v2661_v40, 4 }
 0x293   : > { %v9154_v28 = vunpack.i.h.bf16 %v9152_v32  ;;  %v9153_v49 = vunpack.i.l.bf16 %v9152_v32 }
 0x295   : > { %v1964_v50 = vsel %vm1023_vm2, %v1963_v15, %v9153_v49  ;;  %v2418_v39 = vsel %vm1023_vm2, %v2417_v5, %v9154_v28  ;;  %v12895_v15 = vld [vmem:[#allocation17_spill] sm:$0xff] }
 0x296   : > { %v2856_v13 = vpop.permute.xlu0 %2855  ;;  %v2912_v58 = vsel %vm2909_vm3, %v1964_v50, %v2904_v34  ;;  %v2913_v37 = vsel %vm2909_vm3, %v2418_v39, %v2907_v4 }
 0x297   : > { %v2890_v46 = vsel %vm1011_vm12, %v2889_v19, %v2856_v13  ;;  %v8590_v29 = vpack.c.bf16 %v2913_v37, %v2912_v58 }
 0x298   : > { %v2891_v52 = vsel %vm1013_vm13, %v2890_v46, %v12890_v22  ;;  %vm12893_vm13 = vmmov 0  }
 0x299   : > { %8591 = vmatpush3.bf16.msra.mxu0 %v8590_v29 }
 0x29a   : > { %v2864_v45 = vpop.permute.xlu0 %2863  ;;  %8219 = vmatprep.subr.mxu0 %v12891_v8 }
 0x29b   : > { %v2892_v31 = vsel %vm1015_vm14, %v2891_v52, %v2864_v45 }
 0x29c   : > { %v2893_v17 = vsel %vm1017_vm15, %v2892_v31, %v2868_v6 }
 0x29e   : > { %v2872_v56 = vpop.permute.xlu0 %2871 }
 0x29f   : > { %v2894_v62 = vsel %vm1019_vm0, %v2893_v17, %v2872_v56  ;;  %v2997_v16 = vpop.permute.xlu1 %2996 }
 0x2a0   : > { %v2895_v60 = vsel %vm1021_vm1, %v2894_v62, %v2876_v43 }
 0x2a2   : > { %v2880_v54 = vpop.permute.xlu0 %2879 }
 0x2a3   : > { %v2896_v57 = vsel %vm1023_vm2, %v2895_v60, %v2880_v54 }
 0x2a4   : > { %8220 = vmatpush3.msk.msra.mxu0 %vm2909_vm3, %v2896_v57  ;;  %vm12896_vm3 = vcmask 80912  }
 0x2a5   : > { %8222 = vmatmul.mubr.msk.f32.vlgmr.msra.gmra.mrb[0].mxu0 %vm2917_vm11, %v2914_v0  ;;  %8604 = vmatprep.subr.bf16.mxu0 %v12886_v12  ;;  %vm12897_vm14 = vmmov %vm12896_vm3 }
 0x2a6   : > { %8253 = vmatprep.mubr.msk.f32.mxu0 %vm12893_vm13, %v12891_v8  ;;  %vm12898_vm15 = vmmov %vm12896_vm3 }
 0x2a7   : > { %vm12899_vm0 = vmmov %vm12896_vm3 }
 0x2a8   : > { %vm12900_vm1 = vmmov %vm12899_vm0 }
 0x2a9   : > { %vm12901_vm11 = vmmov %vm12899_vm0 }
 0x2b3   : > { %v3003_v48 = vpop.permute.xlu0 %3002 }
 0x378   : > { %v2990_v63 = vpop.f32.mrb[0].mxu0 }
 0x379   : > { %v2999_v36 = vmul.f32 %v2997_v16, %v2990_v63  ;;  %v8223_v53 = vpop.f32.mrb[1].mxu0 }
 0x37b   : > { %v3005_v10 = vadd.f32 %v3003_v48, %v2999_v36 }
 0x37d   : > { %v3007_v33 = vmin.f32 %v3005_v10, 0.0  ;;  %vm3006_vm2 = vcmp.gt.f32.partialorder %v3005_v10, 0.0 }
 0x37f   : > { %v3008_v61 = vmul.f32 1.442695, %v3007_v33 }
 0x381   : > { %9319 = vpow2.f32 %v3008_v61 }
 0x38b   : > { %v9320_v59 = vpop.eup %9319 }
 0x38c   : > { %v7968_v35 = vadd.f32 -1.0, %v9320_v59 }
 0x38e   : > { %v3011_v51 = vsel %vm3006_vm2, %v3005_v10, %v7968_v35  ;;  %vm12902_vm2 = vmmov %vm12899_vm0 }
 0x38f   : > { %3019 = vrot.lane.b32.xlu0 %v3011_v51, %s9522_s5  ;;  %3013 = vrot.lane.b32.xlu1 %v3011_v51, %s9524_s23 }
 0x393   : > { %3025 = vrot.lane.b32.xlu0 %v3011_v51, %s9520_s27  ;;  %3016 = vrot.lane.b32.xlu1 %v3011_v51, %s9523_s6 }
 0x397   : > { %3031 = vrot.lane.b32.xlu0 %v3011_v51, %s9518_s3  ;;  %3022 = vrot.lane.b32.xlu1 %v3011_v51, %s9521_s0  ;;  %s12909_s0 = smov 40  }
 0x39b   : > { %3028 = vrot.lane.b32.xlu1 %v3011_v51, %s9519_s26 }
 0x401   : > { %v3020_v7 = vpop.permute.xlu0 %3019  ;;  %v3014_v44 = vpop.permute.xlu1 %3013 }
 0x402   : > { %v3050_v1 = vcombine.low %v3014_v44, %v3020_v7  ;;  %v3051_v41 = vcombine.high %v3014_v44, %v3020_v7 }
 0x404   : > { %v3058_v18 = vrot.slane %v3050_v1, %v12894_v21  ;;  %v3065_v39 = vrot.slane %v3051_v41, %v12894_v21 }
 0x405   : > { %v3026_v24 = vpop.permute.xlu0 %3025  ;;  %v3017_v26 = vpop.permute.xlu1 %3016 }
 0x406   : > { %v3034_v30 = vcombine.low %v3011_v51, %v3017_v26  ;;  %v3035_v25 = vcombine.high %v3011_v51, %v3017_v26 }
 0x408   : > { %v3042_v55 = vrot.slane %v3034_v30, %v12894_v21  ;;  %v3049_v14 = vrot.slane %v3035_v25, %v12894_v21 }
 0x409   : > { %v3032_v27 = vpop.permute.xlu0 %3031  ;;  %v3023_v3 = vpop.permute.xlu1 %3022 }
 0x40a   : > { %v3082_v23 = vcombine.low %v3026_v24, %v3032_v27  ;;  %v3098_v40 = vcombine.low %v3042_v55, %v3058_v18  ;;  %v3083_v47 = vcombine.high %v3026_v24, %v3032_v27  ;;  %v3099_v34 = vcombine.high %v3042_v55, %v3058_v18 }
 0x40b   : > { %v3114_v37 = vcombine.low %v3049_v14, %v3065_v39  ;;  %v3115_v6 = vcombine.high %v3049_v14, %v3065_v39 }
 0x40c   : > { %v3090_v42 = vrot.slane %v3082_v23, %v12894_v21  ;;  %v3097_v4 = vrot.slane %v3083_v47, %v12894_v21  ;;  %v3106_v5 = vrot.slane %v3098_v40, %v12895_v15  ;;  %v3113_v46 = vrot.slane %v3099_v34, %v12895_v15 }
 0x40d   : > { %v3029_v20 = vpop.permute.xlu1 %3028  ;;  %v3122_v31 = vrot.slane %v3114_v37, %v12895_v15  ;;  %v3129_v43 = vrot.slane %v3115_v6, %v12895_v15 }
 0x40e   : > { %v3066_v2 = vcombine.low %v3023_v3, %v3029_v20  ;;  %v3067_v38 = vcombine.high %v3023_v3, %v3029_v20 }
 0x410   : > { %v3074_v9 = vrot.slane %v3066_v2, %v12894_v21  ;;  %v3081_v32 = vrot.slane %v3067_v38, %v12894_v21 }
 0x412   : > { %v3130_v28 = vcombine.low %v3074_v9, %v3090_v42  ;;  %v3131_v49 = vcombine.high %v3074_v9, %v3090_v42  ;;  %v3146_v11 = vcombine.low %v3081_v32, %v3097_v4  ;;  %v3147_v29 = vcombine.high %v3081_v32, %v3097_v4 }
 0x414   : > { %v3138_v50 = vrot.slane %v3130_v28, %v12895_v15  ;;  %v3145_v58 = vrot.slane %v3131_v49, %v12895_v15  ;;  %v3154_v45 = vrot.slane %v3146_v11, %v12895_v15  ;;  %v3161_v62 = vrot.slane %v3147_v29, %v12895_v15 }
 0x416   : > { %v3163_v19 = vcombine.high %v3106_v5, %v3138_v50  ;;  %v3162_v13 = vcombine.low %v3106_v5, %v3138_v50  ;;  %v3165_v22 = vcombine.high %v3113_v46, %v3145_v58  ;;  %v3164_v52 = vcombine.low %v3113_v46, %v3145_v58 }
 0x417   : > { %v3167_v17 = vcombine.high %v3122_v31, %v3154_v45  ;;  %v3166_v56 = vcombine.low %v3122_v31, %v3154_v45  ;;  %v3169_v60 = vcombine.high %v3129_v43, %v3161_v62  ;;  %v3168_v54 = vcombine.low %v3129_v43, %v3161_v62 }
 0x418   : > { %3180 = vrot.lane.b32.xlu0 %v3163_v19, %s9532_s22  ;;  %3178 = vrot.lane.b32.xlu1 %v3162_v13, %s9532_s22 }
 0x41c   : > { %3184 = vrot.lane.b32.xlu0 %v3165_v22, %s9532_s22  ;;  %3182 = vrot.lane.b32.xlu1 %v3164_v52, %s9532_s22 }
 0x420   : > { %3188 = vrot.lane.b32.xlu0 %v3167_v17, %s9532_s22  ;;  %3186 = vrot.lane.b32.xlu1 %v3166_v56, %s9532_s22 }
 0x424   : > { %3192 = vrot.lane.b32.xlu0 %v3169_v60, %s9532_s22  ;;  %3190 = vrot.lane.b32.xlu1 %v3168_v54, %s9532_s22 }
 0x48a   : > { %v3181_v0 = vpop.permute.xlu0 %3180  ;;  %v3179_v57 = vpop.permute.xlu1 %3178 }
 0x48b   : > { %v3203_v16 = vmax.f32 %v3163_v19, %v3181_v0  ;;  %v3202_v63 = vmax.f32 %v3162_v13, %v3179_v57 }
 0x48d   : > { %3236 = vrot.lane.b32.xlu0 %v3203_v16, %s9513_s2  ;;  %3234 = vrot.lane.b32.xlu1 %v3202_v63, %s9513_s2 }
 0x48e   : > { %v3185_v48 = vpop.permute.xlu0 %3184  ;;  %v3183_v36 = vpop.permute.xlu1 %3182 }
 0x48f   : > { %v3205_v53 = vmax.f32 %v3165_v22, %v3185_v48  ;;  %v3204_v10 = vmax.f32 %v3164_v52, %v3183_v36 }
 0x491   : > { %3240 = vrot.lane.b32.xlu0 %v3205_v53, %s9513_s2  ;;  %3238 = vrot.lane.b32.xlu1 %v3204_v10, %s9513_s2 }
 0x492   : > { %v3189_v33 = vpop.permute.xlu0 %3188  ;;  %v3187_v61 = vpop.permute.xlu1 %3186 }
 0x493   : > { %v3207_v59 = vmax.f32 %v3167_v17, %v3189_v33  ;;  %v3206_v35 = vmax.f32 %v3166_v56, %v3187_v61 }
 0x495   : > { %3244 = vrot.lane.b32.xlu0 %v3207_v59, %s9513_s2  ;;  %3242 = vrot.lane.b32.xlu1 %v3206_v35, %s9513_s2 }
 0x496   : > { %v3193_v51 = vpop.permute.xlu0 %3192  ;;  %v3191_v7 = vpop.permute.xlu1 %3190 }
 0x497   : > { %v3209_v44 = vmax.f32 %v3169_v60, %v3193_v51  ;;  %v3208_v24 = vmax.f32 %v3168_v54, %v3191_v7 }
 0x499   : > { %3248 = vrot.lane.b32.xlu0 %v3209_v44, %s9513_s2  ;;  %3246 = vrot.lane.b32.xlu1 %v3208_v24, %s9513_s2  ;;  %s12904_s2 = smov 126  }
 0x4ff   : > { %v3237_v26 = vpop.permute.xlu0 %3236  ;;  %v3235_v30 = vpop.permute.xlu1 %3234 }
 0x500   : > { %3259 = vst.msk [vmem:[#allocation3 + $0x11] sm:$0xff] %vm12896_vm3, %v3237_v26  ;;  %vm12903_vm3 = vmmov %vm12899_vm0 }
 0x501   : > { %3258 = vst.msk [vmem:[#allocation3 + $0x1] sm:$0xff] %vm12897_vm14, %v3235_v30 }
 0x503   : > { %v3241_v27 = vpop.permute.xlu0 %3240  ;;  %v3239_v3 = vpop.permute.xlu1 %3238 }
 0x504   : > { %3261 = vst.msk [vmem:[#allocation3 + $0x31] sm:$0xff] %vm12898_vm15, %v3241_v27 }
 0x505   : > { %3260 = vst.msk [vmem:[#allocation3 + $0x21] sm:$0xff] %vm12899_vm0, %v3239_v3 }
 0x507   : > { %v3245_v1 = vpop.permute.xlu0 %3244  ;;  %v3243_v55 = vpop.permute.xlu1 %3242  ;;  %v11388_v23 = vld [vmem:[#allocation3 + $0x10] sm:$0xff] }
 0x508   : > { %v11390_v20 = vld [vmem:[#allocation3] sm:$0xff]  ;;  %3263 = vst.msk [vmem:[#allocation3 + $0x51] sm:$0xff] %vm12900_vm1, %v3245_v1  ;;  %3455 = vrot.lane.b32.xlu0 %v11388_v23, %s9515_s20  ;;  %v11416_v41 = vld [vmem:[#allocation3 + $0x11] sm:$0xff] }
 0x509   : > { %3262 = vst.msk [vmem:[#allocation3 + $0x41] sm:$0xff] %vm12901_vm11, %v3243_v55  ;;  %3453 = vrot.lane.b32.xlu1 %v11390_v20, %s9515_s20  ;;  %v11418_v32 = vld [vmem:[#allocation3 + $0x1] sm:$0xff] }
 0x50b   : > { %v3249_v18 = vpop.permute.xlu0 %3248  ;;  %v3247_v2 = vpop.permute.xlu1 %3246  ;;  %v11398_v38 = vld [vmem:[#allocation3 + $0x30] sm:$0xff] }
 0x50c   : > { %v11400_v25 = vld [vmem:[#allocation3 + $0x20] sm:$0xff]  ;;  %v11402_v40 = vld [vmem:[#allocation3 + $0x31] sm:$0xff]  ;;  %3265 = vst.msk [vmem:[#allocation3 + $0x71] sm:$0xff] %vm12902_vm2, %v3249_v18  ;;  %3459 = vrot.lane.b32.xlu0 %v11398_v38, %s9515_s20  ;;  %v3290_v47 = vcombine.low %v11388_v23, %v11398_v38  ;;  %v3291_v42 = vcombine.high %v11388_v23, %v11398_v38 }
 0x50d   : > { %3264 = vst.msk [vmem:[#allocation3 + $0x61] sm:$0xff] %vm12903_vm3, %v3247_v2  ;;  %3457 = vrot.lane.b32.xlu1 %v11400_v25, %s9515_s20  ;;  %v3274_v9 = vcombine.low %v11390_v20, %v11400_v25  ;;  %v11420_v28 = vld [vmem:[#allocation3 + $0x21] sm:$0xff]  ;;  %v3275_v49 = vcombine.high %v11390_v20, %v11400_v25  ;;  %v3867_v14 = vcombine.low %v11416_v41, %v11402_v40  ;;  %v11526_v18 = vld [vmem:[#allocation3 + $0x32] sm:$0xff] }
 0x50e   : > { %v3868_v34 = vcombine.high %v11416_v41, %v11402_v40  ;;  %v3851_v4 = vcombine.low %v11418_v32, %v11420_v28  ;;  %v11431_v5 = vrot.slane %v3290_v47, %v12894_v21  ;;  %v11434_v50 = vrot.slane %v3291_v42, %v12894_v21 }
 0x50f   : > { %v11437_v39 = vrot.slane %v3274_v9, %v12894_v21  ;;  %v3852_v11 = vcombine.high %v11418_v32, %v11420_v28  ;;  %v11442_v19 = vrot.slane %v3275_v49, %v12894_v21  ;;  %v11444_v13 = vld [vmem:[#allocation3 + $0x50] sm:$0xff]  ;;  %v11449_v37 = vrot.slane %v3867_v14, %v12894_v21  ;;  %v11530_v14 = vld [vmem:[#allocation3 + $0x22] sm:$0xff] }
 0x510   : > { %v11446_v58 = vld [vmem:[#allocation3 + $0x40] sm:$0xff]  ;;  %v11452_v46 = vrot.slane %v3868_v34, %v12894_v21  ;;  %v11455_v29 = vrot.slane %v3851_v4, %v12894_v21  ;;  %3463 = vrot.lane.b32.xlu0 %v11444_v13, %s9515_s20  ;;  %v11496_v48 = vld [vmem:[#allocation3 + $0x51] sm:$0xff] }
 0x511   : > { %v3338_v22 = vcombine.low %v11437_v39, %v11431_v5  ;;  %v3339_v52 = vcombine.high %v11437_v39, %v11431_v5  ;;  %3461 = vrot.lane.b32.xlu1 %v11446_v58, %s9515_s20  ;;  %v11466_v45 = vrot.slane %v3852_v11, %v12894_v21  ;;  %v3354_v6 = vcombine.low %v11442_v19, %v11434_v50  ;;  %v11498_v36 = vld [vmem:[#allocation3 + $0x41] sm:$0xff]  ;;  %v11536_v11 = vld [vmem:[#allocation3 + $0x12] sm:$0xff] }
 0x512   : > { %v3355_v31 = vcombine.high %v11442_v19, %v11434_v50  ;;  %v3915_v17 = vcombine.low %v11455_v29, %v11449_v37  ;;  %v3916_v56 = vcombine.high %v11455_v29, %v11449_v37 }
 0x513   : > { %v3931_v62 = vcombine.low %v11466_v45, %v11452_v46  ;;  %v3932_v43 = vcombine.high %v11466_v45, %v11452_v46  ;;  %v11480_v60 = vld [vmem:[#allocation3 + $0x70] sm:$0xff] }
 0x514   : > { %v11482_v54 = vld [vmem:[#allocation3 + $0x60] sm:$0xff]  ;;  %v11484_v0 = vld [vmem:[#allocation3 + $0x71] sm:$0xff]  ;;  %3467 = vrot.lane.b32.xlu0 %v11480_v60, %s9515_s20  ;;  %v3322_v57 = vcombine.low %v11444_v13, %v11480_v60  ;;  %v3323_v16 = vcombine.high %v11444_v13, %v11480_v60  ;;  %v11636_v19 = vrot.slane %v3916_v56, %v12895_v15 }
 0x515   : > { %3465 = vrot.lane.b32.xlu1 %v11482_v54, %s9515_s20  ;;  %v3306_v63 = vcombine.low %v11446_v58, %v11482_v54  ;;  %v11500_v53 = vld [vmem:[#allocation3 + $0x61] sm:$0xff]  ;;  %v3307_v10 = vcombine.high %v11446_v58, %v11482_v54  ;;  %v3899_v33 = vcombine.low %v11496_v48, %v11484_v0  ;;  %v3900_v61 = vcombine.high %v11496_v48, %v11484_v0  ;;  %v11528_v2 = vld [vmem:[#allocation3 + $0x72] sm:$0xff] }
 0x516   : > { %v3883_v59 = vcombine.low %v11498_v36, %v11500_v53  ;;  %v3330_v35 = vrot.slane %v3322_v57, %v12894_v21  ;;  %v3337_v51 = vrot.slane %v3323_v16, %v12894_v21  ;;  %v3884_v44 = vcombine.high %v11498_v36, %v11500_v53  ;;  %v11532_v34 = vld [vmem:[#allocation3 + $0x62] sm:$0xff] }
 0x517   : > { %v3314_v7 = vrot.slane %v3306_v63, %v12894_v21  ;;  %v3321_v24 = vrot.slane %v3307_v10, %v12894_v21  ;;  %v3907_v26 = vrot.slane %v3899_v33, %v12894_v21  ;;  %v11518_v30 = vrot.slane %v3900_v61, %v12894_v21  ;;  %v11540_v57 = vld [vmem:[#allocation3 + $0x2] sm:$0xff] }
 0x518   : > { %v3891_v27 = vrot.slane %v3883_v59, %v12894_v21  ;;  %3650 = vrot.lane.b32.xlu0 %v11388_v23, %s12904_s2  ;;  %v3898_v55 = vrot.slane %v3884_v44, %v12894_v21  ;;  %v4444_v16 = vcombine.low %v11536_v11, %v11526_v18  ;;  %v11544_v63 = vld [vmem:[#allocation3 + $0x42] sm:$0xff]  ;;  %v4428_v33 = vcombine.low %v11540_v57, %v11530_v14 }
 0x519   : > { %v3370_v3 = vcombine.low %v3314_v7, %v3330_v35  ;;  %v3371_v1 = vcombine.high %v3314_v7, %v3330_v35  ;;  %3648 = vrot.lane.b32.xlu1 %v11390_v20, %s12904_s2  ;;  %v3386_v47 = vcombine.low %v3321_v24, %v3337_v51  ;;  %v3387_v42 = vcombine.high %v3321_v24, %v3337_v51  ;;  %v11538_v20 = vld [vmem:[#allocation3 + $0x52] sm:$0xff] }
 0x51a   : > { %v3947_v9 = vcombine.low %v3891_v27, %v3907_v26  ;;  %v3948_v49 = vcombine.high %v3891_v27, %v3907_v26  ;;  %v3963_v4 = vcombine.low %v3898_v55, %v11518_v30  ;;  %v3964_v23 = vcombine.high %v3898_v55, %v11518_v30 }
 0x51b   : > { %v4476_v10 = vcombine.low %v11538_v20, %v11528_v2  ;;  %v4460_v61 = vcombine.low %v11544_v63, %v11532_v34  ;;  %v11557_v59 = vrot.slane %v3371_v1, %v12895_v15  ;;  %v11560_v35 = vrot.slane %v3339_v52, %v12895_v15 }
 0x51c   : > { %3654 = vrot.lane.b32.xlu0 %v11398_v38, %s12904_s2  ;;  %v11577_v44 = vrot.slane %v3370_v3, %v12895_v15  ;;  %v11580_v52 = vrot.slane %v3354_v6, %v12895_v15  ;;  %v11583_v24 = vrot.slane %v3386_v47, %v12895_v15  ;;  %v11590_v5 = vrot.slane %v4444_v16, %v12894_v21 }
 0x51d   : > { %3652 = vrot.lane.b32.xlu1 %v11400_v25, %s12904_s2  ;;  %v11563_v51 = vrot.slane %v4476_v10, %v12894_v21  ;;  %v11566_v38 = vrot.slane %v4460_v61, %v12894_v21  ;;  %v11572_v25 = vrot.slane %v3338_v22, %v12895_v15  ;;  %v3404_v7 = vcombine.low %v11560_v35, %v11557_v59 }
 0x51e   : > { %v11593_v39 = vrot.slane %v4428_v33, %v12894_v21  ;;  %v11609_v30 = vrot.slane %v3355_v31, %v12895_v15  ;;  %v11612_v27 = vrot.slane %v3387_v42, %v12895_v15  ;;  %v11618_v3 = vrot.slane %v3915_v17, %v12895_v15 }
 0x51f   : > { %v4524_v22 = vcombine.low %v11566_v38, %v11563_v51  ;;  %v3403_v6 = vcombine.high %v11572_v25, %v11577_v44  ;;  %v11621_v1 = vrot.slane %v3947_v9, %v12895_v15  ;;  %v11627_v55 = vrot.slane %v3931_v62, %v12895_v15 }
 0x520   : > { %3658 = vrot.lane.b32.xlu0 %v11444_v13, %s12904_s2  ;;  %v11630_v50 = vrot.slane %v3963_v4, %v12895_v15  ;;  %v11647_v62 = vrot.slane %v3948_v49, %v12895_v15  ;;  %v4492_v37 = vcombine.low %v11593_v39, %v11590_v5  ;;  %v11665_v42 = vrot.slane %v3932_v43, %v12895_v15 }
 0x521   : > { %3656 = vrot.lane.b32.xlu1 %v11446_v58, %s12904_s2  ;;  %v11668_v9 = vrot.slane %v3964_v23, %v12895_v15  ;;  %v11671_v49 = vrot.slane %v4524_v22, %v12895_v15 }
 0x522   : > { %v11682_v45 = vrot.slane %v4492_v37, %v12895_v15 }
 0x524   : > { %3662 = vrot.lane.b32.xlu0 %v11480_v60, %s12904_s2 }
 0x525   : > { %3660 = vrot.lane.b32.xlu1 %v11482_v54, %s12904_s2 }
 0x528   : > { %4032 = vrot.lane.b32.xlu0 %v11416_v41, %s9515_s20 }
 0x529   : > { %4030 = vrot.lane.b32.xlu1 %v11418_v32, %s9515_s20 }
 0x52c   : > { %4036 = vrot.lane.b32.xlu0 %v11402_v40, %s9515_s20 }
 0x52d   : > { %4034 = vrot.lane.b32.xlu1 %v11420_v28, %s9515_s20 }
 0x530   : > { %4040 = vrot.lane.b32.xlu0 %v11496_v48, %s9515_s20 }
 0x531   : > { %4038 = vrot.lane.b32.xlu1 %v11498_v36, %s9515_s20 }
 0x534   : > { %4044 = vrot.lane.b32.xlu0 %v11484_v0, %s9515_s20 }
 0x535   : > { %4042 = vrot.lane.b32.xlu1 %v11500_v53, %s9515_s20 }
 0x538   : > { %4227 = vrot.lane.b32.xlu0 %v11416_v41, %s12904_s2 }
 0x539   : > { %4225 = vrot.lane.b32.xlu1 %v11418_v32, %s12904_s2 }
 0x53c   : > { %4231 = vrot.lane.b32.xlu0 %v11402_v40, %s12904_s2 }
 0x53d   : > { %4229 = vrot.lane.b32.xlu1 %v11420_v28, %s12904_s2 }
 0x540   : > { %4235 = vrot.lane.b32.xlu0 %v11496_v48, %s12904_s2 }
 0x541   : > { %4233 = vrot.lane.b32.xlu1 %v11498_v36, %s12904_s2 }
 0x544   : > { %4239 = vrot.lane.b32.xlu0 %v11484_v0, %s12904_s2 }
 0x545   : > { %4237 = vrot.lane.b32.xlu1 %v11500_v53, %s12904_s2 }
 0x548   : > { %4609 = vrot.lane.b32.xlu0 %v11536_v11, %s9515_s20 }
 0x549   : > { %4607 = vrot.lane.b32.xlu1 %v11540_v57, %s9515_s20 }
 0x54c   : > { %4613 = vrot.lane.b32.xlu0 %v11526_v18, %s9515_s20 }
 0x54d   : > { %4611 = vrot.lane.b32.xlu1 %v11530_v14, %s9515_s20 }
 0x550   : > { %4617 = vrot.lane.b32.xlu0 %v11538_v20, %s9515_s20 }
 0x551   : > { %4615 = vrot.lane.b32.xlu1 %v11544_v63, %s9515_s20 }
 0x554   : > { %4621 = vrot.lane.b32.xlu0 %v11528_v2, %s9515_s20 }
 0x555   : > { %4619 = vrot.lane.b32.xlu1 %v11532_v34, %s9515_s20  ;;  %s12907_s20 = smov 24  }
 0x558   : > { %4804 = vrot.lane.b32.xlu0 %v11536_v11, %s12904_s2 }
 0x559   : > { %4802 = vrot.lane.b32.xlu1 %v11540_v57, %s12904_s2 }
 0x55c   : > { %4808 = vrot.lane.b32.xlu0 %v11526_v18, %s12904_s2 }
 0x55d   : > { %4806 = vrot.lane.b32.xlu1 %v11530_v14, %s12904_s2 }
 0x560   : > { %4812 = vrot.lane.b32.xlu0 %v11538_v20, %s12904_s2 }
 0x561   : > { %4810 = vrot.lane.b32.xlu1 %v11544_v63, %s12904_s2 }
 0x564   : > { %4816 = vrot.lane.b32.xlu0 %v11528_v2, %s12904_s2 }
 0x565   : > { %4814 = vrot.lane.b32.xlu1 %v11532_v34, %s12904_s2 }
 0x57a   : > { %v3456_v40 = vpop.permute.xlu0 %3455 }
 0x57b   : > { %v3454_v41 = vpop.permute.xlu1 %3453 }
 0x57e   : > { %v3460_v32 = vpop.permute.xlu0 %3459 }
 0x57f   : > { %v3458_v28 = vpop.permute.xlu1 %3457  ;;  %v3493_v0 = vcombine.low %v3456_v40, %v3460_v32  ;;  %v3494_v36 = vcombine.high %v3456_v40, %v3460_v32 }
 0x580   : > { %v3477_v48 = vcombine.low %v3454_v41, %v3458_v28  ;;  %v3478_v53 = vcombine.high %v3454_v41, %v3458_v28 }
 0x581   : > { %v3501_v61 = vrot.slane %v3493_v0, %v12894_v21  ;;  %v3508_v37 = vrot.slane %v3494_v36, %v12894_v21 }
 0x582   : > { %v3464_v10 = vpop.permute.xlu0 %3463  ;;  %v3485_v22 = vrot.slane %v3477_v48, %v12894_v21  ;;  %v3492_v16 = vrot.slane %v3478_v53, %v12894_v21 }
 0x583   : > { %v3462_v33 = vpop.permute.xlu1 %3461 }
 0x584   : > { %v3541_v54 = vcombine.low %v3485_v22, %v3501_v61  ;;  %v3542_v0 = vcombine.high %v3485_v22, %v3501_v61  ;;  %v3557_v56 = vcombine.low %v3492_v16, %v3508_v37 }
 0x586   : > { %v3468_v23 = vpop.permute.xlu0 %3467 }
 0x587   : > { %v3466_v43 = vpop.permute.xlu1 %3465  ;;  %v3525_v46 = vcombine.low %v3464_v10, %v3468_v23  ;;  %v3526_v4 = vcombine.high %v3464_v10, %v3468_v23  ;;  %v11759_v23 = vrot.slane %v3541_v54, %v12895_v15 }
 0x588   : > { %v3509_v60 = vcombine.low %v3462_v33, %v3466_v43  ;;  %v3510_v47 = vcombine.high %v3462_v33, %v3466_v43  ;;  %v3565_v33 = vrot.slane %v3557_v56, %v12895_v15 }
 0x589   : > { %v3533_v40 = vrot.slane %v3525_v46, %v12894_v21  ;;  %v3540_v41 = vrot.slane %v3526_v4, %v12894_v21  ;;  %v3556_v4 = vrot.slane %v3542_v0, %v12895_v15 }
 0x58a   : > { %v3517_v32 = vrot.slane %v3509_v60, %v12894_v21  ;;  %v3524_v28 = vrot.slane %v3510_v47, %v12894_v21  ;;  %v3651_v48 = vpop.permute.xlu0 %3650 }
 0x58b   : > { %v3649_v36 = vpop.permute.xlu1 %3648 }
 0x58c   : > { %v3573_v53 = vcombine.low %v3517_v32, %v3533_v40  ;;  %v3574_v29 = vcombine.high %v3517_v32, %v3533_v40  ;;  %v3589_v17 = vcombine.low %v3524_v28, %v3540_v41  ;;  %v3590_v31 = vcombine.high %v3524_v28, %v3540_v41 }
 0x58e   : > { %v11762_v43 = vrot.slane %v3573_v53, %v12895_v15  ;;  %v3588_v46 = vrot.slane %v3574_v29, %v12895_v15  ;;  %v3597_v60 = vrot.slane %v3589_v17, %v12895_v15  ;;  %v3655_v47 = vpop.permute.xlu0 %3654  ;;  %v3558_v53 = vcombine.high %v3492_v16, %v3508_v37 }
 0x58f   : > { %v3653_v10 = vpop.permute.xlu1 %3652  ;;  %v3688_v22 = vcombine.low %v3651_v48, %v3655_v47  ;;  %v3689_v13 = vcombine.high %v3651_v48, %v3655_v47  ;;  %v12906_v48 = vcombine.high %v11560_v35, %v11557_v59 }
 0x590   : > { %v3672_v40 = vcombine.low %v3649_v36, %v3653_v10  ;;  %v3607_v54 = vcombine.low %v3556_v4, %v3588_v46  ;;  %v3606_v32 = vcombine.high %v11759_v23, %v11762_v43  ;;  %v3609_v0 = vcombine.low %v3565_v33, %v3597_v60 }
 0x591   : > { %v3608_v61 = vcombine.high %v3556_v4, %v3588_v46  ;;  %v3696_v26 = vrot.slane %v3688_v22, %v12894_v21  ;;  %v3673_v8 = vcombine.high %v3649_v36, %v3653_v10  ;;  %v3572_v16 = vrot.slane %v3558_v53, %v12895_v15 }
 0x592   : > { %v3659_v29 = vpop.permute.xlu0 %3658  ;;  %v9162_v17 = vpack.i.bf16 %v3607_v54, %v3404_v7  ;;  %v9157_v56 = vpack.i.bf16 %v3606_v32, %v3403_v6  ;;  %v3680_v12 = vrot.slane %v3672_v40, %v12894_v21  ;;  %v3604_v7 = vrot.slane %v3590_v31, %v12895_v15 }
 0x593   : > { %v3657_v58 = vpop.permute.xlu1 %3656  ;;  %v12905_v6 = vcombine.low %v11580_v52, %v11583_v24  ;;  %v9167_v36 = vpack.i.bf16 %v3608_v61, %v12906_v48  ;;  %v3610_v46 = vcombine.high %v3565_v33, %v3597_v60  ;;  %v11791_v40 = vrot.slane %v3689_v13, %v12894_v21 }
 0x594   : > { %9163 = vrot.lane.b32.xlu0 %v9162_v17, %s9518_s3  ;;  %9158 = vrot.lane.b32.xlu1 %v9157_v56, %s9525_s4  ;;  %v11794_v31 = vrot.slane %v3673_v8, %v12894_v21  ;;  %v3736_v54 = vcombine.low %v3680_v12, %v3696_v26  ;;  %v12908_v8 = vcombine.high %v11580_v52, %v11583_v24 }
 0x595   : > { %v9172_v28 = vpack.i.bf16 %v3609_v0, %v12905_v6  ;;  %v3611_v61 = vcombine.low %v3572_v16, %v3604_v7  ;;  %v3737_v56 = vcombine.high %v3680_v12, %v3696_v26  ;;  %v12910_v12 = vcombine.low %v11609_v30, %v11612_v27 }
 0x596   : > { %v3663_v37 = vpop.permute.xlu0 %3662  ;;  %v9177_v33 = vpack.i.bf16 %v3610_v46, %v12908_v8  ;;  %v3752_v0 = vcombine.low %v11794_v31, %v11791_v40  ;;  %v3612_v48 = vcombine.high %v3572_v16, %v3604_v7  ;;  %v12911_v7 = vcombine.high %v11609_v30, %v11612_v27 }
 0x597   : > { %v3661_v41 = vpop.permute.xlu1 %3660  ;;  %v3720_v4 = vcombine.low %v3659_v29, %v3663_v37  ;;  %v3721_v47 = vcombine.high %v3659_v29, %v3663_v37  ;;  %v11813_v37 = vrot.slane %v3736_v54, %v12895_v15  ;;  %v9187_v26 = vpack.i.bf16 %v3611_v61, %v12910_v12 }
 0x598   : > { %v3704_v10 = vcombine.low %v3657_v58, %v3661_v41  ;;  %v3705_v22 = vcombine.high %v3657_v58, %v3661_v41  ;;  %9173 = vrot.lane.b32.xlu0 %v9172_v28, %s9519_s26  ;;  %9168 = vrot.lane.b32.xlu1 %v9167_v36, %s12907_s20  ;;  %v3751_v46 = vrot.slane %v3737_v56, %v12895_v15 }
 0x599   : > { %v3728_v32 = vrot.slane %v3720_v4, %v12894_v21  ;;  %v3735_v59 = vrot.slane %v3721_v47, %v12894_v21  ;;  %v3760_v4 = vrot.slane %v3752_v0, %v12895_v15  ;;  %v12914_v27 = vcombine.low %v11627_v55, %v11630_v50 }
 0x59a   : > { %v3712_v35 = vrot.slane %v3704_v10, %v12894_v21  ;;  %v3719_v60 = vrot.slane %v3705_v22, %v12894_v21  ;;  %v11802_v58 = vpop.permute.xlu0 %4032  ;;  %v12915_v12 = vcombine.low %v11636_v19, %v11647_v62 }
 0x59b   : > { %v11804_v13 = vpop.permute.xlu1 %4030 }
 0x59c   : > { %v3768_v53 = vcombine.low %v3712_v35, %v3728_v32  ;;  %v3769_v29 = vcombine.high %v3712_v35, %v3728_v32  ;;  %v3784_v17 = vcombine.low %v3719_v60, %v3735_v59  ;;  %9178 = vrot.lane.b32.xlu1 %v9177_v33, %s12909_s0  ;;  %v9197_v32 = vpack.i.bf16 %v3612_v48, %v12911_v7 }
 0x59d   : > { %v12912_v35 = vcombine.high %v11618_v3, %v11621_v1 }
 0x59e   : > { %v11816_v41 = vrot.slane %v3768_v53, %v12895_v15  ;;  %v3783_v6 = vrot.slane %v3769_v29, %v12895_v15  ;;  %v3792_v52 = vrot.slane %v3784_v17, %v12895_v15  ;;  %v11820_v24 = vpop.permute.xlu0 %4036  ;;  %v3785_v53 = vcombine.high %v3719_v60, %v3735_v59 }
 0x59f   : > { %v11822_v28 = vpop.permute.xlu1 %4034  ;;  %v4070_v10 = vcombine.low %v11802_v58, %v11820_v24  ;;  %v3753_v59 = vcombine.high %v11794_v31, %v11791_v40  ;;  %v12916_v40 = vcombine.high %v11636_v19, %v11647_v62  ;;  %v12917_v62 = vcombine.high %v11627_v55, %v11630_v50 }
 0x5a0   : > { %9188 = vrot.lane.b32.xlu1 %v9187_v26, %s9520_s27  ;;  %v3801_v47 = vcombine.high %v11813_v37, %v11816_v41  ;;  %v4054_v22 = vcombine.low %v11804_v13, %v11822_v28  ;;  %v3804_v33 = vcombine.low %v3760_v4, %v3792_v52  ;;  %v3802_v61 = vcombine.low %v3751_v46, %v3783_v6 }
 0x5a1   : > { %v11847_v29 = vrot.slane %v4070_v10, %v12894_v21  ;;  %v3803_v48 = vcombine.high %v3751_v46, %v3783_v6  ;;  %v3799_v10 = vrot.slane %v3785_v53, %v12895_v15 }
 0x5a2   : > { %v4041_v54 = vpop.permute.xlu0 %4040  ;;  %v9182_v8 = vpack.i.bf16 %v12912_v35, %v3801_v47  ;;  %v11850_v17 = vrot.slane %v4054_v22, %v12894_v21  ;;  %v9207_v0 = vpack.i.bf16 %v12914_v27, %v3804_v33  ;;  %v9192_v26 = vpack.i.bf16 %v12915_v12, %v3802_v61 }
 0x5a3   : > { %v4039_v16 = vpop.permute.xlu1 %4038  ;;  %v9202_v31 = vpack.i.bf16 %v12916_v40, %v3803_v48  ;;  %v3805_v35 = vcombine.high %v3760_v4, %v3792_v52  ;;  %v4071_v48 = vcombine.high %v11802_v58, %v11820_v24 }
 0x5a4   : > { %9198 = vrot.lane.b32.xlu1 %v9197_v32, %s12913_s17  ;;  %9183 = vrot.lane.b32.xlu0 %v9182_v8, %s9525_s4  ;;  %v4118_v22 = vcombine.low %v11850_v17, %v11847_v29  ;;  %v3767_v8 = vrot.slane %v3753_v59, %v12895_v15  ;;  %v4055_v59 = vcombine.high %v11804_v13, %v11822_v28 }
 0x5a5   : > { %v9212_v52 = vpack.i.bf16 %v12917_v62, %v3805_v35  ;;  %v11904_v13 = vrot.slane %v4071_v48, %v12894_v21 }
 0x5a6   : > { %v4045_v56 = vpop.permute.xlu0 %4044  ;;  %v11879_v61 = vrot.slane %v4118_v22, %v12895_v15  ;;  %v3806_v27 = vcombine.low %v3767_v8, %v3799_v10  ;;  %v11907_v28 = vrot.slane %v4055_v59, %v12894_v21 }
 0x5a7   : > { %v4043_v30 = vpop.permute.xlu1 %4042  ;;  %v4102_v60 = vcombine.low %v4041_v54, %v4045_v56 }
 0x5a8   : > { %v4086_v47 = vcombine.low %v4039_v16, %v4043_v30  ;;  %9208 = vrot.lane.b32.xlu1 %v9207_v0, %s9519_s26  ;;  %9193 = vrot.lane.b32.xlu0 %v9192_v26, %s9518_s3  ;;  %v4103_v0 = vcombine.high %v4041_v54, %v4045_v56  ;;  %v4087_v12 = vcombine.high %v4039_v16, %v4043_v30 }
 0x5a9   : > { %v11866_v7 = vrot.slane %v4102_v60, %v12894_v21  ;;  %v12918_v54 = vcombine.low %v11665_v42, %v11668_v9  ;;  %v3807_v56 = vcombine.high %v3767_v8, %v3799_v10  ;;  %v4134_v62 = vcombine.low %v11907_v28, %v11904_v13 }
 0x5aa   : > { %v11869_v32 = vrot.slane %v4086_v47, %v12894_v21  ;;  %v4228_v6 = vpop.permute.xlu0 %4227  ;;  %v11898_v55 = vrot.slane %v4103_v0, %v12894_v21  ;;  %v11901_v50 = vrot.slane %v4087_v12, %v12894_v21 }
 0x5ab   : > { %v4226_v46 = vpop.permute.xlu1 %4225  ;;  %v9222_v16 = vpack.i.bf16 %v12918_v54, %v3806_v27 }
 0x5ac   : > { %v4150_v33 = vcombine.low %v11869_v32, %v11866_v7  ;;  %9203 = vrot.lane.b32.xlu0 %v9202_v31, %s12907_s20  ;;  %v4166_v31 = vcombine.low %v11901_v50, %v11898_v55 }
 0x5ae   : > { %v11882_v53 = vrot.slane %v4150_v33, %v12895_v15  ;;  %v4232_v26 = vpop.permute.xlu0 %4231  ;;  %v12919_v33 = vcombine.high %v11665_v42, %v11668_v9  ;;  %v4151_v9 = vcombine.high %v11869_v32, %v11866_v7  ;;  %v4429_v7 = vcombine.high %v11540_v57, %v11530_v14 }
 0x5af   : > { %v4230_v19 = vpop.permute.xlu1 %4229  ;;  %v4265_v60 = vcombine.low %v4228_v6, %v4232_v26  ;;  %v4266_v30 = vcombine.high %v4228_v6, %v4232_v26  ;;  %v4477_v32 = vcombine.high %v11538_v20, %v11528_v2  ;;  %v4119_v14 = vcombine.high %v11850_v17, %v11847_v29 }
 0x5b0   : > { %v4249_v47 = vcombine.low %v4226_v46, %v4230_v19  ;;  %9213 = vrot.lane.b32.xlu0 %v9212_v52, %s12909_s0  ;;  %v4250_v58 = vcombine.high %v4226_v46, %v4230_v19  ;;  %v9232_v27 = vpack.i.bf16 %v12919_v33, %v3807_v56  ;;  %v4165_v2 = vrot.slane %v4151_v9, %v12895_v15 }
 0x5b1   : > { %v4273_v40 = vrot.slane %v4265_v60, %v12894_v21  ;;  %v11915_v6 = vrot.slane %v4266_v30, %v12894_v21  ;;  %v4183_v29 = vcombine.high %v11879_v61, %v11882_v53 }
 0x5b2   : > { %v4236_v24 = vpop.permute.xlu0 %4235  ;;  %v4257_v10 = vrot.slane %v4249_v47, %v12894_v21  ;;  %v11918_v46 = vrot.slane %v4250_v58, %v12894_v21  ;;  %v11937_v47 = vrot.slane %v4166_v31, %v12895_v15  ;;  %v4461_v31 = vcombine.high %v11544_v63, %v11532_v34 }
 0x5b3   : > { %v4234_v22 = vpop.permute.xlu1 %4233 }
 0x5b4   : > { %9223 = vrot.lane.b32.xlu0 %v9222_v16, %s9520_s27  ;;  %v4313_v52 = vcombine.low %v4257_v10, %v4273_v40  ;;  %v4329_v54 = vcombine.low %v11918_v46, %v11915_v6  ;;  %v4314_v30 = vcombine.high %v4257_v10, %v4273_v40 }
 0x5b6   : > { %v4240_v35 = vpop.permute.xlu0 %4239  ;;  %v11959_v40 = vrot.slane %v4313_v52, %v12895_v15  ;;  %v4328_v63 = vrot.slane %v4314_v30, %v12895_v15  ;;  %v11994_v52 = vrot.slane %v4477_v32, %v12894_v21 }
 0x5b7   : > { %v4238_v8 = vpop.permute.xlu1 %4237  ;;  %v4297_v0 = vcombine.low %v4236_v24, %v4240_v35  ;;  %v4298_v12 = vcombine.high %v4236_v24, %v4240_v35  ;;  %v4445_v35 = vcombine.high %v11536_v11, %v11526_v18  ;;  %v11971_v11 = vrot.slane %v4329_v54, %v12895_v15 }
 0x5b8   : > { %v4281_v26 = vcombine.low %v4234_v22, %v4238_v8  ;;  %v4282_v19 = vcombine.high %v4234_v22, %v4238_v8  ;;  %9233 = vrot.lane.b32.xlu0 %v9232_v27, %s12913_s17  ;;  %v11956_v8 = vrot.slane %v4134_v62, %v12895_v15  ;;  %v11991_v62 = vrot.slane %v4429_v7, %v12894_v21 }
 0x5b9   : > { %v4305_v48 = vrot.slane %v4297_v0, %v12894_v21  ;;  %v11928_v59 = vrot.slane %v4298_v12, %v12894_v21 }
 0x5ba   : > { %v4289_v60 = vrot.slane %v4281_v26, %v12894_v21  ;;  %v11932_v42 = vrot.slane %v4282_v19, %v12894_v21  ;;  %v11941_v16 = vpop.permute.xlu0 %4609  ;;  %v4186_v27 = vcombine.low %v11956_v8, %v11937_v47  ;;  %v11988_v19 = vrot.slane %v4445_v35, %v12894_v21 }
 0x5bb   : > { %v11943_v56 = vpop.permute.xlu1 %4607 }
 0x5bc   : > { %v4345_v58 = vcombine.low %v4289_v60, %v4305_v48  ;;  %v4346_v24 = vcombine.high %v4289_v60, %v4305_v48  ;;  %v4361_v22 = vcombine.low %v11932_v42, %v11928_v59  ;;  %v11997_v48 = vrot.slane %v4461_v31, %v12894_v21 }
 0x5bd   : > { %v4133_v60 = vrot.slane %v4119_v14, %v12895_v15  ;;  %v4508_v31 = vcombine.low %v11991_v62, %v11988_v19  ;;  %v4525_v14 = vcombine.high %v11566_v38, %v11563_v51  ;;  %v4167_v51 = vcombine.high %v11901_v50, %v11898_v55 }
 0x5be   : > { %v11962_v10 = vrot.slane %v4345_v58, %v12895_v15  ;;  %v11965_v18 = vrot.slane %v4361_v22, %v12895_v15  ;;  %v4360_v34 = vrot.slane %v4346_v24, %v12895_v15  ;;  %v4614_v20 = vpop.permute.xlu0 %4613  ;;  %v4493_v22 = vcombine.high %v11593_v39, %v11590_v5 }
 0x5bf   : > { %v4612_v57 = vpop.permute.xlu1 %4611  ;;  %v4647_v17 = vcombine.low %v11941_v16, %v4614_v20  ;;  %v4184_v32 = vcombine.low %v4133_v60, %v4165_v2  ;;  %v4362_v5 = vcombine.high %v11932_v42, %v11928_v59  ;;  %v4648_v39 = vcombine.high %v11941_v16, %v4614_v20 }
 0x5c0   : > { %v4631_v0 = vcombine.low %v11943_v56, %v4612_v57  ;;  %v4381_v12 = vcombine.low %v11971_v11, %v11965_v18  ;;  %v4378_v26 = vcombine.high %v11959_v40, %v11962_v10  ;;  %v4379_v24 = vcombine.low %v4328_v63, %v4360_v34 }
 0x5c1   : > { %v4655_v35 = vrot.slane %v4647_v17, %v12894_v21  ;;  %v4330_v38 = vcombine.high %v11918_v46, %v11915_v6  ;;  %v4185_v59 = vcombine.high %v4133_v60, %v4165_v2  ;;  %v4135_v20 = vcombine.high %v11907_v28, %v11904_v13 }
 0x5c2   : > { %v4618_v9 = vpop.permute.xlu0 %4617  ;;  %v9242_v30 = vpack.i.bf16 %v4381_v12, %v4186_v27  ;;  %v9217_v58 = vpack.i.bf16 %v4378_v26, %v4183_v29  ;;  %v4639_v7 = vrot.slane %v4631_v0, %v12894_v21  ;;  %v4540_v27 = vcombine.low %v11997_v48, %v11994_v52 }
 0x5c3   : > { %v4616_v54 = vpop.permute.xlu1 %4615  ;;  %v4632_v29 = vcombine.high %v11943_v56, %v4612_v57  ;;  %v9227_v12 = vpack.i.bf16 %v4379_v24, %v4184_v32  ;;  %v4380_v26 = vcombine.high %v4328_v63, %v4360_v34  ;;  %v4376_v55 = vrot.slane %v4362_v5, %v12895_v15 }
 0x5c4   : > { %9243 = vrot.lane.b32.xlu0 %v9242_v30, %s9519_s26  ;;  %9218 = vrot.lane.b32.xlu1 %v9217_v58, %s9525_s4  ;;  %v4695_v36 = vcombine.low %v4639_v7, %v4655_v35  ;;  %v4382_v2 = vcombine.high %v11971_v11, %v11965_v18  ;;  %v4662_v57 = vrot.slane %v4648_v39, %v12894_v21 }
 0x5c5   : > { %v9237_v46 = vpack.i.bf16 %v4380_v26, %v4185_v59  ;;  %v4646_v63 = vrot.slane %v4632_v29, %v12894_v21  ;;  %v4344_v13 = vrot.slane %v4330_v38, %v12895_v15  ;;  %v4696_v28 = vcombine.high %v4639_v7, %v4655_v35 }
 0x5c6   : > { %v4622_v17 = vpop.permute.xlu0 %4621  ;;  %v12044_v18 = vrot.slane %v4695_v36, %v12895_v15  ;;  %v4149_v32 = vrot.slane %v4135_v20, %v12895_v15  ;;  %v4507_v36 = vrot.slane %v4493_v22, %v12895_v15 }
 0x5c7   : > { %v4620_v0 = vpop.permute.xlu1 %4619  ;;  %v4679_v30 = vcombine.low %v4618_v9, %v4622_v17  ;;  %v4680_v58 = vcombine.high %v4618_v9, %v4622_v17  ;;  %v4187_v9 = vcombine.high %v11956_v8, %v11937_v47  ;;  %v4383_v47 = vcombine.low %v4344_v13, %v4376_v55 }
 0x5c8   : > { %v4663_v4 = vcombine.low %v4616_v54, %v4620_v0  ;;  %v4664_v33 = vcombine.high %v4616_v54, %v4620_v0  ;;  %9228 = vrot.lane.b32.xlu1 %v9227_v12, %s9518_s3  ;;  %v4541_v54 = vcombine.high %v11997_v48, %v11994_v52  ;;  %v4711_v8 = vcombine.low %v4646_v63, %v4662_v57 }
 0x5c9   : > { %v4687_v42 = vrot.slane %v4679_v30, %v12894_v21  ;;  %v4694_v16 = vrot.slane %v4680_v58, %v12894_v21  ;;  %v9247_v39 = vpack.i.bf16 %v4382_v2, %v4187_v9  ;;  %v4539_v48 = vrot.slane %v4525_v14, %v12895_v15 }
 0x5ca   : > { %v4671_v56 = vrot.slane %v4663_v4, %v12894_v21  ;;  %v4678_v34 = vrot.slane %v4664_v33, %v12894_v21  ;;  %v12028_v50 = vpop.permute.xlu0 %4804  ;;  %v4181_v33 = vrot.slane %v4167_v51, %v12895_v15  ;;  %v4710_v29 = vrot.slane %v4696_v28, %v12895_v15 }
 0x5cb   : > { %v12030_v6 = vpop.permute.xlu1 %4802  ;;  %v4557_v0 = vcombine.high %v11682_v45, %v11671_v49  ;;  %v4712_v26 = vcombine.high %v4646_v63, %v4662_v57  ;;  %v4548_v51 = vrot.slane %v4540_v27, %v12895_v15  ;;  %v4719_v20 = vrot.slane %v4711_v8, %v12895_v15 }
 0x5cc   : > { %v4727_v4 = vcombine.low %v4671_v56, %v4687_v42  ;;  %v4728_v60 = vcombine.high %v4671_v56, %v4687_v42  ;;  %9238 = vrot.lane.b32.xlu1 %v9237_v46, %s12907_s20  ;;  %v4743_v24 = vcombine.low %v4678_v34, %v4694_v16  ;;  %v4188_v17 = vcombine.low %v4149_v32, %v4181_v33 }
 0x5cd   : > { %v4744_v30 = vcombine.high %v4678_v34, %v4694_v16  ;;  %v4384_v42 = vcombine.high %v4344_v13, %v4376_v55  ;;  %v4516_v16 = vrot.slane %v4508_v31, %v12895_v15  ;;  %v4509_v27 = vcombine.high %v11991_v62, %v11988_v19 }
 0x5ce   : > { %v12047_v11 = vrot.slane %v4727_v4, %v12895_v15  ;;  %v4742_v5 = vrot.slane %v4728_v60, %v12895_v15  ;;  %v12051_v35 = vpop.permute.xlu0 %4808  ;;  %v4751_v58 = vrot.slane %v4743_v24, %v12895_v15  ;;  %v9257_v14 = vpack.i.bf16 %v4383_v47, %v4188_v17 }
 0x5cf   : > { %v12053_v7 = vpop.permute.xlu1 %4806  ;;  %v4842_v46 = vcombine.low %v12028_v50, %v12051_v35  ;;  %v4189_v34 = vcombine.high %v4149_v32, %v4181_v33  ;;  %v4558_v55 = vcombine.low %v4507_v36, %v4539_v48  ;;  %v4758_v57 = vrot.slane %v4744_v30, %v12895_v15 }
 0x5d0   : > { %v4759_v52 = vcombine.low %v12044_v18, %v12047_v11  ;;  %9248 = vrot.lane.b32.xlu1 %v9247_v39, %s12909_s0  ;;  %v4760_v12 = vcombine.high %v12044_v18, %v12047_v11  ;;  %v4761_v56 = vcombine.low %v4710_v29, %v4742_v5  ;;  %v4826_v2 = vcombine.low %v12030_v6, %v12053_v7 }
 0x5d1   : > { %v4560_v63 = vcombine.low %v4516_v16, %v4548_v51  ;;  %v4763_v4 = vcombine.low %v4719_v20, %v4751_v58  ;;  %v4555_v60 = vrot.slane %v4541_v54, %v12895_v15  ;;  %v4726_v13 = vrot.slane %v4712_v26, %v12895_v15 }
 0x5d2   : > { %v4813_v22 = vpop.permute.xlu0 %4812  ;;  %v9252_v59 = vpack.i.bf16 %v4760_v12, %v4557_v0  ;;  %v9267_v31 = vpack.i.bf16 %v4384_v42, %v4189_v34  ;;  %v9262_v24 = vpack.i.bf16 %v4761_v56, %v4558_v55  ;;  %v4762_v39 = vcombine.high %v4710_v29, %v4742_v5 }
 0x5d3   : > { %v4811_v38 = vpop.permute.xlu1 %4810  ;;  %v4850_v19 = vrot.slane %v4842_v46, %v12894_v21  ;;  %v4834_v62 = vrot.slane %v4826_v2, %v12894_v21  ;;  %v4559_v32 = vcombine.high %v4507_v36, %v4539_v48  ;;  %v4523_v54 = vrot.slane %v4509_v27, %v12895_v15 }
 0x5d4   : > { %9258 = vrot.lane.b32.xlu1 %v9257_v14, %s9520_s27  ;;  %9253 = vrot.lane.b32.xlu0 %v9252_v59, %s9525_s4  ;;  %v9277_v0 = vpack.i.bf16 %v4763_v4, %v4560_v63  ;;  %v4765_v12 = vcombine.low %v4726_v13, %v4758_v57  ;;  %v4764_v30 = vcombine.high %v4719_v20, %v4751_v58 }
 0x5d5   : > { %v9272_v26 = vpack.i.bf16 %v4762_v39, %v4559_v32  ;;  %v4890_v14 = vcombine.low %v4834_v62, %v4850_v19  ;;  %v4562_v42 = vcombine.low %v4523_v54, %v4555_v60  ;;  %v4843_v56 = vcombine.high %v12028_v50, %v12051_v35 }
 0x5d6   : > { %v4817_v28 = vpop.permute.xlu0 %4816  ;;  %v4827_v36 = vcombine.high %v12030_v6, %v12053_v7  ;;  %v4561_v48 = vcombine.high %v4516_v16, %v4548_v51  ;;  %v4563_v6 = vcombine.high %v4523_v54, %v4555_v60  ;;  %v4891_v51 = vcombine.high %v4834_v62, %v4850_v19 }
 0x5d7   : > { %v4815_v9 = vpop.permute.xlu1 %4814  ;;  %v4874_v47 = vcombine.low %v4813_v22, %v4817_v28  ;;  %v4875_v5 = vcombine.high %v4813_v22, %v4817_v28  ;;  %v9287_v22 = vpack.i.bf16 %v4765_v12, %v4562_v42  ;;  %v12102_v50 = vrot.slane %v4890_v14, %v12895_v15 }
 0x5d8   : > { %v4858_v33 = vcombine.low %v4811_v38, %v4815_v9  ;;  %9268 = vrot.lane.b32.xlu1 %v9267_v31, %s12913_s17  ;;  %9263 = vrot.lane.b32.xlu0 %v9262_v24, %s9518_s3  ;;  %v4859_v29 = vcombine.high %v4811_v38, %v4815_v9  ;;  %v4766_v38 = vcombine.high %v4726_v13, %v4758_v57 }
 0x5d9   : > { %v4882_v8 = vrot.slane %v4874_v47, %v12894_v21  ;;  %v4889_v58 = vrot.slane %v4875_v5, %v12894_v21  ;;  %v9282_v27 = vpack.i.bf16 %v4764_v30, %v4561_v48  ;;  %v4857_v35 = vrot.slane %v4843_v56, %v12894_v21 }
 0x5da   : > { %v4866_v17 = vrot.slane %v4858_v33, %v12894_v21  ;;  %v4873_v20 = vrot.slane %v4859_v29, %v12894_v21  ;;  %v4841_v7 = vrot.slane %v4827_v36, %v12894_v21  ;;  %v9292_v57 = vpack.i.bf16 %v4766_v38, %v4563_v6 }
 0x5db   : > { %v4905_v4 = vrot.slane %v4891_v51, %v12895_v15  ;;  %v12922_v42 = vcombine.low %v11759_v23, %v11762_v43  ;;  %v12923_v36 = vcombine.low %v11572_v25, %v11577_v44 }
 0x5dc   : > { %v4922_v59 = vcombine.low %v4866_v17, %v4882_v8  ;;  %9278 = vrot.lane.b32.xlu1 %v9277_v0, %s9519_s26  ;;  %9273 = vrot.lane.b32.xlu0 %v9272_v26, %s12907_s20  ;;  %v4923_v2 = vcombine.high %v4866_v17, %v4882_v8  ;;  %v4938_v55 = vcombine.low %v4873_v20, %v4889_v58  ;;  %v4998_v8 = vld [vmem:[%s12920_s29] sm:$0xff] }
 0x5dd   : > { %v4906_v60 = vcombine.low %v4841_v7, %v4857_v35  ;;  %v4939_v13 = vcombine.high %v4873_v20, %v4889_v58  ;;  %v4907_v24 = vcombine.high %v4841_v7, %v4857_v35  ;;  %v4999_v17 = vld [vmem:[%s12921_s30] sm:$0xff] }
 0x5de   : > { %v12097_v46 = vrot.slane %v4922_v59, %v12895_v15  ;;  %v4937_v34 = vrot.slane %v4923_v2, %v12895_v15  ;;  %v4946_v28 = vrot.slane %v4938_v55, %v12895_v15 }
 0x5df   : > { %v4914_v39 = vrot.slane %v4906_v60, %v12895_v15  ;;  %v4953_v19 = vrot.slane %v4939_v13, %v12895_v15  ;;  %v4921_v33 = vrot.slane %v4907_v24, %v12895_v15 }
 0x5e0   : > { %9288 = vrot.lane.b32.xlu1 %v9287_v22, %s9520_s27  ;;  %9283 = vrot.lane.b32.xlu0 %v9282_v27, %s12909_s0  ;;  %v4954_v16 = vcombine.low %v12102_v50, %v12097_v46  ;;  %v4955_v63 = vcombine.high %v12102_v50, %v12097_v46  ;;  %v4956_v9 = vcombine.low %v4905_v4, %v4937_v34 }
 0x5e1   : > { %v4957_v31 = vcombine.high %v4905_v4, %v4937_v34  ;;  %v4958_v62 = vcombine.low %v4914_v39, %v4946_v28  ;;  %v4959_v47 = vcombine.high %v4914_v39, %v4946_v28  ;;  %v4960_v32 = vcombine.low %v4921_v33, %v4953_v19 }
 0x5e2   : > { %v4961_v54 = vcombine.high %v4921_v33, %v4953_v19 }
 0x5e4   : > { %9293 = vrot.lane.b32.xlu0 %v9292_v57, %s12913_s17  ;;  %4963 = vrot.lane.b32.xlu1 %v4955_v63, %s9525_s4  ;;  %s12932_s4 = sld [smem:[#allocation61_spill]] }
 0x5e8   : > { %4967 = vrot.lane.b32.xlu0 %v4956_v9, %s9518_s3  ;;  %4971 = vrot.lane.b32.xlu1 %v4957_v31, %s12907_s20  ;;  %s8039_s3 = sshll.u32 %s12937_s28, 5 }
 0x5e9   : > { %s727_s30 = scalar_lea.vmem %s12934_s24, %s8039_s3 }
 0x5ec   : > { %4975 = vrot.lane.b32.xlu0 %v4958_v62, %s9519_s26  ;;  %4979 = vrot.lane.b32.xlu1 %v4959_v47, %s12909_s0  ;;  %v12924_v47 = vmov 0.0|0.0  }
 0x5f0   : > { %4983 = vrot.lane.b32.xlu0 %v4960_v32, %s9520_s27  ;;  %4987 = vrot.lane.b32.xlu1 %v4961_v54, %s12913_s17 }
 0x5f4   : > { %5075 = vperm.xlu0 %9156, %v4998_v8   ;;  %5081 = vperm.xlu1 %9155, %v4999_v17  }
 0x606   : > { %v9159_v0 = vpop.permute.xlu1 %9158  ;;  %v9164_v12 = vpop.permute.xlu0 %9163 }
 0x607   : > { %v9161_v29 = vunpack.i.h.bf16 %v9159_v0  ;;  %v9160_v26 = vunpack.i.l.bf16 %v9159_v0  ;;  %v9166_v30 = vunpack.i.h.bf16 %v9164_v12  ;;  %v9165_v14 = vunpack.i.l.bf16 %v9164_v12 }
 0x609   : > { %v3641_v56 = vsel %vm995_vm4, %v12922_v42, %v9161_v29  ;;  %v3438_v48 = vsel %vm995_vm4, %v12923_v36, %v9160_v26  ;;  %v12925_v29 = vcombine.low %v11618_v3, %v11621_v1 }
 0x60a   : > { %v9169_v5 = vpop.permute.xlu1 %9168  ;;  %v9174_v22 = vpop.permute.xlu0 %9173  ;;  %v3439_v27 = vsel %vm997_vm5, %v3438_v48, %v9165_v14  ;;  %v3642_v6 = vsel %vm997_vm5, %v3641_v56, %v9166_v30  ;;  %v12926_v30 = vcombine.low %v11813_v37, %v11816_v41 }
 0x60b   : > { %v9171_v38 = vunpack.i.h.bf16 %v9169_v5  ;;  %v9170_v58 = vunpack.i.l.bf16 %v9169_v5  ;;  %v9176_v20 = vunpack.i.h.bf16 %v9174_v22  ;;  %v9175_v2 = vunpack.i.l.bf16 %v9174_v22 }
 0x60d   : > { %v3440_v7 = vsel %vm999_vm6, %v3439_v27, %v9170_v58  ;;  %v3643_v23 = vsel %vm999_vm6, %v3642_v6, %v9171_v38 }
 0x60e   : > { %v9179_v59 = vpop.permute.xlu1 %9178  ;;  %v3441_v44 = vsel %vm1001_vm7, %v3440_v7, %v9175_v2  ;;  %v3644_v55 = vsel %vm1001_vm7, %v3643_v23, %v9176_v20 }
 0x60f   : > { %v9181_v43 = vunpack.i.h.bf16 %v9179_v59  ;;  %v9180_v51 = vunpack.i.l.bf16 %v9179_v59 }
 0x611   : > { %v3442_v4 = vsel %vm1003_vm8, %v3441_v44, %v9180_v51  ;;  %v3645_v60 = vsel %vm1003_vm8, %v3644_v55, %v9181_v43 }
 0x612   : > { %v9189_v35 = vpop.permute.xlu1 %9188 }
 0x613   : > { %v9191_v34 = vunpack.i.h.bf16 %v9189_v35  ;;  %v9190_v25 = vunpack.i.l.bf16 %v9189_v35 }
 0x615   : > { %v3443_v9 = vsel %vm1005_vm9, %v3442_v4, %v9190_v25  ;;  %v3646_v31 = vsel %vm1005_vm9, %v3645_v60, %v9191_v34 }
 0x616   : > { %v9184_v57 = vpop.permute.xlu0 %9183  ;;  %v9199_v63 = vpop.permute.xlu1 %9198 }
 0x617   : > { %v9201_v13 = vunpack.i.h.bf16 %v9199_v63  ;;  %v9200_v28 = vunpack.i.l.bf16 %v9199_v63  ;;  %v9186_v32 = vunpack.i.h.bf16 %v9184_v57  ;;  %v9185_v54 = vunpack.i.l.bf16 %v9184_v57 }
 0x619   : > { %v3444_v24 = vsel %vm1007_vm10, %v3443_v9, %v9200_v28  ;;  %v3647_v39 = vsel %vm1007_vm10, %v3646_v31, %v9201_v13  ;;  %v4015_v26 = vsel %vm995_vm4, %v12925_v29, %v9186_v32  ;;  %v3836_v14 = vsel %vm995_vm4, %v12926_v30, %v9185_v54 }
 0x61a   : > { %v9194_v19 = vpop.permute.xlu0 %9193  ;;  %v8593_v62 = vpack.c.bf16 %v3647_v39, %v3444_v24  ;;  %v9209_v59 = vpop.permute.xlu1 %9208 }
 0x61b   : > { %v9196_v8 = vunpack.i.h.bf16 %v9194_v19  ;;  %v9195_v17 = vunpack.i.l.bf16 %v9194_v19  ;;  %v9211_v3 = vunpack.i.h.bf16 %v9209_v59  ;;  %v9210_v1 = vunpack.i.l.bf16 %v9209_v59 }
 0x61c   : > { %8594 = vmatpush3.bf16.msra.mxu1 %v8593_v62  ;;  %v12927_v19 = vcombine.low %v11959_v40, %v11962_v10 }
 0x61d   : > { %8595 = vmatprep.subr.bf16.mxu1 %v12924_v47  ;;  %v3837_v42 = vsel %vm997_vm5, %v3836_v14, %v9195_v17  ;;  %v4016_v56 = vsel %vm997_vm5, %v4015_v26, %v9196_v8 }
 0x61e   : > { %v9204_v33 = vpop.permute.xlu0 %9203 }
 0x61f   : > { %v9206_v12 = vunpack.i.h.bf16 %v9204_v33  ;;  %v9205_v5 = vunpack.i.l.bf16 %v9204_v33  ;;  %v12928_v33 = vcombine.low %v11879_v61, %v11882_v53 }
 0x621   : > { %v3838_v48 = vsel %vm999_vm6, %v3837_v42, %v9205_v5  ;;  %v4017_v22 = vsel %vm999_vm6, %v4016_v56, %v9206_v12 }
 0x622   : > { %v9214_v0 = vpop.permute.xlu0 %9213  ;;  %v3839_v37 = vsel %vm1001_vm7, %v3838_v48, %v9210_v1  ;;  %v4018_v41 = vsel %vm1001_vm7, %v4017_v22, %v9211_v3 }
 0x623   : > { %v9216_v38 = vunpack.i.h.bf16 %v9214_v0  ;;  %v9215_v58 = vunpack.i.l.bf16 %v9214_v0 }
 0x625   : > { %v3840_v6 = vsel %vm1003_vm8, %v3839_v37, %v9215_v58  ;;  %v4019_v35 = vsel %vm1003_vm8, %v4018_v41, %v9216_v38 }
 0x626   : > { %v9224_v36 = vpop.permute.xlu0 %9223 }
 0x627   : > { %v9226_v20 = vunpack.i.h.bf16 %v9224_v36  ;;  %v9225_v2 = vunpack.i.l.bf16 %v9224_v36 }
 0x629   : > { %v3841_v43 = vsel %vm1005_vm9, %v3840_v6, %v9225_v2  ;;  %v4020_v51 = vsel %vm1005_vm9, %v4019_v35, %v9226_v20 }
 0x62a   : > { %v9234_v27 = vpop.permute.xlu0 %9233 }
 0x62b   : > { %v9236_v7 = vunpack.i.h.bf16 %v9234_v27  ;;  %v9235_v23 = vunpack.i.l.bf16 %v9234_v27 }
 0x62d   : > { %v3842_v34 = vsel %vm1007_vm10, %v3841_v43, %v9235_v23  ;;  %v4021_v25 = vsel %vm1007_vm10, %v4020_v51, %v9236_v7  ;;  %v12929_v7 = vcombine.low %v11682_v45, %v11671_v49 }
 0x62e   : > { %v8596_v44 = vpack.c.bf16 %v4021_v25, %v3842_v34 }
 0x630   : > { %8597 = vmatpush3.bf16.msra.mxu1 %v8596_v44 }
 0x631   : > { %8598 = vmatprep.subr.bf16.mxu1 %v12924_v47 }
 0x636   : > { %v9219_v55 = vpop.permute.xlu1 %9218  ;;  %v9244_v9 = vpop.permute.xlu0 %9243 }
 0x637   : > { %v9221_v4 = vunpack.i.h.bf16 %v9219_v55  ;;  %v9220_v60 = vunpack.i.l.bf16 %v9219_v55  ;;  %v9246_v40 = vunpack.i.h.bf16 %v9244_v9  ;;  %v9245_v10 = vunpack.i.l.bf16 %v9244_v9 }
 0x639   : > { %v4413_v62 = vsel %vm995_vm4, %v12927_v19, %v9221_v4  ;;  %v4218_v32 = vsel %vm995_vm4, %v12928_v33, %v9220_v60 }
 0x63a   : > { %v9229_v57 = vpop.permute.xlu1 %9228 }
 0x63b   : > { %v9231_v13 = vunpack.i.h.bf16 %v9229_v57  ;;  %v9230_v28 = vunpack.i.l.bf16 %v9229_v57 }
 0x63d   : > { %v4219_v54 = vsel %vm997_vm5, %v4218_v32, %v9230_v28  ;;  %v4414_v8 = vsel %vm997_vm5, %v4413_v62, %v9231_v13 }
 0x63e   : > { %v9239_v63 = vpop.permute.xlu1 %9238 }
 0x63f   : > { %v9241_v31 = vunpack.i.h.bf16 %v9239_v63  ;;  %v9240_v24 = vunpack.i.l.bf16 %v9239_v63 }
 0x641   : > { %v4220_v17 = vsel %vm999_vm6, %v4219_v54, %v9240_v24  ;;  %v4415_v0 = vsel %vm999_vm6, %v4414_v8, %v9241_v31 }
 0x642   : > { %v9249_v39 = vpop.permute.xlu1 %9248  ;;  %v4221_v61 = vsel %vm1001_vm7, %v4220_v17, %v9245_v10  ;;  %v4416_v53 = vsel %vm1001_vm7, %v4415_v0, %v9246_v40 }
 0x643   : > { %v9251_v12 = vunpack.i.h.bf16 %v9249_v39  ;;  %v9250_v5 = vunpack.i.l.bf16 %v9249_v39 }
 0x645   : > { %v4222_v59 = vsel %vm1003_vm8, %v4221_v61, %v9250_v5  ;;  %v4417_v42 = vsel %vm1003_vm8, %v4416_v53, %v9251_v12 }
 0x646   : > { %v9254_v29 = vpop.permute.xlu0 %9253  ;;  %v9259_v26 = vpop.permute.xlu1 %9258 }
 0x647   : > { %v9261_v30 = vunpack.i.h.bf16 %v9259_v26  ;;  %v9260_v14 = vunpack.i.l.bf16 %v9259_v26  ;;  %v9256_v48 = vunpack.i.h.bf16 %v9254_v29  ;;  %v9255_v22 = vunpack.i.l.bf16 %v9254_v29 }
 0x648   : > { %v12930_v26 = vmov 0.0  }
 0x649   : > { %v4223_v3 = vsel %vm1005_vm9, %v4222_v59, %v9260_v14  ;;  %v4418_v1 = vsel %vm1005_vm9, %v4417_v42, %v9261_v30  ;;  %v4592_v23 = vsel %vm995_vm4, %v12929_v7, %v9255_v22  ;;  %v4795_v43 = vsel %vm995_vm4, %v4759_v52, %v9256_v48 }
 0x64a   : > { %v9264_v56 = vpop.permute.xlu0 %9263  ;;  %v9269_v36 = vpop.permute.xlu1 %9268 }
 0x64b   : > { %v9271_v38 = vunpack.i.h.bf16 %v9269_v36  ;;  %v9270_v58 = vunpack.i.l.bf16 %v9269_v36  ;;  %v9266_v20 = vunpack.i.h.bf16 %v9264_v56  ;;  %v9265_v2 = vunpack.i.l.bf16 %v9264_v56 }
 0x64d   : > { %v4224_v37 = vsel %vm1007_vm10, %v4223_v3, %v9270_v58  ;;  %v4419_v41 = vsel %vm1007_vm10, %v4418_v1, %v9271_v38  ;;  %v4593_v25 = vsel %vm997_vm5, %v4592_v23, %v9265_v2  ;;  %v4796_v44 = vsel %vm997_vm5, %v4795_v43, %v9266_v20 }
 0x64e   : > { %v9274_v27 = vpop.permute.xlu0 %9273  ;;  %v9279_v6 = vpop.permute.xlu1 %9278  ;;  %v8599_v35 = vpack.c.bf16 %v4419_v41, %v4224_v37 }
 0x64f   : > { %v9276_v51 = vunpack.i.h.bf16 %v9274_v27  ;;  %v9275_v34 = vunpack.i.l.bf16 %v9274_v27  ;;  %v9281_v55 = vunpack.i.h.bf16 %v9279_v6  ;;  %v9280_v57 = vunpack.i.l.bf16 %v9279_v6 }
 0x650   : > { %8600 = vmatpush3.bf16.msra.mxu1 %v8599_v35 }
 0x651   : > { %v4594_v63 = vsel %vm999_vm6, %v4593_v25, %v9275_v34  ;;  %v4797_v49 = vsel %vm999_vm6, %v4796_v44, %v9276_v51  ;;  %8601 = vmatprep.subr.bf16.mxu1 %v12924_v47 }
 0x652   : > { %v9284_v45 = vpop.permute.xlu0 %9283  ;;  %v9289_v4 = vpop.permute.xlu1 %9288  ;;  %v4798_v52 = vsel %vm1001_vm7, %v4797_v49, %v9281_v55  ;;  %v4595_v60 = vsel %vm1001_vm7, %v4594_v63, %v9280_v57 }
 0x653   : > { %v9286_v18 = vunpack.i.h.bf16 %v9284_v45  ;;  %v9285_v11 = vunpack.i.l.bf16 %v9284_v45  ;;  %v9291_v13 = vunpack.i.h.bf16 %v9289_v4  ;;  %v9290_v28 = vunpack.i.l.bf16 %v9289_v4 }
 0x655   : > { %v4596_v9 = vsel %vm1003_vm8, %v4595_v60, %v9285_v11  ;;  %v4799_v31 = vsel %vm1003_vm8, %v4798_v52, %v9286_v18  ;;  %v5258_v52 = vld [vmem:[%s12634_s7 + $0x8] sm:$0xff]  ;;  %v5425_v60 = vld [vmem:[%s12636_s9] sm:$0xff] }
 0x656   : > { %v9294_v24 = vpop.permute.xlu0 %9293  ;;  %v4964_v39 = vpop.permute.xlu1 %4963  ;;  %v4597_v33 = vsel %vm1005_vm9, %v4596_v9, %v9290_v28  ;;  %v4800_v32 = vsel %vm1005_vm9, %v4799_v31, %v9291_v13  ;;  %v5426_v28 = vld [vmem:[%s12636_s9 + $0x8] sm:$0xff]  ;;  %v5259_v9 = vld [vmem:[%s12634_s7 + $0x10] sm:$0xff]  ;;  %v5260_v31 = vld [vmem:[%s12634_s7 + $0x18] sm:$0xff] }
 0x657   : > { %v9296_v19 = vunpack.i.h.bf16 %v9294_v24  ;;  %v9295_v62 = vunpack.i.l.bf16 %v9294_v24  ;;  %v4990_v17 = vsel %vm995_vm4, %v4954_v16, %v4964_v39  ;;  %v4997_v16 = vld [vmem:[%s12931_s25] sm:$0xff]  ;;  %v8617_v24 = vpack.c.bf16 %v5426_v28, %v5425_v60  ;;  %v5427_v39 = vld [vmem:[%s12636_s9 + $0x10] sm:$0xff] }
 0x659   : > { %v4598_v54 = vsel %vm1007_vm10, %v4597_v33, %v9295_v62  ;;  %v4801_v8 = vsel %vm1007_vm10, %v4800_v32, %v9296_v19  ;;  %v5428_v19 = vld [vmem:[%s12636_s9 + $0x18] sm:$0xff]  ;;  %v8608_v32 = vpack.c.bf16 %v5260_v31, %v5259_v9  ;;  %v7973_v31 = vld [vmem:[%s12641_s14] ss:$0 sm:$0xff] }
 0x65a   : > { %v4968_v0 = vpop.permute.xlu0 %4967  ;;  %v4972_v12 = vpop.permute.xlu1 %4971  ;;  %v8602_v5 = vpack.c.bf16 %v4801_v8, %v4598_v54  ;;  %v8620_v54 = vpack.c.bf16 %v5428_v19, %v5427_v39 }
 0x65b   : > { %v4991_v29 = vsel %vm997_vm5, %v4990_v17, %v4968_v0 }
 0x65c   : > { %8603 = vmatpush3.bf16.msra.mxu1 %v8602_v5  ;;  %v4992_v40 = vsel %vm999_vm6, %v4991_v29, %v4972_v12  ;;  %vm5758_vm6 = vcmask 253952  }
 0x65d   : > { %8240 = vmatprep.subr.mxu1 %v12930_v26 }
 0x65e   : > { %v4976_v10 = vpop.permute.xlu0 %4975  ;;  %v4980_v30 = vpop.permute.xlu1 %4979 }
 0x65f   : > { %v4993_v14 = vsel %vm1001_vm7, %v4992_v40, %v4976_v10 }
 0x660   : > { %v4994_v61 = vsel %vm1003_vm8, %v4993_v14, %v4980_v30 }
 0x662   : > { %v4984_v53 = vpop.permute.xlu0 %4983  ;;  %v4988_v46 = vpop.permute.xlu1 %4987 }
 0x663   : > { %v4995_v50 = vsel %vm1005_vm9, %v4994_v61, %v4984_v53 }
 0x664   : > { %v4996_v59 = vsel %vm1007_vm10, %v4995_v50, %v4988_v46  ;;  %vm7643_vm10 = vcmask 57344  }
 0x665   : > { %8241 = vmatpush3.msra.mxu1 %v4996_v59 }
 0x666   : > { %8243 = vmatmul.mubr.msk.f32.vlgmr.msra.gmra.mrb[0].mxu1 %vm1011_vm12, %v4997_v16  ;;  %8616 = vmatprep.subr.bf16.mxu1 %v12924_v47 }
 0x667   : > { %8275 = vmatprep.mubr.msk.f32.mxu1 %vm12893_vm13, %v12930_v26  ;;  %8618 = vmatpush3.bf16.msra.mxu1 %v8617_v24 }
 0x668   : > { %8619 = vmatprep.subr.bf16.mxu1 %v12924_v47 }
 0x66b   : > { %8621 = vmatpush3.bf16.msra.mxu1 %v8620_v54 }
 0x66c   : > { %8628 = vmatprep.subr.bf16.mxu1 %v12924_v47 }
 0x673   : > { %v5076_v42 = vpop.permute.xlu0 %5075  ;;  %v5082_v22 = vpop.permute.xlu1 %5081 }
 0x739   : > { %v5069_v56 = vpop.f32.mrb[0].mxu1 }
 0x73a   : > { %v5078_v36 = vmul.f32 %v5076_v42, %v5069_v56  ;;  %v8244_v48 = vpop.f32.mrb[1].mxu1 }
 0x73c   : > { %v5084_v38 = vadd.f32 %v5082_v22, %v5078_v36  ;;  %v5342_v22 = vld [vmem:[%s12635_s8] sm:$0xff] }
 0x73e   : > { %v5086_v58 = vmin.f32 %v5084_v38, 0.0  ;;  %vm5085_vm5 = vcmp.gt.f32.partialorder %v5084_v38, 0.0 }
 0x740   : > { %v5087_v3 = vmul.f32 1.442695, %v5086_v58  ;;  %v5512_v58 = vld [vmem:[%s12638_s11] sm:$0xff] }
 0x742   : > { %9321 = vpow2.f32 %v5087_v3  ;;  %v5513_v3 = vld [vmem:[%s12638_s11 + $0x8] sm:$0xff] }
 0x74c   : > { %v9322_v1 = vpop.eup %9321 }
 0x74d   : > { %v7970_v20 = vadd.f32 -1.0, %v9322_v1 }
 0x74f   : > { %v5090_v2 = vsel %vm5085_vm5, %v5084_v38, %v7970_v20  ;;  %v5343_v38 = vld [vmem:[%s12635_s8 + $0x8] sm:$0xff]  ;;  %v5344_v20 = vld [vmem:[%s12635_s8 + $0x10] sm:$0xff] }
 0x750   : > { %5095 = vrot.lane.b32.xlu1 %v5090_v2, %s9523_s6  ;;  %5092 = vrot.lane.b32.xlu0 %v5090_v2, %s9524_s23  ;;  %v8611_v1 = vpack.c.bf16 %v5343_v38, %v5342_v22 }
 0x754   : > { %5098 = vrot.lane.b32.xlu0 %v5090_v2, %s9522_s5 }
 0x7c2   : > { %v5096_v37 = vpop.permute.xlu1 %5095  ;;  %v5093_v41 = vpop.permute.xlu0 %5092 }
 0x7c3   : > { %v5101_v27 = vcombine.low %v5090_v2, %v5096_v37  ;;  %v5102_v23 = vcombine.high %v5090_v2, %v5096_v37  ;;  %v5345_v2 = vld [vmem:[%s12635_s8 + $0x18] sm:$0xff]  ;;  %v12302_v37 = vpack.c.bf16 %v5513_v3, %v5512_v58 }
 0x7c5   : > { %v5109_v43 = vrot.slane %v5101_v27, %v12894_v21  ;;  %v5116_v55 = vrot.slane %v5102_v23, %v12894_v21  ;;  %v5514_v27 = vld [vmem:[%s12638_s11 + $0x10] sm:$0xff]  ;;  %v5509_v23 = vld [vmem:[%s12637_s10 + $0x8] sm:$0xff] }
 0x7c6   : > { %v5099_v6 = vpop.permute.xlu0 %5098 }
 0x7c7   : > { %v5117_v35 = vcombine.low %v5093_v41, %v5099_v6  ;;  %v5118_v7 = vcombine.high %v5093_v41, %v5099_v6  ;;  %v5515_v6 = vld [vmem:[%s12638_s11 + $0x18] sm:$0xff] }
 0x7c9   : > { %v5125_v51 = vrot.slane %v5117_v35, %v12894_v21  ;;  %v5132_v34 = vrot.slane %v5118_v7, %v12894_v21  ;;  %v5257_v21 = vld [vmem:[%s12634_s7] sm:$0xff]  ;;  %v8614_v35 = vpack.c.bf16 %v5345_v2, %v5344_v20 }
 0x7ca   : > { %v8605_v13 = vpack.c.bf16 %v5258_v52, %v5257_v21  ;;  %v5508_v7 = vld [vmem:[%s12637_s10] sm:$0xff] }
 0x7cb   : > { %v5133_v25 = vcombine.low %v5109_v43, %v5125_v51  ;;  %v5134_v44 = vcombine.high %v5109_v43, %v5125_v51  ;;  %v5149_v63 = vcombine.low %v5116_v55, %v5132_v34  ;;  %v5150_v4 = vcombine.high %v5116_v55, %v5132_v34  ;;  %v5510_v34 = vld [vmem:[%s12637_s10 + $0x10] sm:$0xff]  ;;  %v5516_v55 = vld [vmem:[%s12639_s12] sm:$0xff] }
 0x7cc   : > { %8606 = vmatpush3.bf16.msra.mxu0 %v8605_v13  ;;  %v12322_v43 = vpack.c.bf16 %v5515_v6, %v5514_v27  ;;  %v12327_v51 = vpack.c.bf16 %v5509_v23, %v5508_v7 }
 0x7cd   : > { %v5141_v57 = vrot.slane %v5133_v25, %v12895_v15  ;;  %v5148_v45 = vrot.slane %v5134_v44, %v12895_v15  ;;  %v5157_v11 = vrot.slane %v5149_v63, %v12895_v15  ;;  %v5164_v33 = vrot.slane %v5150_v4, %v12895_v15  ;;  %8607 = vmatprep.subr.bf16.mxu0 %v12924_v47  ;;  %v5511_v25 = vld [vmem:[%s12637_s10 + $0x18] sm:$0xff] }
 0x7ce   : > { %v12340_v44 = vpack.c.bf16 %v5511_v25, %v5510_v34 }
 0x7cf   : > { %5177 = vrot.lane.b32.xlu1 %v5141_v57, %s9532_s22  ;;  %v5165_v49 = vcombine.high %v5141_v57, %v12930_v26  ;;  %v5166_v18 = vcombine.high %v5148_v45, %v12930_v26  ;;  %v5167_v62 = vcombine.high %v5157_v11, %v12930_v26  ;;  %v5168_v8 = vcombine.high %v5164_v33, %v12930_v26 }
 0x7d0   : > { %8609 = vmatpush3.bf16.msra.mxu0 %v8608_v32 }
 0x7d1   : > { %5179 = vrot.lane.b32.xlu0 %v5165_v49, %s9532_s22  ;;  %8610 = vmatprep.subr.bf16.mxu0 %v12924_v47 }
 0x7d3   : > { %5181 = vrot.lane.b32.xlu1 %v5148_v45, %s9532_s22 }
 0x7d5   : > { %5183 = vrot.lane.b32.xlu0 %v5166_v18, %s9532_s22 }
 0x7d7   : > { %5185 = vrot.lane.b32.xlu1 %v5157_v11, %s9532_s22 }
 0x7d9   : > { %5187 = vrot.lane.b32.xlu0 %v5167_v62, %s9532_s22 }
 0x7db   : > { %5189 = vrot.lane.b32.xlu1 %v5164_v33, %s9532_s22 }
 0x7dd   : > { %5191 = vrot.lane.b32.xlu0 %v5168_v8, %s9532_s22  ;;  %s12933_s22 = sld [smem:[#allocation62_spill]] }
 0x841   : > { %v5178_v15 = vpop.permute.xlu1 %5177 }
 0x842   : > { %v5201_v0 = vmax.f32 %v5141_v57, %v5178_v15  ;;  %v5517_v57 = vld [vmem:[%s12639_s12 + $0x8] sm:$0xff] }
 0x843   : > { %v5180_v17 = vpop.permute.xlu0 %5179  ;;  %v12357_v63 = vpack.c.bf16 %v5517_v57, %v5516_v55 }
 0x844   : > { %v5202_v12 = vmax.f32 %v5165_v49, %v5180_v17  ;;  %v5518_v49 = vld [vmem:[%s12639_s12 + $0x10] sm:$0xff] }
 0x845   : > { %v5182_v5 = vpop.permute.xlu1 %5181 }
 0x846   : > { %v5217_v29 = vcombine.low %v5201_v0, %v5202_v12  ;;  %v5203_v10 = vmax.f32 %v5148_v45, %v5182_v5  ;;  %v5519_v45 = vld [vmem:[%s12639_s12 + $0x18] sm:$0xff] }
 0x847   : > { %v5184_v40 = vpop.permute.xlu0 %5183  ;;  %v12370_v4 = vpack.c.bf16 %v5519_v45, %v5518_v49 }
 0x848   : > { %v5204_v30 = vmax.f32 %v5166_v18, %v5184_v40  ;;  %5225 = vxpose.xlu1.b32.start [1/4] (short) (narrow) %v5217_v29, 8  ;;  %v7971_v18 = vld [vmem:[%s12640_s13] ss:$0 sm:$0xff] }
 0x849   : > { %v5186_v14 = vpop.permute.xlu1 %5185 }
 0x84a   : > { %v5218_v61 = vcombine.low %v5203_v10, %v5204_v30  ;;  %v5205_v46 = vmax.f32 %v5157_v11, %v5186_v14  ;;  %v7975_v11 = vld [vmem:[%s12642_s15] ss:$0 sm:$0xff] }
 0x84b   : > { %v5188_v53 = vpop.permute.xlu0 %5187 }
 0x84c   : > { %v5206_v50 = vmax.f32 %v5167_v62, %v5188_v53  ;;  %5226 = vxpose.xlu1.b32.cont [2/4] (short) (narrow) %v5218_v61, 8  ;;  %v12399_v61 = vld [vmem:[%s12643_s16] sm:$0x1] }
 0x84d   : > { %v5190_v16 = vpop.permute.xlu1 %5189 }
 0x84e   : > { %v5219_v59 = vcombine.low %v5205_v46, %v5206_v50  ;;  %v5207_v56 = vmax.f32 %v5164_v33, %v5190_v16 }
 0x84f   : > { %v5192_v42 = vpop.permute.xlu0 %5191 }
 0x850   : > { %v5208_v36 = vmax.f32 %v5168_v8, %v5192_v42  ;;  %5227 = vxpose.xlu1.b32.cont [3/4] (short) (narrow) %v5219_v59, 8 }
 0x852   : > { %v5220_v48 = vcombine.low %v5207_v56, %v5208_v36 }
 0x854   : > { %5228 = vxpose.xlu1.b32.end [4/4] (short) (narrow) %v5220_v48, 8 }
 0x8c8   : > { %v5241_v41 = vpop.trf.xlu1 }
 0x8c9   : > { %8254 = vmatmul.mubr.msk.f32.vlgmr.msra.gmra.mrb[2].mxu0 %vm1001_vm7, %v5241_v41  ;;  %8276 = vmatmul.mubr.msk.f32.vlgmr.msra.gmra.mrb[2].mxu1 %vm1001_vm7, %v5241_v41 }
 0x8ca   : > { %8612 = vmatpush3.bf16.msra.mxu0 %v8611_v1  ;;  %8264 = vmatprep.mubr.msk.f32.mxu0 %vm12893_vm13, %v12930_v26 }
 0x8cb   : > { %8613 = vmatprep.subr.bf16.mxu0 %v12924_v47  ;;  %8630 = vmatpush3.bf16.msra.mxu1 %v12302_v37 }
 0x8cc   : > { %8631 = vmatprep.subr.bf16.mxu1 %v12924_v47  ;;  %8297 = vmatprep.mubr.msk.f32.mxu1 %vm12893_vm13, %v12930_v26 }
 0x8ce   : > { %8615 = vmatpush3.bf16.msra.mxu0 %v8614_v35 }
 0x8cf   : > { %8622 = vmatprep.subr.bf16.mxu0 %v12924_v47  ;;  %8633 = vmatpush3.bf16.msra.mxu1 %v12322_v43 }
 0x8d0   : > { %8640 = vmatprep.subr.bf16.mxu1 %v12924_v47 }
 0x8d1   : > { %8265 = vmatmul.mubr.msk.f32.vlgmr.msra.gmra.mrb[4].mxu0 %vm1001_vm7, %v5241_v41 }
 0x8d2   : > { %8624 = vmatpush3.bf16.msra.mxu0 %v12327_v51  ;;  %8286 = vmatprep.mubr.msk.f32.mxu0 %vm12893_vm13, %v12930_v26 }
 0x8d3   : > { %8625 = vmatprep.subr.bf16.mxu0 %v12924_v47  ;;  %8298 = vmatmul.mubr.f32.vlgmr.msra.gmra.mrb[4].mxu1 %v12930_v26 }
 0x8d4   : > { %8642 = vmatpush3.bf16.msra.mxu1 %v12327_v51  ;;  %8319 = vmatprep.mubr.msk.f32.mxu1 %vm12893_vm13, %v12930_v26 }
 0x8d5   : > { %8643 = vmatprep.subr.bf16.mxu1 %v12924_v47 }
 0x8d6   : > { %8627 = vmatpush3.bf16.msra.mxu0 %v12340_v44 }
 0x8d7   : > { %8634 = vmatprep.subr.bf16.mxu0 %v12924_v47 }
 0x8d8   : > { %8645 = vmatpush3.bf16.msra.mxu1 %v12340_v44 }
 0x8d9   : > { %8287 = vmatmul.mubr.f32.vlgmr.msra.gmra.mrb[6].mxu0 %v12930_v26  ;;  %8652 = vmatprep.subr.bf16.mxu1 %v12924_v47 }
 0x8da   : > { %8636 = vmatpush3.bf16.msra.mxu0 %v12357_v63  ;;  %8308 = vmatprep.mubr.msk.f32.mxu0 %vm12893_vm13, %v12930_v26 }
 0x8db   : > { %8637 = vmatprep.subr.bf16.mxu0 %v12924_v47 }
 0x8de   : > { %8639 = vmatpush3.bf16.msra.mxu0 %v12370_v4 }
 0x8df   : > { %8646 = vmatprep.subr.bf16.mxu0 %v12924_v47 }
 0x8e1   : > { %8309 = vmatmul.mubr.f32.vlgmr.msra.gmra.mrb[8].mxu0 %v12930_v26 }
 0x8e2   : > { %8648 = vmatpush3.bf16.msra.mxu0 %v12302_v37  ;;  %8330 = vmatprep.mubr.msk.f32.mxu0 %vm12893_vm13, %v12930_v26 }
 0x8e3   : > { %8649 = vmatprep.subr.bf16.mxu0 %v12924_v47 }
 0x8e6   : > { %8651 = vmatpush3.bf16.msra.mxu0 %v12322_v43 }
 0x8e7   : > { %8658 = vmatprep.subr.bf16.mxu0 %v12924_v47 }
 0x99c   : > { %v5337_v21 = vpop.f32.mrb[2].mxu0  ;;  %v5502_v52 = vpop.f32.mrb[2].mxu1 }
 0x99d   : > { %v5338_v60 = vadd.f32 %v7971_v18, %v5337_v21  ;;  %v5503_v13 = vadd.f32 %v7975_v11, %v5502_v52  ;;  %v8255_v28 = vpop.f32.mrb[3].mxu0  ;;  %v8277_v9 = vpop.f32.mrb[3].mxu1 }
 0x99f   : > { %5341 = vst.msk [vmem:[#allocation4] sm:$0xff] %vm1001_vm7, %v5338_v60  ;;  %5507 = vst.msk [vmem:[#allocation4 + $0x10] sm:$0xff] %vm1001_vm7, %v5503_v13 }
 0x9a4   : > { %v5419_v24 = vpop.f32.mrb[4].mxu0 }
 0x9a5   : > { %v5420_v39 = vadd.f32 %v7973_v31, %v5419_v24  ;;  %v8266_v19 = vpop.f32.mrb[5].mxu0 }
 0x9a6   : > { %v5670_v62 = vpop.f32.mrb[4].mxu1  ;;  %v5521_v32 = vld [vmem:[#allocation4] sm:$0x1]  ;;  %v5523_v59 = vld [vmem:[#allocation4 + $0x10] sm:$0x1] }
 0x9a7   : > { %5424 = vst.msk [vmem:[#allocation4 + $0x8] sm:$0xff] %vm1001_vm7, %v5420_v39  ;;  %v8299_v33 = vpop.f32.mrb[5].mxu1  ;;  %v5760_v3 = vld [vmem:[#allocation4 + $0x1] sm:$0x1]  ;;  %v5762_v52 = vld [vmem:[#allocation4 + $0x11] sm:$0x1] }
 0x9a8   : > { %v5998_v19 = vld [vmem:[#allocation4 + $0x2] sm:$0x1] }
 0x9ac   : > { %v5593_v54 = vpop.f32.mrb[6].mxu0 }
 0x9ad   : > { %v5597_v8 = vadd.f32 %v5593_v54, %v5521_v32  ;;  %v8288_v15 = vpop.f32.mrb[7].mxu0 }
 0x9ae   : > { %v5522_v17 = vld [vmem:[#allocation4 + $0x8] sm:$0x1]  ;;  %v5761_v35 = vld [vmem:[#allocation4 + $0x9] sm:$0x1] }
 0x9af   : > { %v7977_v0 = vmul.f32 -1.442695, %v5597_v8  ;;  %v5674_v12 = vadd.f32 %v5670_v62, %v5522_v17  ;;  %v5999_v17 = vld [vmem:[#allocation4 + $0xa] sm:$0x1] }
 0x9b1   : > { %9323 = vpow2.f32 %v7977_v0  ;;  %v7978_v5 = vmul.f32 -1.442695, %v5674_v12 }
 0x9b3   : > { %9325 = vpow2.f32 %v7978_v5 }
 0x9b4   : > { %v5747_v29 = vpop.f32.mrb[8].mxu0 }
 0x9b5   : > { %v8310_v40 = vpop.f32.mrb[9].mxu0  ;;  %v5748_v46 = vadd.f32 %v5747_v29, %v12399_v61 }
 0x9bb   : > { %v9324_v10 = vpop.eup %9323 }
 0x9bc   : > { %v5601_v30 = vadd.f32 1.0, %v9324_v10 }
 0x9bd   : > { %v9326_v14 = vpop.eup %9325 }
 0x9be   : > { %9327 = vrcp.f32 %v5601_v30  ;;  %v5678_v53 = vadd.f32 1.0, %v9326_v14 }
 0x9c0   : > { %9329 = vrcp.f32 %v5678_v53 }
 0x9c8   : > { %v9328_v50 = vpop.eup %9327 }
 0x9c9   : > { %v5751_v16 = vmul.f32 %v9328_v50, %v5748_v46 }
 0x9ca   : > { %v9330_v56 = vpop.eup %9329 }
 0x9cb   : > { %v5752_v42 = vadd.f32 %v5751_v16, %v5523_v59  ;;  %v5754_v36 = vsub.f32 1.0, %v9330_v56  ;;  %v5756_v38 = vmul.f32 0.0, %v9330_v56  ;;  %v6000_v16 = vld [vmem:[#allocation4 + $0x12] sm:$0x1] }
 0x9cd   : > { %9331 = vtanh.f32 %v5752_v42 }
 0x9d7   : > { %v9332_v48 = vpop.eup %9331 }
 0x9d8   : > { %v5755_v22 = vmul.f32 %v9332_v48, %v5754_v36 }
 0x9da   : > { %v5757_v58 = vadd.f32 %v5756_v38, %v5755_v22 }
 0x9dc   : > { %5759 = vst.msk [vmem:[#allocation5] sm:$0x1] %vm5758_vm6, %v5757_v58  ;;  %8320 = vmatmul.mubr.msk.f32.vlgmr.msra.gmra.mrb[6].mxu1 %vm1001_vm7, %v5757_v58  ;;  %8331 = vmatmul.mubr.msk.f32.vlgmr.msra.gmra.mrb[10].mxu0 %vm1001_vm7, %v5757_v58 }
 0x9dd   : > { %8654 = vmatpush3.bf16.msra.mxu1 %v12357_v63  ;;  %8341 = vmatprep.mubr.msk.f32.mxu1 %vm12893_vm13, %v12930_v26 }
 0x9de   : > { %8655 = vmatprep.subr.bf16.mxu1 %v12924_v47  ;;  %8660 = vmatpush3.bf16.msra.mxu0 %v12327_v51 }
 0x9df   : > { %8661 = vmatprep.subr.bf16.mxu0 %v12924_v47  ;;  %8352 = vmatprep.mubr.msk.f32.mxu0 %vm12893_vm13, %v12930_v26 }
 0x9e1   : > { %8657 = vmatpush3.bf16.msra.mxu1 %v12370_v4 }
 0x9e2   : > { %8664 = vmatprep.subr.bf16.mxu1 %v12924_v47  ;;  %8663 = vmatpush3.bf16.msra.mxu0 %v12340_v44 }
 0x9e3   : > { %8670 = vmatprep.subr.bf16.mxu0 %v12924_v47 }
 0x9e4   : > { %8342 = vmatmul.mubr.msk.f32.vlgmr.msra.gmra.mrb[8].mxu1 %vm1001_vm7, %v5757_v58 }
 0x9e5   : > { %8666 = vmatpush3.bf16.msra.mxu1 %v12302_v37  ;;  %8363 = vmatprep.mubr.msk.f32.mxu1 %vm12893_vm13, %v12930_v26 }
 0x9e6   : > { %8667 = vmatprep.subr.bf16.mxu1 %v12924_v47 }
 0x9e9   : > { %8669 = vmatpush3.bf16.msra.mxu1 %v12322_v43 }
 0x9ea   : > { %8676 = vmatprep.subr.bf16.mxu1 %v12924_v47 }
 0xaaf   : > { %v5832_v1 = vpop.f32.mrb[6].mxu1  ;;  %v5909_v20 = vpop.f32.mrb[10].mxu0 }
 0xab0   : > { %v5836_v2 = vadd.f32 %v5832_v1, %v5760_v3  ;;  %v8321_v41 = vpop.f32.mrb[7].mxu1  ;;  %v8332_v27 = vpop.f32.mrb[11].mxu0  ;;  %v5913_v7 = vadd.f32 %v5909_v20, %v5761_v35 }
 0xab2   : > { %v7980_v6 = vmul.f32 -1.442695, %v5836_v2  ;;  %v7982_v23 = vmul.f32 -1.442695, %v5913_v7 }
 0xab4   : > { %9333 = vpow2.f32 %v7980_v6  ;;  %v6237_v6 = vld [vmem:[#allocation4 + $0xb] sm:$0x1] }
 0xab5   : > { %9335 = vpow2.f32 %v7982_v23 }
 0xab7   : > { %v5986_v34 = vpop.f32.mrb[8].mxu1 }
 0xab8   : > { %v8343_v25 = vpop.f32.mrb[9].mxu1  ;;  %v5987_v18 = vadd.f32 %v5986_v34, %v12399_v61 }
 0xabe   : > { %v9334_v55 = vpop.eup %9333 }
 0xabf   : > { %v5840_v57 = vadd.f32 1.0, %v9334_v55  ;;  %v9336_v49 = vpop.eup %9335 }
 0xac0   : > { %v5917_v45 = vadd.f32 1.0, %v9336_v49 }
 0xac1   : > { %9337 = vrcp.f32 %v5840_v57 }
 0xac2   : > { %9339 = vrcp.f32 %v5917_v45 }
 0xacb   : > { %v9338_v11 = vpop.eup %9337 }
 0xacc   : > { %v5990_v21 = vmul.f32 %v9338_v11, %v5987_v18  ;;  %v9340_v13 = vpop.eup %9339 }
 0xacd   : > { %v5993_v28 = vsub.f32 1.0, %v9340_v13  ;;  %v5995_v24 = vmul.f32 %v9340_v13, %v5757_v58  ;;  %v6236_v58 = vld [vmem:[#allocation4 + $0x3] sm:$0x1] }
 0xace   : > { %v5991_v60 = vadd.f32 %v5990_v21, %v5762_v52  ;;  %v6238_v21 = vld [vmem:[#allocation4 + $0x13] sm:$0x1] }
 0xad0   : > { %9341 = vtanh.f32 %v5991_v60 }
 0xada   : > { %v9342_v9 = vpop.eup %9341 }
 0xadb   : > { %v5994_v31 = vmul.f32 %v9342_v9, %v5993_v28 }
 0xadd   : > { %v5996_v39 = vadd.f32 %v5995_v24, %v5994_v31 }
 0xadf   : > { %5997 = vst.msk [vmem:[#allocation5 + $0x1] sm:$0x1] %vm5758_vm6, %v5996_v39  ;;  %8353 = vmatmul.mubr.msk.f32.vlgmr.msra.gmra.mrb[12].mxu0 %vm1001_vm7, %v5996_v39  ;;  %8364 = vmatmul.mubr.msk.f32.vlgmr.msra.gmra.mrb[10].mxu1 %vm1001_vm7, %v5996_v39 }
 0xae0   : > { %8672 = vmatpush3.bf16.msra.mxu0 %v12357_v63  ;;  %8374 = vmatprep.mubr.msk.f32.mxu0 %vm12893_vm13, %v12930_v26 }
 0xae1   : > { %8673 = vmatprep.subr.bf16.mxu0 %v12924_v47  ;;  %8678 = vmatpush3.bf16.msra.mxu1 %v12327_v51 }
 0xae2   : > { %8679 = vmatprep.subr.bf16.mxu1 %v12924_v47  ;;  %8385 = vmatprep.mubr.msk.f32.mxu1 %vm12893_vm13, %v12930_v26 }
 0xae4   : > { %8675 = vmatpush3.bf16.msra.mxu0 %v12370_v4 }
 0xae5   : > { %8682 = vmatprep.subr.bf16.mxu0 %v12924_v47  ;;  %8681 = vmatpush3.bf16.msra.mxu1 %v12340_v44 }
 0xae6   : > { %8688 = vmatprep.subr.bf16.mxu1 %v12924_v47 }
 0xae7   : > { %8375 = vmatmul.mubr.msk.f32.vlgmr.msra.gmra.mrb[14].mxu0 %vm1001_vm7, %v5996_v39 }
 0xae8   : > { %8684 = vmatpush3.bf16.msra.mxu0 %v12302_v37  ;;  %8396 = vmatprep.mubr.msk.f32.mxu0 %vm12893_vm13, %v12930_v26 }
 0xae9   : > { %8685 = vmatprep.subr.bf16.mxu0 %v12924_v47 }
 0xaec   : > { %8687 = vmatpush3.bf16.msra.mxu0 %v12322_v43 }
 0xaed   : > { %8694 = vmatprep.subr.bf16.mxu0 %v12924_v47 }
 0xbb2   : > { %v6070_v62 = vpop.f32.mrb[12].mxu0  ;;  %v6147_v33 = vpop.f32.mrb[10].mxu1 }
 0xbb3   : > { %v6074_v32 = vadd.f32 %v6070_v62, %v5998_v19  ;;  %v8354_v54 = vpop.f32.mrb[13].mxu0  ;;  %v8365_v8 = vpop.f32.mrb[11].mxu1  ;;  %v6151_v0 = vadd.f32 %v6147_v33, %v5999_v17 }
 0xbb5   : > { %v7985_v15 = vmul.f32 -1.442695, %v6074_v32  ;;  %v7987_v12 = vmul.f32 -1.442695, %v6151_v0 }
 0xbb7   : > { %9343 = vpow2.f32 %v7985_v15  ;;  %v6475_v15 = vld [vmem:[#allocation4 + $0xc] sm:$0x1] }
 0xbb8   : > { %9345 = vpow2.f32 %v7987_v12 }
 0xbba   : > { %v6224_v5 = vpop.f32.mrb[14].mxu0 }
 0xbbb   : > { %v8376_v29 = vpop.f32.mrb[15].mxu0  ;;  %v6225_v53 = vadd.f32 %v6224_v5, %v12399_v61 }
 0xbc1   : > { %v9344_v40 = vpop.eup %9343 }
 0xbc2   : > { %v6078_v10 = vadd.f32 1.0, %v9344_v40  ;;  %v9346_v30 = vpop.eup %9345 }
 0xbc3   : > { %v6155_v14 = vadd.f32 1.0, %v9346_v30 }
 0xbc4   : > { %9347 = vrcp.f32 %v6078_v10 }
 0xbc5   : > { %9349 = vrcp.f32 %v6155_v14 }
 0xbce   : > { %v9348_v46 = vpop.eup %9347 }
 0xbcf   : > { %v6228_v50 = vmul.f32 %v9348_v46, %v6225_v53  ;;  %v9350_v42 = vpop.eup %9349 }
 0xbd0   : > { %v6231_v56 = vsub.f32 1.0, %v9350_v42  ;;  %v6233_v22 = vmul.f32 %v9350_v42, %v5996_v39  ;;  %v6474_v39 = vld [vmem:[#allocation4 + $0x4] sm:$0x1] }
 0xbd1   : > { %v6229_v59 = vadd.f32 %v6228_v50, %v6000_v16  ;;  %v6476_v50 = vld [vmem:[#allocation4 + $0x14] sm:$0x1] }
 0xbd3   : > { %9351 = vtanh.f32 %v6229_v59 }
 0xbdd   : > { %v9352_v36 = vpop.eup %9351 }
 0xbde   : > { %v6232_v48 = vmul.f32 %v9352_v36, %v6231_v56 }
 0xbe0   : > { %v6234_v38 = vadd.f32 %v6233_v22, %v6232_v48 }
 0xbe2   : > { %6235 = vst.msk [vmem:[#allocation5 + $0x2] sm:$0x1] %vm5758_vm6, %v6234_v38  ;;  %8386 = vmatmul.mubr.msk.f32.vlgmr.msra.gmra.mrb[12].mxu1 %vm1001_vm7, %v6234_v38  ;;  %8397 = vmatmul.mubr.msk.f32.vlgmr.msra.gmra.mrb[16].mxu0 %vm1001_vm7, %v6234_v38 }
 0xbe3   : > { %8690 = vmatpush3.bf16.msra.mxu1 %v12357_v63  ;;  %8407 = vmatprep.mubr.msk.f32.mxu1 %vm12893_vm13, %v12930_v26 }
 0xbe4   : > { %8691 = vmatprep.subr.bf16.mxu1 %v12924_v47  ;;  %8696 = vmatpush3.bf16.msra.mxu0 %v12327_v51 }
 0xbe5   : > { %8697 = vmatprep.subr.bf16.mxu0 %v12924_v47  ;;  %8418 = vmatprep.mubr.msk.f32.mxu0 %vm12893_vm13, %v12930_v26 }
 0xbe7   : > { %8693 = vmatpush3.bf16.msra.mxu1 %v12370_v4 }
 0xbe8   : > { %8700 = vmatprep.subr.bf16.mxu1 %v12924_v47  ;;  %8699 = vmatpush3.bf16.msra.mxu0 %v12340_v44 }
 0xbe9   : > { %8706 = vmatprep.subr.bf16.mxu0 %v12924_v47 }
 0xbea   : > { %8408 = vmatmul.mubr.msk.f32.vlgmr.msra.gmra.mrb[14].mxu1 %vm1001_vm7, %v6234_v38 }
 0xbeb   : > { %8702 = vmatpush3.bf16.msra.mxu1 %v12302_v37  ;;  %8429 = vmatprep.mubr.msk.f32.mxu1 %vm12893_vm13, %v12930_v26 }
 0xbec   : > { %8703 = vmatprep.subr.bf16.mxu1 %v12924_v47 }
 0xbef   : > { %8705 = vmatpush3.bf16.msra.mxu1 %v12322_v43 }
 0xbf0   : > { %8712 = vmatprep.subr.bf16.mxu1 %v12924_v47 }
 0xcb5   : > { %v6308_v3 = vpop.f32.mrb[12].mxu1  ;;  %v6385_v1 = vpop.f32.mrb[16].mxu0 }
 0xcb6   : > { %v6312_v20 = vadd.f32 %v6308_v3, %v6236_v58  ;;  %v8387_v2 = vpop.f32.mrb[13].mxu1  ;;  %v8398_v41 = vpop.f32.mrb[17].mxu0  ;;  %v6389_v35 = vadd.f32 %v6385_v1, %v6237_v6 }
 0xcb8   : > { %v7990_v27 = vmul.f32 -1.442695, %v6312_v20  ;;  %v7992_v7 = vmul.f32 -1.442695, %v6389_v35 }
 0xcba   : > { %9353 = vpow2.f32 %v7990_v27  ;;  %v6713_v27 = vld [vmem:[#allocation4 + $0xd] sm:$0x1] }
 0xcbb   : > { %9355 = vpow2.f32 %v7992_v7 }
 0xcbd   : > { %v6462_v23 = vpop.f32.mrb[14].mxu1 }
 0xcbe   : > { %v8409_v34 = vpop.f32.mrb[15].mxu1  ;;  %v6463_v45 = vadd.f32 %v6462_v23, %v12399_v61 }
 0xcc4   : > { %v9354_v25 = vpop.eup %9353 }
 0xcc5   : > { %v6316_v55 = vadd.f32 1.0, %v9354_v25  ;;  %v9356_v57 = vpop.eup %9355 }
 0xcc6   : > { %v6393_v49 = vadd.f32 1.0, %v9356_v57 }
 0xcc7   : > { %9357 = vrcp.f32 %v6316_v55 }
 0xcc8   : > { %9359 = vrcp.f32 %v6393_v49 }
 0xcd1   : > { %v9358_v18 = vpop.eup %9357 }
 0xcd2   : > { %v6466_v11 = vmul.f32 %v9358_v18, %v6463_v45  ;;  %v9360_v60 = vpop.eup %9359 }
 0xcd3   : > { %v6469_v13 = vsub.f32 1.0, %v9360_v60  ;;  %v6471_v31 = vmul.f32 %v9360_v60, %v6234_v38  ;;  %v6712_v38 = vld [vmem:[#allocation4 + $0x5] sm:$0x1] }
 0xcd4   : > { %v6467_v52 = vadd.f32 %v6466_v11, %v6238_v21  ;;  %v6714_v11 = vld [vmem:[#allocation4 + $0x15] sm:$0x1] }
 0xcd6   : > { %9361 = vtanh.f32 %v6467_v52 }
 0xce0   : > { %v9362_v28 = vpop.eup %9361 }
 0xce1   : > { %v6470_v9 = vmul.f32 %v9362_v28, %v6469_v13 }
 0xce3   : > { %v6472_v24 = vadd.f32 %v6471_v31, %v6470_v9 }
 0xce5   : > { %6473 = vst.msk [vmem:[#allocation5 + $0x3] sm:$0x1] %vm5758_vm6, %v6472_v24  ;;  %8419 = vmatmul.mubr.msk.f32.vlgmr.msra.gmra.mrb[18].mxu0 %vm1001_vm7, %v6472_v24  ;;  %8430 = vmatmul.mubr.msk.f32.vlgmr.msra.gmra.mrb[16].mxu1 %vm1001_vm7, %v6472_v24 }
 0xce6   : > { %8708 = vmatpush3.bf16.msra.mxu0 %v12357_v63  ;;  %8440 = vmatprep.mubr.msk.f32.mxu0 %vm12893_vm13, %v12930_v26 }
 0xce7   : > { %8709 = vmatprep.subr.bf16.mxu0 %v12924_v47  ;;  %8714 = vmatpush3.bf16.msra.mxu1 %v12327_v51 }
 0xce8   : > { %8715 = vmatprep.subr.bf16.mxu1 %v12924_v47  ;;  %8451 = vmatprep.mubr.msk.f32.mxu1 %vm12893_vm13, %v12930_v26 }
 0xcea   : > { %8711 = vmatpush3.bf16.msra.mxu0 %v12370_v4 }
 0xceb   : > { %8718 = vmatprep.subr.bf16.mxu0 %v12924_v47  ;;  %8717 = vmatpush3.bf16.msra.mxu1 %v12340_v44 }
 0xcec   : > { %8724 = vmatprep.subr.bf16.mxu1 %v12924_v47 }
 0xced   : > { %8441 = vmatmul.mubr.msk.f32.vlgmr.msra.gmra.mrb[20].mxu0 %vm1001_vm7, %v6472_v24 }
 0xcee   : > { %8720 = vmatpush3.bf16.msra.mxu0 %v12302_v37  ;;  %8462 = vmatprep.mubr.msk.f32.mxu0 %vm12893_vm13, %v12930_v26 }
 0xcef   : > { %8721 = vmatprep.subr.bf16.mxu0 %v12924_v47 }
 0xcf2   : > { %8723 = vmatpush3.bf16.msra.mxu0 %v12322_v43 }
 0xcf3   : > { %8730 = vmatprep.subr.bf16.mxu0 %v12924_v47 }
 0xdb8   : > { %v6546_v19 = vpop.f32.mrb[18].mxu0  ;;  %v6623_v62 = vpop.f32.mrb[16].mxu1 }
 0xdb9   : > { %v6550_v33 = vadd.f32 %v6546_v19, %v6474_v39  ;;  %v8420_v32 = vpop.f32.mrb[19].mxu0  ;;  %v8431_v54 = vpop.f32.mrb[17].mxu1  ;;  %v6627_v17 = vadd.f32 %v6623_v62, %v6475_v15 }
 0xdba   : > { %v6951_v32 = vld [vmem:[#allocation4 + $0xe] sm:$0x1] }
 0xdbb   : > { %v7995_v8 = vmul.f32 -1.442695, %v6550_v33  ;;  %v7997_v0 = vmul.f32 -1.442695, %v6627_v17 }
 0xdbd   : > { %9363 = vpow2.f32 %v7995_v8 }
 0xdbe   : > { %9365 = vpow2.f32 %v7997_v0 }
 0xdc0   : > { %v6700_v12 = vpop.f32.mrb[20].mxu0 }
 0xdc1   : > { %v8442_v5 = vpop.f32.mrb[21].mxu0  ;;  %v6701_v14 = vadd.f32 %v6700_v12, %v12399_v61 }
 0xdc7   : > { %v9364_v29 = vpop.eup %9363 }
 0xdc8   : > { %v6554_v40 = vadd.f32 1.0, %v9364_v29  ;;  %v9366_v10 = vpop.eup %9365 }
 0xdc9   : > { %v6631_v30 = vadd.f32 1.0, %v9366_v10  ;;  %v6952_v10 = vld [vmem:[#allocation4 + $0x16] sm:$0x1] }
 0xdca   : > { %9367 = vrcp.f32 %v6554_v40 }
 0xdcb   : > { %9369 = vrcp.f32 %v6631_v30 }
 0xdd4   : > { %v9368_v53 = vpop.eup %9367 }
 0xdd5   : > { %v6704_v46 = vmul.f32 %v9368_v53, %v6701_v14  ;;  %v9370_v59 = vpop.eup %9369 }
 0xdd6   : > { %v6707_v42 = vsub.f32 1.0, %v9370_v59  ;;  %v6709_v48 = vmul.f32 %v9370_v59, %v6472_v24 }
 0xdd7   : > { %v6705_v16 = vadd.f32 %v6704_v46, %v6476_v50 }
 0xdd9   : > { %9371 = vtanh.f32 %v6705_v16 }
 0xde3   : > { %v9372_v56 = vpop.eup %9371 }
 0xde4   : > { %v6708_v36 = vmul.f32 %v9372_v56, %v6707_v42  ;;  %v7428_v42 = vld [vmem:[%s12932_s4 + $0x8] sm:$0xff]  ;;  %v7429_v56 = vld [vmem:[%s12932_s4 + $0x10] sm:$0xff] }
 0xde6   : > { %v6710_v22 = vadd.f32 %v6709_v48, %v6708_v36  ;;  %v7430_v36 = vld [vmem:[%s12932_s4 + $0x18] sm:$0xff] }
 0xde7   : > { %v8770_v48 = vpack.c.bf16 %v7430_v36, %v7429_v56  ;;  %v8026_v36 = vld [vmem:[#allocation8 + $0x1] ss:$0 sm:$0xff] }
 0xde8   : > { %6711 = vst.msk [vmem:[#allocation5 + $0x4] sm:$0x1] %vm5758_vm6, %v6710_v22  ;;  %8452 = vmatmul.mubr.msk.f32.vlgmr.msra.gmra.mrb[18].mxu1 %vm1001_vm7, %v6710_v22  ;;  %8463 = vmatmul.mubr.msk.f32.vlgmr.msra.gmra.mrb[22].mxu0 %vm1001_vm7, %v6710_v22 }
 0xde9   : > { %8726 = vmatpush3.bf16.msra.mxu1 %v12357_v63  ;;  %8473 = vmatprep.mubr.msk.f32.mxu1 %vm12893_vm13, %v12930_v26 }
 0xdea   : > { %8727 = vmatprep.subr.bf16.mxu1 %v12924_v47  ;;  %8732 = vmatpush3.bf16.msra.mxu0 %v12327_v51 }
 0xdeb   : > { %8733 = vmatprep.subr.bf16.mxu0 %v12924_v47  ;;  %8484 = vmatprep.mubr.msk.f32.mxu0 %vm12893_vm13, %v12930_v26 }
 0xded   : > { %8729 = vmatpush3.bf16.msra.mxu1 %v12370_v4 }
 0xdee   : > { %8736 = vmatprep.subr.bf16.mxu1 %v12924_v47  ;;  %8735 = vmatpush3.bf16.msra.mxu0 %v12340_v44 }
 0xdef   : > { %8742 = vmatprep.subr.bf16.mxu0 %v12924_v47 }
 0xdf0   : > { %8474 = vmatmul.mubr.msk.f32.vlgmr.msra.gmra.mrb[20].mxu1 %vm1001_vm7, %v6710_v22 }
 0xdf1   : > { %8738 = vmatpush3.bf16.msra.mxu1 %v12302_v37  ;;  %8495 = vmatprep.mubr.msk.f32.mxu1 %vm12893_vm13, %v12930_v26 }
 0xdf2   : > { %8739 = vmatprep.subr.bf16.mxu1 %v12924_v47 }
 0xdf5   : > { %8741 = vmatpush3.bf16.msra.mxu1 %v12322_v43 }
 0xdf6   : > { %8748 = vmatprep.subr.bf16.mxu1 %v12924_v47 }
 0xebb   : > { %v6784_v58 = vpop.f32.mrb[18].mxu1  ;;  %v6861_v3 = vpop.f32.mrb[22].mxu0 }
 0xebc   : > { %v6788_v1 = vadd.f32 %v6784_v58, %v6712_v38  ;;  %v8453_v20 = vpop.f32.mrb[19].mxu1  ;;  %v8464_v2 = vpop.f32.mrb[23].mxu0  ;;  %v6865_v6 = vadd.f32 %v6861_v3, %v6713_v27 }
 0xebe   : > { %v8000_v41 = vmul.f32 -1.442695, %v6788_v1  ;;  %v8002_v35 = vmul.f32 -1.442695, %v6865_v6 }
 0xec0   : > { %9373 = vpow2.f32 %v8000_v41  ;;  %v7189_v41 = vld [vmem:[#allocation4 + $0xf] sm:$0x1] }
 0xec1   : > { %9375 = vpow2.f32 %v8002_v35 }
 0xec3   : > { %v6938_v7 = vpop.f32.mrb[20].mxu1 }
 0xec4   : > { %v8475_v23 = vpop.f32.mrb[21].mxu1  ;;  %v6939_v49 = vadd.f32 %v6938_v7, %v12399_v61 }
 0xeca   : > { %v9374_v34 = vpop.eup %9373 }
 0xecb   : > { %v6792_v25 = vadd.f32 1.0, %v9374_v34  ;;  %v9376_v55 = vpop.eup %9375 }
 0xecc   : > { %v6869_v57 = vadd.f32 1.0, %v9376_v55 }
 0xecd   : > { %9377 = vrcp.f32 %v6792_v25 }
 0xece   : > { %9379 = vrcp.f32 %v6869_v57 }
 0xed7   : > { %v9378_v45 = vpop.eup %9377 }
 0xed8   : > { %v6942_v18 = vmul.f32 %v9378_v45, %v6939_v49  ;;  %v9380_v52 = vpop.eup %9379 }
 0xed9   : > { %v6945_v60 = vsub.f32 1.0, %v9380_v52  ;;  %v6947_v9 = vmul.f32 %v9380_v52, %v6710_v22  ;;  %v7188_v22 = vld [vmem:[#allocation4 + $0x7] sm:$0x1] }
 0xeda   : > { %v6943_v21 = vadd.f32 %v6942_v18, %v6714_v11  ;;  %v7190_v18 = vld [vmem:[#allocation4 + $0x17] sm:$0x1] }
 0xedc   : > { %9381 = vtanh.f32 %v6943_v21 }
 0xee6   : > { %v9382_v13 = vpop.eup %9381 }
 0xee7   : > { %v6946_v28 = vmul.f32 %v9382_v13, %v6945_v60 }
 0xee9   : > { %v6948_v31 = vadd.f32 %v6947_v9, %v6946_v28 }
 0xeeb   : > { %6949 = vst.msk [vmem:[#allocation5 + $0x5] sm:$0x1] %vm5758_vm6, %v6948_v31  ;;  %8485 = vmatmul.mubr.msk.f32.vlgmr.msra.gmra.mrb[24].mxu0 %vm1001_vm7, %v6948_v31  ;;  %8496 = vmatmul.mubr.msk.f32.vlgmr.msra.gmra.mrb[22].mxu1 %vm1001_vm7, %v6948_v31 }
 0xeec   : > { %8744 = vmatpush3.bf16.msra.mxu0 %v12357_v63  ;;  %8506 = vmatprep.mubr.msk.f32.mxu0 %vm12893_vm13, %v12930_v26 }
 0xeed   : > { %8745 = vmatprep.subr.bf16.mxu0 %v12924_v47  ;;  %8750 = vmatpush3.bf16.msra.mxu1 %v12327_v51  ;;  %v6950_v51 = vld [vmem:[#allocation4 + $0x6] sm:$0x1] }
 0xeee   : > { %8751 = vmatprep.subr.bf16.mxu1 %v12924_v47  ;;  %8517 = vmatprep.mubr.msk.f32.mxu1 %vm12893_vm13, %v12930_v26 }
 0xef0   : > { %8747 = vmatpush3.bf16.msra.mxu0 %v12370_v4 }
 0xef1   : > { %8754 = vmatprep.subr.bf16.mxu0 %v12924_v47  ;;  %8753 = vmatpush3.bf16.msra.mxu1 %v12340_v44 }
 0xef2   : > { %8760 = vmatprep.subr.bf16.mxu1 %v12924_v47 }
 0xef3   : > { %8507 = vmatmul.mubr.msk.f32.vlgmr.msra.gmra.mrb[26].mxu0 %vm1001_vm7, %v6948_v31 }
 0xef4   : > { %8756 = vmatpush3.bf16.msra.mxu0 %v12302_v37  ;;  %8528 = vmatprep.mubr.msk.f32.mxu0 %vm12893_vm13, %v12930_v26 }
 0xef5   : > { %8757 = vmatprep.subr.bf16.mxu0 %v12924_v47 }
 0xef8   : > { %8759 = vmatpush3.bf16.msra.mxu0 %v12322_v43 }
 0xef9   : > { %8766 = vmatprep.subr.bf16.mxu0 %v12924_v47 }
 0xfbe   : > { %v7022_v24 = vpop.f32.mrb[24].mxu0  ;;  %v7099_v39 = vpop.f32.mrb[22].mxu1 }
 0xfbf   : > { %v7026_v19 = vadd.f32 %v7022_v24, %v6950_v51  ;;  %v8486_v44 = vpop.f32.mrb[25].mxu0  ;;  %v8497_v62 = vpop.f32.mrb[23].mxu1  ;;  %v7103_v54 = vadd.f32 %v7099_v39, %v6951_v32  ;;  %v7527_v51 = vld [vmem:[%s12933_s22 + $0x8] sm:$0xff]  ;;  %v8020_v24 = vld [vmem:[%s12932_s4 + $0x20] sm:$0xff]  ;;  %v8022_v32 = vld [vmem:[%s12932_s4 + $0x30] sm:$0xff] }
 0xfc0   : > { %v7528_v44 = vld [vmem:[%s12933_s22 + $0x10] sm:$0xff]  ;;  %v7529_v62 = vld [vmem:[%s12933_s22 + $0x18] sm:$0xff] }
 0xfc1   : > { %v8005_v33 = vmul.f32 -1.442695, %v7026_v19  ;;  %v8007_v37 = vmul.f32 -1.442695, %v7103_v54  ;;  %v8021_v19 = vld [vmem:[%s12932_s4 + $0x28] sm:$0xff]  ;;  %v8023_v54 = vld [vmem:[%s12932_s4 + $0x38] sm:$0xff] }
 0xfc3   : > { %9383 = vpow2.f32 %v8005_v33  ;;  %v8779_v33 = vpack.c.bf16 %v8021_v19, %v8020_v24 }
 0xfc4   : > { %9385 = vpow2.f32 %v8007_v37  ;;  %v8776_v37 = vpack.c.bf16 %v7529_v62, %v7528_v44 }
 0xfc6   : > { %v7176_v8 = vpop.f32.mrb[26].mxu0 }
 0xfc7   : > { %v8508_v15 = vpop.f32.mrb[27].mxu0  ;;  %v7177_v5 = vadd.f32 %v7176_v8, %v12399_v61  ;;  %v8782_v8 = vpack.c.bf16 %v8023_v54, %v8022_v32 }
 0xfc8   : > { %v8015_v15 = vld [vmem:[#allocation6] ss:$0 sm:$0xff] }
 0xfcd   : > { %v9384_v17 = vpop.eup %9383 }
 0xfce   : > { %v7030_v0 = vadd.f32 1.0, %v9384_v17  ;;  %v9386_v43 = vpop.eup %9385 }
 0xfcf   : > { %v7107_v12 = vadd.f32 1.0, %v9386_v43 }
 0xfd0   : > { %9387 = vrcp.f32 %v7030_v0  ;;  %v8016_v0 = vld [vmem:[#allocation8] ss:$0 sm:$0xff] }
 0xfd1   : > { %9389 = vrcp.f32 %v7107_v12 }
 0xfda   : > { %v9388_v29 = vpop.eup %9387 }
 0xfdb   : > { %v7180_v40 = vmul.f32 %v9388_v29, %v7177_v5  ;;  %v9390_v14 = vpop.eup %9389 }
 0xfdc   : > { %v7183_v53 = vsub.f32 1.0, %v9390_v14  ;;  %v7185_v16 = vmul.f32 %v9390_v14, %v6948_v31 }
 0xfdd   : > { %v7181_v30 = vadd.f32 %v7180_v40, %v6952_v10 }
 0xfdf   : > { %9391 = vtanh.f32 %v7181_v30 }
 0xfe9   : > { %v9392_v46 = vpop.eup %9391 }
 0xfea   : > { %v7184_v50 = vmul.f32 %v9392_v46, %v7183_v53  ;;  %v8028_v53 = vld [vmem:[%s12933_s22 + $0x20] sm:$0xff]  ;;  %v8029_v46 = vld [vmem:[%s12933_s22 + $0x28] sm:$0xff] }
 0xfec   : > { %v7186_v59 = vadd.f32 %v7185_v16, %v7184_v50  ;;  %v8030_v50 = vld [vmem:[%s12933_s22 + $0x30] sm:$0xff]  ;;  %v8785_v16 = vpack.c.bf16 %v8029_v46, %v8028_v53 }
 0xfee   : > { %7187 = vst.msk [vmem:[#allocation5 + $0x6] sm:$0x1] %vm5758_vm6, %v7186_v59  ;;  %8518 = vmatmul.mubr.msk.f32.vlgmr.msra.gmra.mrb[24].mxu1 %vm1001_vm7, %v7186_v59  ;;  %8529 = vmatmul.mubr.msk.f32.vlgmr.msra.gmra.mrb[28].mxu0 %vm1001_vm7, %v7186_v59 }
 0xfef   : > { %8762 = vmatpush3.bf16.msra.mxu1 %v12357_v63  ;;  %8539 = vmatprep.mubr.msk.f32.mxu1 %vm12893_vm13, %v12930_v26  ;;  %v7427_v63 = vld [vmem:[%s12932_s4] sm:$0xff] }
 0xff0   : > { %8763 = vmatprep.subr.bf16.mxu1 %v12924_v47  ;;  %8550 = vmatprep.mubr.msk.f32.mxu0 %vm12893_vm13, %v12930_v26 }
 0xff3   : > { %8765 = vmatpush3.bf16.msra.mxu1 %v12370_v4  ;;  %v8767_v4 = vpack.c.bf16 %v7428_v42, %v7427_v63  ;;  %v8025_v42 = vld [vmem:[#allocation6 + $0x1] ss:$0 sm:$0xff] }
 0xff4   : > { %8772 = vmatprep.subr.bf16.mxu1 %v12924_v47 }
 0xff5   : > { %8768 = vmatpush3.bf16.msra.mxu0 %v8767_v4 }
 0xff6   : > { %8540 = vmatmul.mubr.msk.f32.vlgmr.msra.gmra.mrb[26].mxu1 %vm1001_vm7, %v7186_v59  ;;  %8769 = vmatprep.subr.bf16.mxu0 %v12924_v47 }
 0xff7   : > { %8561 = vmatprep.mubr.msk.f32.mxu1 %vm12893_vm13, %v12930_v26 }
 0xff9   : > { %8771 = vmatpush3.bf16.msra.mxu0 %v8770_v48 }
 0xffa   : > { %8778 = vmatprep.subr.bf16.mxu0 %v12924_v47 }
0x10c1   : > { %v7260_v38 = vpop.f32.mrb[24].mxu1  ;;  %v7337_v58 = vpop.f32.mrb[28].mxu0 }
0x10c2   : > { %v7264_v3 = vadd.f32 %v7260_v38, %v7188_v22  ;;  %v8519_v1 = vpop.f32.mrb[25].mxu1  ;;  %v8530_v20 = vpop.f32.mrb[29].mxu0  ;;  %v7341_v27 = vadd.f32 %v7337_v58, %v7189_v41 }
0x10c4   : > { %v8010_v2 = vmul.f32 -1.442695, %v7264_v3  ;;  %v8012_v6 = vmul.f32 -1.442695, %v7341_v27 }
0x10c6   : > { %9393 = vpow2.f32 %v8010_v2 }
0x10c7   : > { %9395 = vpow2.f32 %v8012_v6 }
0x10c9   : > { %v7414_v35 = vpop.f32.mrb[26].mxu1 }
0x10ca   : > { %v8541_v7 = vpop.f32.mrb[27].mxu1  ;;  %v7415_v57 = vadd.f32 %v7414_v35, %v12399_v61  ;;  %v7526_v61 = vld [vmem:[%s12933_s22] sm:$0xff] }
0x10cb   : > { %v8773_v39 = vpack.c.bf16 %v7527_v51, %v7526_v61  ;;  %v8032_v35 = vld [vmem:[#allocation10 + $0x1] ss:$0 sm:$0xff] }
0x10cd   : > { %8774 = vmatpush3.bf16.msra.mxu1 %v8773_v39 }
0x10ce   : > { %8775 = vmatprep.subr.bf16.mxu1 %v12924_v47 }
0x10d0   : > { %v9394_v23 = vpop.eup %9393 }
0x10d1   : > { %v7268_v34 = vadd.f32 1.0, %v9394_v23  ;;  %v9396_v25 = vpop.eup %9395  ;;  %8777 = vmatpush3.bf16.msra.mxu1 %v8776_v37 }
0x10d2   : > { %v7345_v55 = vadd.f32 1.0, %v9396_v25  ;;  %8784 = vmatprep.subr.bf16.mxu1 %v12924_v47 }
0x10d3   : > { %9397 = vrcp.f32 %v7268_v34 }
0x10d4   : > { %9399 = vrcp.f32 %v7345_v55 }
0x10dd   : > { %v9398_v49 = vpop.eup %9397 }
0x10de   : > { %v7418_v45 = vmul.f32 %v9398_v49, %v7415_v57  ;;  %v9400_v21 = vpop.eup %9399 }
0x10df   : > { %v7421_v52 = vsub.f32 1.0, %v9400_v21  ;;  %v7423_v13 = vmul.f32 %v9400_v21, %v7186_v59  ;;  %v8031_v59 = vld [vmem:[%s12933_s22 + $0x38] sm:$0xff] }
0x10e0   : > { %v7419_v11 = vadd.f32 %v7418_v45, %v7190_v18  ;;  %v8788_v63 = vpack.c.bf16 %v8031_v59, %v8030_v50 }
0x10e2   : > { %9401 = vtanh.f32 %v7419_v11 }
0x10ec   : > { %v9402_v60 = vpop.eup %9401 }
0x10ed   : > { %v7422_v28 = vmul.f32 %v9402_v60, %v7421_v52 }
0x10ef   : > { %v7424_v9 = vadd.f32 %v7423_v13, %v7422_v28 }
0x10f1   : > { %7425 = vst.msk [vmem:[#allocation5 + $0x7] sm:$0x1] %vm5758_vm6, %v7424_v9 }
0x10f8   : > { %v7426_v31 = vld [vmem:[#allocation5] sm:$0xff] }
0x10f9   : > { %8551 = vmatmul.mubr.msk.f32.vlgmr.msra.gmra.mrb[30].mxu0 %vm1001_vm7, %v7426_v31 }
0x10fa   : > { %8572 = vmatprep.mubr.msk.f32.mxu0 %vm12893_vm13, %v12930_v26  ;;  %8780 = vmatpush3.bf16.msra.mxu0 %v8779_v33 }
0x10fb   : > { %8781 = vmatprep.subr.bf16.mxu0 %v12924_v47 }
0x10fe   : > { %8783 = vmatpush3.bf16.msra.mxu0 %v8782_v8 }
0x11cc   : > { %v7500_v17 = vpop.f32.mrb[30].mxu0 }
0x11cd   : > { %v7511_v43 = vmul.f32 %v8015_v15, %v7500_v17  ;;  %v8552_v12 = vpop.f32.mrb[31].mxu0 }
0x11cf   : > { %v7519_v5 = vadd.f32 %v8016_v0, %v7511_v43 }
0x11d1   : > { %v7521_v29 = vmin.f32 %v7519_v5, 0.0  ;;  %vm7520_vm8 = vcmp.gt.f32.partialorder %v7519_v5, 0.0 }
0x11d3   : > { %v7522_v40 = vmul.f32 1.442695, %v7521_v29 }
0x11d5   : > { %9403 = vpow2.f32 %v7522_v40 }
0x11df   : > { %v9404_v10 = vpop.eup %9403 }
0x11e0   : > { %v8017_v30 = vadd.f32 -1.0, %v9404_v10 }
0x11e2   : > { %v7525_v14 = vsel %vm7520_vm8, %v7519_v5, %v8017_v30 }
0x11e3   : > { %8562 = vmatmul.mubr.msk.f32.vlgmr.msra.gmra.mrb[28].mxu1 %vm1001_vm7, %v7525_v14  ;;  %8573 = vmatmul.mubr.msk.f32.vlgmr.msra.gmra.mrb[32].mxu0 %vm1001_vm7, %v7525_v14 }
0x11e4   : > { %8583 = vmatprep.mubr.msk.f32.mxu1 %vm12893_vm13, %v12930_v26  ;;  %8786 = vmatpush3.bf16.msra.mxu1 %v8785_v16  ;;  %v8018_v26 = vld [vmem:[#allocation10] ss:$0 sm:$0xff] }
0x11e5   : > { %8787 = vmatprep.subr.bf16.mxu1 %v12924_v47 }
0x11e8   : > { %8789 = vmatpush3.bf16.msra.mxu1 %v8788_v63 }
0x12b6   : > { %v7606_v56 = vpop.f32.mrb[28].mxu1  ;;  %v7716_v4 = vpop.f32.mrb[32].mxu0 }
0x12b7   : > { %v7607_v48 = vadd.f32 %v8018_v26, %v7606_v56  ;;  %v7728_v22 = vmul.f32 %v8025_v42, %v7716_v4  ;;  %v8563_v38 = vpop.f32.mrb[29].mxu1  ;;  %v8574_v58 = vpop.f32.mrb[33].mxu0 }
0x12b9   : > { %v7737_v3 = vadd.f32 %v8026_v36, %v7728_v22  ;;  %7610 = vxpose.xlu0.b32.start.end [1/1] (short) (narrow) %v7607_v48, 16 }
0x12bb   : > { %v7739_v1 = vmin.f32 %v7737_v3, 0.0  ;;  %vm7738_vm9 = vcmp.gt.f32.partialorder %v7737_v3, 0.0 }
0x12bd   : > { %v7740_v20 = vmul.f32 1.442695, %v7739_v1 }
0x12bf   : > { %9405 = vpow2.f32 %v7740_v20 }
0x12c9   : > { %v9406_v2 = vpop.eup %9405 }
0x12ca   : > { %v8027_v41 = vadd.f32 -1.0, %v9406_v2 }
0x12cc   : > { %v7743_v47 = vsel %vm7738_vm9, %v7737_v3, %v8027_v41 }
0x12cd   : > { %8584 = vmatmul.mubr.msk.f32.vlgmr.msra.gmra.mrb[30].mxu1 %vm1001_vm7, %v7743_v47 }
0x1339   : > { %v7626_v27 = vpop.trf.xlu0 }
0x133a   : > { %7642 = vst.msk [vmem:[%s727_s30] sm:$0xff] %vm995_vm4, %v7626_v27 }
0x133d   : > { %v7627_v6 = vpop.trf.xlu0 }
0x133e   : > { %7644 = vst.msk [vmem:[%s727_s30 + $0x8] sm:$0x1] %vm7643_vm10, %v7627_v6 }
0x13a0   : > { %v7826_v7 = vpop.f32.mrb[30].mxu1 }
0x13a1   : > { %v7827_v23 = vadd.f32 %v8032_v35, %v7826_v7  ;;  %v8585_v34 = vpop.f32.mrb[31].mxu1 }
0x13a3   : > { %7830 = vxpose.xlu0.b32.start.end [1/1] (short) (narrow) %v7827_v23, 16 }
0x1423   : > { %v7846_v25 = vpop.trf.xlu0 }
0x1424   : > { %8034 = vst.msk [vmem:[%s727_s30 + $0x10] sm:$0xff] %vm995_vm4, %v7846_v25 }
0x1427   : > { %v7847_v55 = vpop.trf.xlu0 }
0x1428   : > { %8035 = vst.msk [vmem:[%s727_s30 + $0x18] sm:$0x1] %vm7643_vm10, %v7847_v55 }
0x1429 PF: > { %s12935_s28 = sld [smem:[#allocation13_spill]] }
0x142f   : > { %s34_s3 = sadd.s32 1, %s12935_s28  }
0x1430   : > { %p31_p5 = scmp.ge.s32.totalorder %s34_s3, 4  }
0x1432   :  { %33 = sbr.rel (!%p31_p5) target bundleno = 13 (0xd), region = 159 }
0x1439   :  { %7886 = vsyncpa [#allocation7], 1 }
0x143a   :  { %7888 = vsyncpa [#allocation7 + $0x1], 1 }
0x143b   :  { %7889 = vsyncpa [#allocation9], 1 }

</bundles_post_ra>
